<compile_context>
chip_gen: v5e
topology: v5e:2x2
jax: 0.10.0
libtpu: 0.0.40
codegen_flags: <defaults>
</compile_context>

<pallas_src>
import functools
import math

import jax
import jax.numpy as jnp
from jax.experimental import pallas as pl
from jax.experimental.pallas import tpu as pltpu


# ----------------------------- model config (small test sizes) ---------------
D_MODEL = 128        # d_model    (t5-v1_1-large: 1024)
N_HEADS = 2          # num_heads  (large: 16)
D_HEAD = 64          # d_kv
D_INNER = N_HEADS * D_HEAD
D_FF = 256           # d_ff       (large: 2816, gated)
N_LAYERS = 2         # num_layers (large: 24)
VOCAB = 256          # vocab_size (large: 32128)
REL_BUCKETS = 32
REL_MAX_DIST = 128
LN_EPS = 1e-6
NEG_INF = -1e9


def _gelu_new(x):
    # T5 v1.1 "gelu_new" (tanh approximation) -- EUP-friendly on TPU.
    c = math.sqrt(2.0 / math.pi)
    return 0.5 * x * (1.0 + jnp.tanh(c * (x + 0.044715 * x * x * x)))


def _m_tile(m, cap=512):
    """Largest multiple of 8 dividing m, capped so the grid has >= 2 parallel steps."""
    if m <= 8:
        return m
    limit = min(cap, max(8, (m // 2) // 8 * 8))
    t = limit
    while t >= 8:
        if m % t == 0:
            return t
        t -= 8
    return m


# ----------------------------- fused attention sub-layer ---------------------
def _attn_block_kernel(x_ref, ln_ref, wqkv_ref, wo_ref, bias_ref, o_ref):
    """out = x + softmax(rms(x)Wq (rms(x)Wk)^T + bias) (rms(x)Wv) Wo   (one batch elt)."""
    x = x_ref[0]                                                  # (LP, D) f32 residual
    # fused T5 LayerNorm (RMSNorm: no mean subtraction, no bias)
    var = jnp.mean(x * x, axis=-1, keepdims=True)
    h = (x * jax.lax.rsqrt(var + LN_EPS) * ln_ref[...]).astype(jnp.bfloat16)
    # fused Q|K|V projection: bf16 MXU inputs, f32 accumulation, single K step -> direct store
    qkv = jnp.dot(h, wqkv_ref[...], preferred_element_type=jnp.float32)   # (LP, 3*H*Dh)

    acc = x                                                       # residual carried in f32
    for hd in range(N_HEADS):                                     # unrolled; MXU fed back-to-back
        q = qkv[:, hd * D_HEAD:(hd + 1) * D_HEAD]
        k = qkv[:, D_INNER + hd * D_HEAD:D_INNER + (hd + 1) * D_HEAD]
        v = qkv[:, 2 * D_INNER + hd * D_HEAD:2 * D_INNER + (hd + 1) * D_HEAD]
        # T5 attention has no 1/sqrt(d_k) scaling (folded into the init).
        s = jax.lax.dot_general(q, k, (((1,), (1,)), ((), ())),
                                preferred_element_type=jnp.float32) + bias_ref[hd]
        m = jnp.max(s, axis=-1, keepdims=True)
        p = jnp.exp(s - m)
        p = p * pl.reciprocal(jnp.sum(p, axis=-1, keepdims=True), approx=True)
        ctx = jnp.dot(p.astype(jnp.bfloat16), v.astype(jnp.bfloat16),
                      preferred_element_type=jnp.float32)          # (LP, Dh)
        # fold the output projection per head: avoids a head-concat relayout entirely
        acc = acc + jnp.dot(ctx.astype(jnp.bfloat16),
                            wo_ref[hd * D_HEAD:(hd + 1) * D_HEAD, :],
                            preferred_element_type=jnp.float32)
    o_ref[0] = acc


def attention_block(x, ln_w, w_qkv, w_o, bias):
    """x: (B, LP, D) f32 residual -> x + attention sub-layer output (f32)."""
    B, LP, D = x.shape
    H = bias.shape[0]
    single = pl.Buffered(1)   # grid-invariant operands: no double buffering (halves VMEM residency)
    return pl.pallas_call(
        _attn_block_kernel,
        out_shape=jax.ShapeDtypeStruct((B, LP, D), jnp.float32),
        grid=(B,),
        in_specs=[
            pl.BlockSpec((1, LP, D), lambda b: (b, 0, 0)),
            pl.BlockSpec((1, D), lambda b: (0, 0)),
            pl.BlockSpec((D, 3 * D_INNER), lambda b: (0, 0), pipeline_mode=single),
            pl.BlockSpec((D_INNER, D), lambda b: (0, 0), pipeline_mode=single),
            pl.BlockSpec((H, LP, LP), lambda b: (0, 0, 0), pipeline_mode=single),
        ],
        out_specs=pl.BlockSpec((1, LP, D), lambda b: (b, 0, 0)),
        compiler_params=pltpu.CompilerParams(dimension_semantics=("parallel",)),
    )(x, ln_w.reshape(1, D), w_qkv, w_o, bias)


# ----------------------------- fused gated-GELU FFN sub-layer ----------------
def _ffn_block_kernel(x_ref, ln_ref, wi0_ref, wi1_ref, wo_ref, o_ref):
    """out = x + (gelu_new(rms(x)@wi0) * (rms(x)@wi1)) @ wo."""
    x = x_ref[...]                                                 # (tm, D) f32 residual
    var = jnp.mean(x * x, axis=-1, keepdims=True)
    h = (x * jax.lax.rsqrt(var + LN_EPS) * ln_ref[...]).astype(jnp.bfloat16)
    g = _gelu_new(jnp.dot(h, wi0_ref[...], preferred_element_type=jnp.float32))
    u = (g * jnp.dot(h, wi1_ref[...], preferred_element_type=jnp.float32)).astype(jnp.bfloat16)
    o_ref[...] = x + jnp.dot(u, wo_ref[...], preferred_element_type=jnp.float32)


def ffn_block(x, ln_w, wi0, wi1, wo):
    """x: (M, D) f32 residual -> x + FFN sub-layer output (f32)."""
    M, D = x.shape
    F = wi0.shape[1]
    tm = _m_tile(M, cap=256)   # >= 2 parallel steps for the 2-TC split / pipeline overlap
    single = pl.Buffered(1)
    # NOTE: at t5-large shapes (D=1024, F=2816) also tile d_ff or set vmem_limit_bytes on v5e.
    return pl.pallas_call(
        _ffn_block_kernel,
        out_shape=jax.ShapeDtypeStruct((M, D), jnp.float32),
        grid=(M // tm,),
        in_specs=[
            pl.BlockSpec((tm, D), lambda i: (i, 0)),
            pl.BlockSpec((1, D), lambda i: (0, 0)),
            pl.BlockSpec((D, F), lambda i: (0, 0), pipeline_mode=single),
            pl.BlockSpec((D, F), lambda i: (0, 0), pipeline_mode=single),
            pl.BlockSpec((F, D), lambda i: (0, 0), pipeline_mode=single),
        ],
        out_specs=pl.BlockSpec((tm, D), lambda i: (i, 0)),
        compiler_params=pltpu.CompilerParams(dimension_semantics=("parallel",)),
    )(x, ln_w.reshape(1, D), wi0, wi1, wo)


# ----------------------------- final RMSNorm (T5 LayerNorm) ------------------
def _rmsnorm_kernel(x_ref, w_ref, o_ref, *, eps):
    x = x_ref[...]
    var = jnp.mean(x * x, axis=-1, keepdims=True)
    o_ref[...] = (x * jax.lax.rsqrt(var + eps) * w_ref[...]).astype(o_ref.dtype)


def pallas_rmsnorm(x, w, *, eps=LN_EPS):
    M, D = x.shape
    tm = _m_tile(M)
    return pl.pallas_call(
        functools.partial(_rmsnorm_kernel, eps=eps),
        out_shape=jax.ShapeDtypeStruct((M, D), jnp.float32),
        grid=(M // tm,),
        in_specs=[pl.BlockSpec((tm, D), lambda i: (i, 0)),
                  pl.BlockSpec((1, D), lambda i: (0, 0))],
        out_specs=pl.BlockSpec((tm, D), lambda i: (i, 0)),
        compiler_params=pltpu.CompilerParams(dimension_semantics=("parallel",)),
    )(x, w.reshape(1, D))


# ----------------------------- T5 relative position bias (plain JAX) ---------
def _relative_position_bucket(rel_pos, num_buckets=REL_BUCKETS, max_distance=REL_MAX_DIST):
    # bidirectional (encoder) bucketing, as in HF T5.
    num_buckets //= 2
    buckets = (rel_pos > 0).astype(jnp.int32) * num_buckets
    n = jnp.abs(rel_pos)
    max_exact = num_buckets // 2
    is_small = n < max_exact
    val_large = max_exact + (
        jnp.log(jnp.maximum(n, 1).astype(jnp.float32) / max_exact)
        / math.log(max_distance / max_exact)
        * (num_buckets - max_exact)
    ).astype(jnp.int32)
    val_large = jnp.minimum(val_large, num_buckets - 1)
    return buckets + jnp.where(is_small, n, val_large)


def compute_position_bias(rel_emb, L_valid, LP):
    """rel_emb: (REL_BUCKETS, H) -> additive bias (H, LP, LP); pad keys masked with -1e9."""
    ctx = jnp.arange(LP)[:, None]
    mem = jnp.arange(LP)[None, :]
    buckets = _relative_position_bucket(mem - ctx)                  # (LP, LP)
    bias = jnp.transpose(rel_emb[buckets], (2, 0, 1)).astype(jnp.float32)   # (H, LP, LP)
    key_valid = jnp.arange(LP) < L_valid
    return jnp.where(key_valid[None, None, :], bias, NEG_INF)


# ----------------------------- encoder forward --------------------------------
def t5_encoder(tokens, params):
    """Pallas equivalent of FrozenT5Embedder.forward on pre-tokenized ids.

    tokens: (B, L) int32 -> last_hidden_state (B, L, D_MODEL) f32.
    """
    # TODO(synk): the T5Tokenizer (string -> token ids) is host-side text processing with
    # no Pallas equivalent; pre-tokenized ids are taken as input.
    B, L = tokens.shape
    LP = ((L + 7) // 8) * 8                              # sublane-align the sequence length
    x = params["embedding"][tokens]                      # (B, L, D) gather (XLA)
    if LP != L:
        x = jnp.pad(x, ((0, 0), (0, LP - L), (0, 0)))
    # relative-position bias shared across layers (as in T5); padded key positions masked.
    bias = compute_position_bias(params["rel_bias"], L, LP)

    for layer in params["layers"]:
        # fused: RMSNorm + QKV + attention + out-proj + residual   (one pallas_call)
        x = attention_block(x, layer["ln_attn"], layer["w_qkv"], layer["w_attn_out"], bias)
        # fused: RMSNorm + gated-GELU FFN + residual                (one pallas_call)
        x = ffn_block(x.reshape(B * LP, D_MODEL), layer["ln_ff"],
                      layer["w_ff_in0"], layer["w_ff_in1"],
                      layer["w_ff_out"]).reshape(B, LP, D_MODEL)

    z = pallas_rmsnorm(x.reshape(B * LP, D_MODEL), params["ln_final"])
    return z.reshape(B, LP, D_MODEL)[:, :L, :]


# ----------------------------- synthetic parameters ---------------------------
def init_params(key):
    keys = jax.random.split(key, 7 * N_LAYERS + 2)
    ki = iter(keys)

    def w(k, shape, std):
        # Weights stored in bf16 (streamed in bf16; f32 accumulation in kernels).
        return (jax.random.normal(k, shape, jnp.float32) * std).astype(jnp.bfloat16)

    layers = []
    for _ in range(N_LAYERS):
        layers.append({
            "ln_attn": jnp.ones((D_MODEL,), jnp.float32),
            # T5 init scales: q ~ (d_model*d_kv)^-0.5, k/v ~ d_model^-0.5.
            # Column layout: [q heads | k heads | v heads], each head's Dh cols contiguous,
            # so the fused kernel slices Q/K/V per head without any transposes.
            "w_qkv": jnp.concatenate([
                w(next(ki), (D_MODEL, D_INNER), (D_MODEL * D_HEAD) ** -0.5),
                w(next(ki), (D_MODEL, D_INNER), D_MODEL ** -0.5),
                w(next(ki), (D_MODEL, D_INNER), D_MODEL ** -0.5),
            ], axis=1),
            "w_attn_out": w(next(ki), (D_INNER, D_MODEL), D_INNER ** -0.5),
            "ln_ff": jnp.ones((D_MODEL,), jnp.float32),
            "w_ff_in0": w(next(ki), (D_MODEL, D_FF), D_MODEL ** -0.5),
            "w_ff_in1": w(next(ki), (D_MODEL, D_FF), D_MODEL ** -0.5),
            "w_ff_out": w(next(ki), (D_FF, D_MODEL), D_FF ** -0.5),
        })
    return {
        "embedding": jax.random.normal(next(ki), (VOCAB, D_MODEL), jnp.float32),
        "rel_bias": jax.random.normal(next(ki), (REL_BUCKETS, N_HEADS), jnp.float32) * 0.5,
        "layers": layers,
        "ln_final": jnp.ones((D_MODEL,), jnp.float32),
    }


# ----------------------------- pure-JAX reference -----------------------------
def reference_encoder(tokens, params):
    def mm(a, b):  # mirrors the kernels: bf16 MXU inputs, f32 accumulation
        return jnp.dot(a.astype(jnp.bfloat16), b, preferred_element_type=jnp.float32)

    def rms(x, w):
        var = jnp.mean(x * x, axis=-1, keepdims=True)
        return x * jax.lax.rsqrt(var + LN_EPS) * w

    B, L = tokens.shape
    x = params["embedding"][tokens]
    bias = compute_position_bias(params["rel_bias"], L, L)      # unpadded -> nothing masked
    for layer in params["layers"]:
        h = rms(x, layer["ln_attn"]).reshape(B * L, D_MODEL)
        qkv = mm(h, layer["w_qkv"]).reshape(B, L, 3, N_HEADS, D_HEAD)
        q, k, v = qkv[:, :, 0], qkv[:, :, 1], qkv[:, :, 2]       # (B, L, H, Dh)
        s = jnp.einsum("bqhd,bkhd->bhqk", q, k) + bias[None]
        p = jax.nn.softmax(s, axis=-1)
        a = jnp.einsum("bhqk,bkhd->bqhd",
                       p.astype(jnp.bfloat16), v.astype(jnp.bfloat16),
                       preferred_element_type=jnp.float32).reshape(B * L, D_INNER)
        x = x + mm(a, layer["w_attn_out"]).reshape(B, L, D_MODEL)

        h = rms(x, layer["ln_ff"]).reshape(B * L, D_MODEL)
        u = _gelu_new(mm(h, layer["w_ff_in0"])) * mm(h, layer["w_ff_in1"])
        x = x + mm(u, layer["w_ff_out"]).reshape(B, L, D_MODEL)
    return rms(x, params["ln_final"])


if __name__ == "__main__":
    key = jax.random.PRNGKey(0)
    kp, kt = jax.random.split(key)

    B, L = 2, 77   # matches the module's max_length=77 padding (kernels pad 77 -> 80 internally)
    params = init_params(kp)
    # Deterministic synthetic token ids (the tokenizer itself is host-side).
    tokens = jax.random.randint(kt, (B, L), 0, VOCAB, dtype=jnp.int32)

    encoder = jax.jit(t5_encoder)
    z = jax.block_until_ready(encoder(tokens, params))

    assert z.shape == (B, L, D_MODEL), z.shape
    assert bool(jnp.all(jnp.isfinite(z)))

    ref = reference_encoder(tokens, params)
    err = float(jnp.max(jnp.abs(z - ref)))
    assert err < 5e-2, f"max abs err {err}"

    print("KERNEL_OK")
</pallas_src>

<mosaic_0001>
module attributes {stable_mosaic.version = 11 : i64} {
  func.func @_attn_block_kernel(%arg0: i32, %arg1: memref<1x80x128xf32, #tpu.memory_space<vmem>>, %arg2: memref<1x128xf32, #tpu.memory_space<vmem>>, %arg3: memref<128x384xbf16, #tpu.memory_space<vmem>>, %arg4: memref<128x128xbf16, #tpu.memory_space<vmem>>, %arg5: memref<2x80x80xf32, #tpu.memory_space<vmem>>, %arg6: memref<1x80x128xf32, #tpu.memory_space<vmem>>) attributes {dimension_semantics = [#tpu.dimension_semantics<parallel>], iteration_bounds = array<i64: 2>, scalar_prefetch = 0 : i64, scratch_operands = 0 : i64, tpu.core_type = #tpu.core_type<tc>, window_params = [{transform_indices = @transform_0, window_bounds = array<i64: 1, 80, 128>}, {pipeline_mode = #tpu.pipeline_mode<synchronous>, transform_indices = @transform_1, window_bounds = array<i64: 1, 128>}, {pipeline_mode = #tpu.pipeline_mode<synchronous>, transform_indices = @transform_2, window_bounds = array<i64: 128, 384>}, {pipeline_mode = #tpu.pipeline_mode<synchronous>, transform_indices = @transform_3, window_bounds = array<i64: 128, 128>}, {pipeline_mode = #tpu.pipeline_mode<synchronous>, transform_indices = @transform_4, window_bounds = array<i64: 2, 80, 80>}, {transform_indices = @transform_5, window_bounds = array<i64: 1, 80, 128>}]} {
    %c0 = arith.constant 0 : index
    %c0_0 = arith.constant 0 : index
    %c0_1 = arith.constant 0 : index
    %0 = vector.load %arg1[%c0, %c0_0, %c0_1] : memref<1x80x128xf32, #tpu.memory_space<vmem>>, vector<1x80x128xf32>
    %1 = vector.shape_cast %0 : vector<1x80x128xf32> to vector<80x128xf32>
    %2 = arith.mulf %1, %1 : vector<80x128xf32>
    %cst = arith.constant dense<0.000000e+00> : vector<80xf32>
    %3 = vector.multi_reduction <add>, %2, %cst [1] : vector<80x128xf32> to vector<80xf32>
    %4 = vector.shape_cast %3 : vector<80xf32> to vector<80x1xf32>
    %cst_2 = arith.constant 1.280000e+02 : f32
    %5 = vector.broadcast %cst_2 : f32 to vector<80x1xf32>
    %6 = arith.divf %4, %5 : vector<80x1xf32>
    %cst_3 = arith.constant 9.99999997E-7 : f32
    %7 = vector.broadcast %cst_3 : f32 to vector<80x1xf32>
    %8 = arith.addf %6, %7 : vector<80x1xf32>
    %9 = math.rsqrt %8 : vector<80x1xf32>
    %10 = vector.broadcast %9 : vector<80x1xf32> to vector<80x128xf32>
    %11 = arith.mulf %1, %10 : vector<80x128xf32>
    %c0_4 = arith.constant 0 : index
    %c0_5 = arith.constant 0 : index
    %12 = vector.load %arg2[%c0_4, %c0_5] : memref<1x128xf32, #tpu.memory_space<vmem>>, vector<1x128xf32>
    %13 = vector.broadcast %12 : vector<1x128xf32> to vector<80x128xf32>
    %14 = arith.mulf %11, %13 : vector<80x128xf32>
    %15 = arith.truncf %14 : vector<80x128xf32> to vector<80x128xbf16>
    %c0_6 = arith.constant 0 : index
    %c0_7 = arith.constant 0 : index
    %16 = vector.load %arg3[%c0_6, %c0_7] : memref<128x384xbf16, #tpu.memory_space<vmem>>, vector<128x384xbf16>
    %cst_8 = arith.constant dense<0.000000e+00> : vector<80x384xf32>
    %17 = tpu.matmul %15, %16, %cst_8 {dimension_numbers = #tpu.dot_dimension_numbers<[1], [0], [0], [1], [0, 0, 1, 1], [], []>} : vector<80x128xbf16>, vector<128x384xbf16>, vector<80x384xf32> -> vector<80x384xf32>
    %18 = vector.extract_strided_slice %17 {offsets = [0, 0], sizes = [80, 64], strides = [1, 1]} : vector<80x384xf32> to vector<80x64xf32>
    %19 = vector.extract_strided_slice %17 {offsets = [0, 128], sizes = [80, 64], strides = [1, 1]} : vector<80x384xf32> to vector<80x64xf32>
    %20 = vector.extract_strided_slice %17 {offsets = [0, 256], sizes = [80, 64], strides = [1, 1]} : vector<80x384xf32> to vector<80x64xf32>
    %cst_9 = arith.constant dense<0.000000e+00> : vector<80x80xf32>
    %21 = tpu.matmul %18, %19, %cst_9 {dimension_numbers = #tpu.dot_dimension_numbers<[1], [1], [0], [0], [0, 0, 1, 0], [], []>} : vector<80x64xf32>, vector<80x64xf32>, vector<80x80xf32> -> vector<80x80xf32>
    %c0_10 = arith.constant 0 : index
    %c0_11 = arith.constant 0 : index
    %c0_12 = arith.constant 0 : index
    %22 = vector.load %arg5[%c0_10, %c0_11, %c0_12] : memref<2x80x80xf32, #tpu.memory_space<vmem>>, vector<1x80x80xf32>
    %23 = vector.shape_cast %22 : vector<1x80x80xf32> to vector<80x80xf32>
    %24 = arith.addf %21, %23 : vector<80x80xf32>
    %cst_13 = arith.constant dense<0xFF800000> : vector<80xf32>
    %25 = vector.multi_reduction <maximumf>, %24, %cst_13 [1] : vector<80x80xf32> to vector<80xf32>
    %26 = vector.shape_cast %25 : vector<80xf32> to vector<80x1xf32>
    %27 = vector.broadcast %26 : vector<80x1xf32> to vector<80x80xf32>
    %28 = arith.subf %24, %27 : vector<80x80xf32>
    %29 = math.exp %28 : vector<80x80xf32>
    %cst_14 = arith.constant dense<0.000000e+00> : vector<80xf32>
    %30 = vector.multi_reduction <add>, %29, %cst_14 [1] : vector<80x80xf32> to vector<80xf32>
    %31 = vector.shape_cast %30 : vector<80xf32> to vector<80x1xf32>
    %32 = tpu.reciprocal %31 {approx = true} : vector<80x1xf32> -> vector<80x1xf32>
    %33 = vector.broadcast %32 : vector<80x1xf32> to vector<80x80xf32>
    %34 = arith.mulf %29, %33 : vector<80x80xf32>
    %35 = arith.truncf %34 : vector<80x80xf32> to vector<80x80xbf16>
    %36 = arith.truncf %20 : vector<80x64xf32> to vector<80x64xbf16>
    %cst_15 = arith.constant dense<0.000000e+00> : vector<80x64xf32>
    %37 = tpu.matmul %35, %36, %cst_15 {dimension_numbers = #tpu.dot_dimension_numbers<[1], [0], [0], [1], [0, 0, 1, 1], [], []>} : vector<80x80xbf16>, vector<80x64xbf16>, vector<80x64xf32> -> vector<80x64xf32>
    %38 = arith.truncf %37 : vector<80x64xf32> to vector<80x64xbf16>
    %c0_16 = arith.constant 0 : index
    %c0_17 = arith.constant 0 : index
    %39 = vector.load %arg4[%c0_16, %c0_17] : memref<128x128xbf16, #tpu.memory_space<vmem>>, vector<64x128xbf16>
    %cst_18 = arith.constant dense<0.000000e+00> : vector<80x128xf32>
    %40 = tpu.matmul %38, %39, %cst_18 {dimension_numbers = #tpu.dot_dimension_numbers<[1], [0], [0], [1], [0, 0, 1, 1], [], []>} : vector<80x64xbf16>, vector<64x128xbf16>, vector<80x128xf32> -> vector<80x128xf32>
    %41 = arith.addf %1, %40 : vector<80x128xf32>
    %42 = vector.extract_strided_slice %17 {offsets = [0, 64], sizes = [80, 64], strides = [1, 1]} : vector<80x384xf32> to vector<80x64xf32>
    %43 = vector.extract_strided_slice %17 {offsets = [0, 192], sizes = [80, 64], strides = [1, 1]} : vector<80x384xf32> to vector<80x64xf32>
    %44 = vector.extract_strided_slice %17 {offsets = [0, 320], sizes = [80, 64], strides = [1, 1]} : vector<80x384xf32> to vector<80x64xf32>
    %cst_19 = arith.constant dense<0.000000e+00> : vector<80x80xf32>
    %45 = tpu.matmul %42, %43, %cst_19 {dimension_numbers = #tpu.dot_dimension_numbers<[1], [1], [0], [0], [0, 0, 1, 0], [], []>} : vector<80x64xf32>, vector<80x64xf32>, vector<80x80xf32> -> vector<80x80xf32>
    %c1 = arith.constant 1 : index
    %c0_20 = arith.constant 0 : index
    %c0_21 = arith.constant 0 : index
    %46 = vector.load %arg5[%c1, %c0_20, %c0_21] : memref<2x80x80xf32, #tpu.memory_space<vmem>>, vector<1x80x80xf32>
    %47 = vector.shape_cast %46 : vector<1x80x80xf32> to vector<80x80xf32>
    %48 = arith.addf %45, %47 : vector<80x80xf32>
    %cst_22 = arith.constant dense<0xFF800000> : vector<80xf32>
    %49 = vector.multi_reduction <maximumf>, %48, %cst_22 [1] : vector<80x80xf32> to vector<80xf32>
    %50 = vector.shape_cast %49 : vector<80xf32> to vector<80x1xf32>
    %51 = vector.broadcast %50 : vector<80x1xf32> to vector<80x80xf32>
    %52 = arith.subf %48, %51 : vector<80x80xf32>
    %53 = math.exp %52 : vector<80x80xf32>
    %cst_23 = arith.constant dense<0.000000e+00> : vector<80xf32>
    %54 = vector.multi_reduction <add>, %53, %cst_23 [1] : vector<80x80xf32> to vector<80xf32>
    %55 = vector.shape_cast %54 : vector<80xf32> to vector<80x1xf32>
    %56 = tpu.reciprocal %55 {approx = true} : vector<80x1xf32> -> vector<80x1xf32>
    %57 = vector.broadcast %56 : vector<80x1xf32> to vector<80x80xf32>
    %58 = arith.mulf %53, %57 : vector<80x80xf32>
    %59 = arith.truncf %58 : vector<80x80xf32> to vector<80x80xbf16>
    %60 = arith.truncf %44 : vector<80x64xf32> to vector<80x64xbf16>
    %cst_24 = arith.constant dense<0.000000e+00> : vector<80x64xf32>
    %61 = tpu.matmul %59, %60, %cst_24 {dimension_numbers = #tpu.dot_dimension_numbers<[1], [0], [0], [1], [0, 0, 1, 1], [], []>} : vector<80x80xbf16>, vector<80x64xbf16>, vector<80x64xf32> -> vector<80x64xf32>
    %62 = arith.truncf %61 : vector<80x64xf32> to vector<80x64xbf16>
    %c64 = arith.constant 64 : index
    %c0_25 = arith.constant 0 : index
    %63 = vector.load %arg4[%c64, %c0_25] : memref<128x128xbf16, #tpu.memory_space<vmem>>, vector<64x128xbf16>
    %cst_26 = arith.constant dense<0.000000e+00> : vector<80x128xf32>
    %64 = tpu.matmul %62, %63, %cst_26 {dimension_numbers = #tpu.dot_dimension_numbers<[1], [0], [0], [1], [0, 0, 1, 1], [], []>} : vector<80x64xbf16>, vector<64x128xbf16>, vector<80x128xf32> -> vector<80x128xf32>
    %65 = arith.addf %41, %64 : vector<80x128xf32>
    %c0_27 = arith.constant 0 : index
    %c0_28 = arith.constant 0 : index
    %c0_29 = arith.constant 0 : index
    %66 = vector.load %arg6[%c0_27, %c0_28, %c0_29] : memref<1x80x128xf32, #tpu.memory_space<vmem>>, vector<1x80x128xf32>
    %67 = vector.shape_cast %66 : vector<1x80x128xf32> to vector<80x128xf32>
    %68 = vector.shape_cast %65 : vector<80x128xf32> to vector<1x80x128xf32>
    tpu.vector_store %arg6[%c0_27, %c0_28, %c0_29], %68 {strides = array<i32>} : memref<1x80x128xf32, #tpu.memory_space<vmem>>, vector<1x80x128xf32>,
    return
  }
  func.func @transform_0(%arg0: i32) -> (i32, i32, i32) {
    %c0_i32 = arith.constant 0 : i32
    %c0_i32_0 = arith.constant 0 : i32
    %c0_i32_1 = arith.constant 0 : i32
    return %arg0, %c0_i32, %c0_i32_0 : i32, i32, i32
  }
  func.func @transform_1(%arg0: i32) -> (i32, i32) {
    %c0_i32 = arith.constant 0 : i32
    %c0_i32_0 = arith.constant 0 : i32
    %c0_i32_1 = arith.constant 0 : i32
    return %c0_i32, %c0_i32_0 : i32, i32
  }
  func.func @transform_2(%arg0: i32) -> (i32, i32) {
    %c0_i32 = arith.constant 0 : i32
    %c0_i32_0 = arith.constant 0 : i32
    %c0_i32_1 = arith.constant 0 : i32
    return %c0_i32, %c0_i32_0 : i32, i32
  }
  func.func @transform_3(%arg0: i32) -> (i32, i32) {
    %c0_i32 = arith.constant 0 : i32
    %c0_i32_0 = arith.constant 0 : i32
    %c0_i32_1 = arith.constant 0 : i32
    return %c0_i32, %c0_i32_0 : i32, i32
  }
  func.func @transform_4(%arg0: i32) -> (i32, i32, i32) {
    %c0_i32 = arith.constant 0 : i32
    %c0_i32_0 = arith.constant 0 : i32
    %c0_i32_1 = arith.constant 0 : i32
    %c0_i32_2 = arith.constant 0 : i32
    return %c0_i32, %c0_i32_0, %c0_i32_1 : i32, i32, i32
  }
  func.func @transform_5(%arg0: i32) -> (i32, i32, i32) {
    %c0_i32 = arith.constant 0 : i32
    %c0_i32_0 = arith.constant 0 : i32
    %c0_i32_1 = arith.constant 0 : i32
    return %arg0, %c0_i32, %c0_i32_0 : i32, i32, i32
  }
}

module attributes {stable_mosaic.version = 11 : i64} {
  func.func @_ffn_block_kernel(%arg0: i32, %arg1: memref<80x128xf32, #tpu.memory_space<vmem>>, %arg2: memref<1x128xf32, #tpu.memory_space<vmem>>, %arg3: memref<128x256xbf16, #tpu.memory_space<vmem>>, %arg4: memref<128x256xbf16, #tpu.memory_space<vmem>>, %arg5: memref<256x128xbf16, #tpu.memory_space<vmem>>, %arg6: memref<80x128xf32, #tpu.memory_space<vmem>>) attributes {dimension_semantics = [#tpu.dimension_semantics<parallel>], iteration_bounds = array<i64: 2>, scalar_prefetch = 0 : i64, scratch_operands = 0 : i64, tpu.core_type = #tpu.core_type<tc>, window_params = [{transform_indices = @transform_0, window_bounds = array<i64: 80, 128>}, {pipeline_mode = #tpu.pipeline_mode<synchronous>, transform_indices = @transform_1, window_bounds = array<i64: 1, 128>}, {pipeline_mode = #tpu.pipeline_mode<synchronous>, transform_indices = @transform_2, window_bounds = array<i64: 128, 256>}, {pipeline_mode = #tpu.pipeline_mode<synchronous>, transform_indices = @transform_3, window_bounds = array<i64: 128, 256>}, {pipeline_mode = #tpu.pipeline_mode<synchronous>, transform_indices = @transform_4, window_bounds = array<i64: 256, 128>}, {transform_indices = @transform_5, window_bounds = array<i64: 80, 128>}]} {
    %c0 = arith.constant 0 : index
    %c0_0 = arith.constant 0 : index
    %0 = vector.load %arg1[%c0, %c0_0] : memref<80x128xf32, #tpu.memory_space<vmem>>, vector<80x128xf32>
    %1 = arith.mulf %0, %0 : vector<80x128xf32>
    %cst = arith.constant dense<0.000000e+00> : vector<80xf32>
    %2 = vector.multi_reduction <add>, %1, %cst [1] : vector<80x128xf32> to vector<80xf32>
    %3 = vector.shape_cast %2 : vector<80xf32> to vector<80x1xf32>
    %cst_1 = arith.constant 1.280000e+02 : f32
    %4 = vector.broadcast %cst_1 : f32 to vector<80x1xf32>
    %5 = arith.divf %3, %4 : vector<80x1xf32>
    %cst_2 = arith.constant 9.99999997E-7 : f32
    %6 = vector.broadcast %cst_2 : f32 to vector<80x1xf32>
    %7 = arith.addf %5, %6 : vector<80x1xf32>
    %8 = math.rsqrt %7 : vector<80x1xf32>
    %9 = vector.broadcast %8 : vector<80x1xf32> to vector<80x128xf32>
    %10 = arith.mulf %0, %9 : vector<80x128xf32>
    %c0_3 = arith.constant 0 : index
    %c0_4 = arith.constant 0 : index
    %11 = vector.load %arg2[%c0_3, %c0_4] : memref<1x128xf32, #tpu.memory_space<vmem>>, vector<1x128xf32>
    %12 = vector.broadcast %11 : vector<1x128xf32> to vector<80x128xf32>
    %13 = arith.mulf %10, %12 : vector<80x128xf32>
    %14 = arith.truncf %13 : vector<80x128xf32> to vector<80x128xbf16>
    %c0_5 = arith.constant 0 : index
    %c0_6 = arith.constant 0 : index
    %15 = vector.load %arg3[%c0_5, %c0_6] : memref<128x256xbf16, #tpu.memory_space<vmem>>, vector<128x256xbf16>
    %cst_7 = arith.constant dense<0.000000e+00> : vector<80x256xf32>
    %16 = tpu.matmul %14, %15, %cst_7 {dimension_numbers = #tpu.dot_dimension_numbers<[1], [0], [0], [1], [0, 0, 1, 1], [], []>} : vector<80x128xbf16>, vector<128x256xbf16>, vector<80x256xf32> -> vector<80x256xf32>
    %cst_8 = arith.constant 5.000000e-01 : f32
    %17 = vector.broadcast %cst_8 : f32 to vector<80x256xf32>
    %18 = arith.mulf %17, %16 : vector<80x256xf32>
    %cst_9 = arith.constant 4.471500e-02 : f32
    %19 = vector.broadcast %cst_9 : f32 to vector<80x256xf32>
    %20 = arith.mulf %19, %16 : vector<80x256xf32>
    %21 = arith.mulf %20, %16 : vector<80x256xf32>
    %22 = arith.mulf %21, %16 : vector<80x256xf32>
    %23 = arith.addf %16, %22 : vector<80x256xf32>
    %cst_10 = arith.constant 0.797884583 : f32
    %24 = vector.broadcast %cst_10 : f32 to vector<80x256xf32>
    %25 = arith.mulf %24, %23 : vector<80x256xf32>
    %26 = math.tanh %25 : vector<80x256xf32>
    %cst_11 = arith.constant 1.000000e+00 : f32
    %27 = vector.broadcast %cst_11 : f32 to vector<80x256xf32>
    %28 = arith.addf %27, %26 : vector<80x256xf32>
    %29 = arith.mulf %18, %28 : vector<80x256xf32>
    %c0_12 = arith.constant 0 : index
    %c0_13 = arith.constant 0 : index
    %30 = vector.load %arg4[%c0_12, %c0_13] : memref<128x256xbf16, #tpu.memory_space<vmem>>, vector<128x256xbf16>
    %cst_14 = arith.constant dense<0.000000e+00> : vector<80x256xf32>
    %31 = tpu.matmul %14, %30, %cst_14 {dimension_numbers = #tpu.dot_dimension_numbers<[1], [0], [0], [1], [0, 0, 1, 1], [], []>} : vector<80x128xbf16>, vector<128x256xbf16>, vector<80x256xf32> -> vector<80x256xf32>
    %32 = arith.mulf %29, %31 : vector<80x256xf32>
    %33 = arith.truncf %32 : vector<80x256xf32> to vector<80x256xbf16>
    %c0_15 = arith.constant 0 : index
    %c0_16 = arith.constant 0 : index
    %34 = vector.load %arg5[%c0_15, %c0_16] : memref<256x128xbf16, #tpu.memory_space<vmem>>, vector<256x128xbf16>
    %cst_17 = arith.constant dense<0.000000e+00> : vector<80x128xf32>
    %35 = tpu.matmul %33, %34, %cst_17 {dimension_numbers = #tpu.dot_dimension_numbers<[1], [0], [0], [1], [0, 0, 1, 1], [], []>} : vector<80x256xbf16>, vector<256x128xbf16>, vector<80x128xf32> -> vector<80x128xf32>
    %36 = arith.addf %0, %35 : vector<80x128xf32>
    %c0_18 = arith.constant 0 : index
    %c0_19 = arith.constant 0 : index
    %37 = vector.load %arg6[%c0_18, %c0_19] : memref<80x128xf32, #tpu.memory_space<vmem>>, vector<80x128xf32>
    tpu.vector_store %arg6[%c0_18, %c0_19], %36 {strides = array<i32>} : memref<80x128xf32, #tpu.memory_space<vmem>>, vector<80x128xf32>,
    return
  }
  func.func @transform_0(%arg0: i32) -> (i32, i32) {
    %c0_i32 = arith.constant 0 : i32
    %c0_i32_0 = arith.constant 0 : i32
    return %arg0, %c0_i32 : i32, i32
  }
  func.func @transform_1(%arg0: i32) -> (i32, i32) {
    %c0_i32 = arith.constant 0 : i32
    %c0_i32_0 = arith.constant 0 : i32
    %c0_i32_1 = arith.constant 0 : i32
    return %c0_i32, %c0_i32_0 : i32, i32
  }
  func.func @transform_2(%arg0: i32) -> (i32, i32) {
    %c0_i32 = arith.constant 0 : i32
    %c0_i32_0 = arith.constant 0 : i32
    %c0_i32_1 = arith.constant 0 : i32
    return %c0_i32, %c0_i32_0 : i32, i32
  }
  func.func @transform_3(%arg0: i32) -> (i32, i32) {
    %c0_i32 = arith.constant 0 : i32
    %c0_i32_0 = arith.constant 0 : i32
    %c0_i32_1 = arith.constant 0 : i32
    return %c0_i32, %c0_i32_0 : i32, i32
  }
  func.func @transform_4(%arg0: i32) -> (i32, i32) {
    %c0_i32 = arith.constant 0 : i32
    %c0_i32_0 = arith.constant 0 : i32
    %c0_i32_1 = arith.constant 0 : i32
    return %c0_i32, %c0_i32_0 : i32, i32
  }
  func.func @transform_5(%arg0: i32) -> (i32, i32) {
    %c0_i32 = arith.constant 0 : i32
    %c0_i32_0 = arith.constant 0 : i32
    return %arg0, %c0_i32 : i32, i32
  }
}

module attributes {stable_mosaic.version = 11 : i64} {
  func.func @_rmsnorm_kernel(%arg0: i32, %arg1: memref<80x128xf32, #tpu.memory_space<vmem>>, %arg2: memref<1x128xf32, #tpu.memory_space<vmem>>, %arg3: memref<80x128xf32, #tpu.memory_space<vmem>>) attributes {dimension_semantics = [#tpu.dimension_semantics<parallel>], iteration_bounds = array<i64: 2>, scalar_prefetch = 0 : i64, scratch_operands = 0 : i64, tpu.core_type = #tpu.core_type<tc>, window_params = [{transform_indices = @transform_0, window_bounds = array<i64: 80, 128>}, {pipeline_mode = #tpu.pipeline_mode<synchronous>, transform_indices = @transform_1, window_bounds = array<i64: 1, 128>}, {transform_indices = @transform_2, window_bounds = array<i64: 80, 128>}]} {
    %c0 = arith.constant 0 : index
    %c0_0 = arith.constant 0 : index
    %0 = vector.load %arg1[%c0, %c0_0] : memref<80x128xf32, #tpu.memory_space<vmem>>, vector<80x128xf32>
    %1 = arith.mulf %0, %0 : vector<80x128xf32>
    %cst = arith.constant dense<0.000000e+00> : vector<80xf32>
    %2 = vector.multi_reduction <add>, %1, %cst [1] : vector<80x128xf32> to vector<80xf32>
    %3 = vector.shape_cast %2 : vector<80xf32> to vector<80x1xf32>
    %cst_1 = arith.constant 1.280000e+02 : f32
    %4 = vector.broadcast %cst_1 : f32 to vector<80x1xf32>
    %5 = arith.divf %3, %4 : vector<80x1xf32>
    %cst_2 = arith.constant 9.99999997E-7 : f32
    %6 = vector.broadcast %cst_2 : f32 to vector<80x1xf32>
    %7 = arith.addf %5, %6 : vector<80x1xf32>
    %8 = math.rsqrt %7 : vector<80x1xf32>
    %9 = vector.broadcast %8 : vector<80x1xf32> to vector<80x128xf32>
    %10 = arith.mulf %0, %9 : vector<80x128xf32>
    %c0_3 = arith.constant 0 : index
    %c0_4 = arith.constant 0 : index
    %11 = vector.load %arg2[%c0_3, %c0_4] : memref<1x128xf32, #tpu.memory_space<vmem>>, vector<1x128xf32>
    %12 = vector.broadcast %11 : vector<1x128xf32> to vector<80x128xf32>
    %13 = arith.mulf %10, %12 : vector<80x128xf32>
    %c0_5 = arith.constant 0 : index
    %c0_6 = arith.constant 0 : index
    %14 = vector.load %arg3[%c0_5, %c0_6] : memref<80x128xf32, #tpu.memory_space<vmem>>, vector<80x128xf32>
    tpu.vector_store %arg3[%c0_5, %c0_6], %13 {strides = array<i32>} : memref<80x128xf32, #tpu.memory_space<vmem>>, vector<80x128xf32>,
    return
  }
  func.func @transform_0(%arg0: i32) -> (i32, i32) {
    %c0_i32 = arith.constant 0 : i32
    %c0_i32_0 = arith.constant 0 : i32
    return %arg0, %c0_i32 : i32, i32
  }
  func.func @transform_1(%arg0: i32) -> (i32, i32) {
    %c0_i32 = arith.constant 0 : i32
    %c0_i32_0 = arith.constant 0 : i32
    %c0_i32_1 = arith.constant 0 : i32
    return %c0_i32, %c0_i32_0 : i32, i32
  }
  func.func @transform_2(%arg0: i32) -> (i32, i32) {
    %c0_i32 = arith.constant 0 : i32
    %c0_i32_0 = arith.constant 0 : i32
    return %arg0, %c0_i32 : i32, i32
  }
}

</mosaic_0001>

<bundles_post_ra>
// kernel: t5_encoder.9
= control target key start
LH: loop header
LB: loop body
LE: loop exit
PB: predicated region body
PF: predicated region fallthrough
CT: control target
= control target key end

     0   :  { %s469_s9 = smov 0   ;;  %s639_s0 = inlined_call_operand.vmem [shape: f32[160,128], index: 0, kind: input, shape index: {}]   ;;  %s640_s1 = inlined_call_operand.vmem [shape: f32[1,128], index: 1, kind: input, shape index: {}]   ;;  %s641_s2 = inlined_call_operand.vmem [shape: f32[160,128], index: 2, kind: output, shape index: {}]  }
   0x1 LB: > { %s404_s10 = sadd.s32 4294967295, %s451_s9   ;;  %p408_p0 = scmp.ge.s32.totalorder %s451_s9, 1  ;;  %s451_s9 = sphi %s469_s9, %s12_s9  }
   0x2   : > { %p113_p1 = scmp.lt.s32.totalorder %s451_s9, 3 }
   0x4   : > { %p114_p2 = pnand %p408_p0, %p113_p1 }
   0x5   : > { %s135_s11 = smul.u32 (!%p114_p2), 10, %s404_s10 }
   0x6   : > { %117 = sbr.rel (%p114_p2) target bundleno = 186 (0xba), region = 28 }
   0x7   : > { %p136_p3 = scmp.lt.s32.totalorder (!%p114_p2), %s135_s11, 19 }
   0xb   : > { %s643_s11 = smov (!%p136_p3, %s135_s11), 19  ;;  %v453_v20 = vmov 128.0  }
   0xc   : > { %s409_s12 = sshll.u32 %s643_s11, 3  ;;  %423 = vrcp.f32 %v453_v20 }
   0xd   : > { %s139_s15 = scalar_lea.vmem %s639_s0, %s409_s12  ;;  %s586_s20 = scalar_lea.vmem %s641_s2, %s409_s12 }
   0xe   : > { %v485_v0 = vld [vmem:[%s139_s15 + $0x20] sm:$0xff]  ;;  %v487_v1 = vld [vmem:[%s139_s15 + $0x10] sm:$0xff]  ;;  %v497_v6 = vld [vmem:[%s139_s15 + $0x28] sm:$0xff] }
   0xf   : > { %v489_v2 = vld [vmem:[%s139_s15] sm:$0xff]  ;;  %v161_v3 = vmul.f32 %v485_v0, %v485_v0  ;;  %v159_v4 = vmul.f32 %v487_v1, %v487_v1  ;;  %v499_v7 = vld [vmem:[%s139_s15 + $0x18] sm:$0xff]  ;;  %v501_v8 = vld [vmem:[%s139_s15 + $0x8] sm:$0xff]  ;;  %v162_v9 = vmul.f32 %v497_v6, %v497_v6 }
  0x10   : > { %v157_v5 = vmul.f32 %v489_v2, %v489_v2  ;;  %v160_v10 = vmul.f32 %v499_v7, %v499_v7  ;;  %v158_v11 = vmul.f32 %v501_v8, %v501_v8  ;;  %v509_v12 = vld [vmem:[%s139_s15 + $0x40] sm:$0xff]  ;;  %v511_v13 = vld [vmem:[%s139_s15 + $0x38] sm:$0xff]  ;;  %v513_v14 = vld [vmem:[%s139_s15 + $0x30] sm:$0xff] }
  0x11   : > { %175 = vadd.xlane.f32.xlu2 %v161_v3  ;;  %171 = vadd.xlane.f32.xlu1 %v159_v4  ;;  %v165_v15 = vmul.f32 %v509_v12, %v509_v12  ;;  %v164_v16 = vmul.f32 %v511_v13, %v511_v13  ;;  %v163_v17 = vmul.f32 %v513_v14, %v513_v14  ;;  %v521_v18 = vld [vmem:[%s139_s15 + $0x48] sm:$0xff] }
  0x12   : > { %167 = vadd.xlane.f32.xlu0 %v157_v5  ;;  %v166_v19 = vmul.f32 %v521_v18, %v521_v18  ;;  %v424_v21 = vpop.eup %423 }
  0x13   : > { %v188_v22 = vmul.f32 128.0, %v424_v21  ;;  %vm192_vm0 = vweird.f32 %v424_v21 }
  0x15   : > { %v189_v23 = vsub.f32 1.0, %v188_v22 }
  0x17   : > { %v190_v24 = vmul.f32 %v424_v21, %v189_v23 }
  0x19   : > { %177 = vadd.xlane.f32.xlu2 %v162_v9  ;;  %173 = vadd.xlane.f32.xlu1 %v160_v10  ;;  %v191_v25 = vadd.f32 %v424_v21, %v190_v24 }
  0x1a   : > { %169 = vadd.xlane.f32.xlu0 %v158_v11 }
  0x1b   : > { %v525_v26 = vsel %vm192_vm0, %v424_v21, %v191_v25 }
  0x21   : > { %183 = vadd.xlane.f32.xlu2 %v165_v15  ;;  %181 = vadd.xlane.f32.xlu1 %v164_v16  ;;  %v562_v16 = vld [vmem:[%s640_s1] ss:$0 sm:$0xff] }
  0x22   : > { %179 = vadd.xlane.f32.xlu0 %v163_v17 }
  0x2a   : > { %185 = vadd.xlane.f32.xlu0 %v166_v19 }
  0x84   : > { %v176_v27 = vpop.xlane.xlu2 %175  ;;  %v172_v28 = vpop.xlane.xlu1 %171 }
  0x85   : > { %v198_v29 = vmul.f32 %v525_v26, %v176_v27  ;;  %v196_v30 = vmul.f32 %v525_v26, %v172_v28  ;;  %v168_v31 = vpop.xlane.xlu0 %167 }
  0x86   : > { %v194_v32 = vmul.f32 %v525_v26, %v168_v31 }
  0x87   : > { %v208_v33 = vadd.f32 1e-06, %v198_v29  ;;  %v206_v34 = vadd.f32 1e-06, %v196_v30 }
  0x88   : > { %v530_v35 = vadd.f32 1e-06, %v194_v32 }
  0x89   : > { %425 = vrsqrt.f32 %v208_v33  ;;  %vm260_vm1 = vweird.f32 %v208_v33  ;;  %vm240_vm2 = vweird.f32 %v206_v34 }
  0x8a   : > { %427 = vrsqrt.f32 %v206_v34  ;;  %vm220_vm3 = vweird.f32 %v530_v35 }
  0x8b   : > { %429 = vrsqrt.f32 %v530_v35 }
  0x8c   : > { %v178_v36 = vpop.xlane.xlu2 %177  ;;  %v174_v37 = vpop.xlane.xlu1 %173 }
  0x8d   : > { %v199_v38 = vmul.f32 %v525_v26, %v178_v36  ;;  %v197_v39 = vmul.f32 %v525_v26, %v174_v37  ;;  %v170_v40 = vpop.xlane.xlu0 %169 }
  0x8e   : > { %v195_v41 = vmul.f32 %v525_v26, %v170_v40 }
  0x8f   : > { %v426_v42 = vpop.eup %425  ;;  %v536_v43 = vadd.f32 1e-06, %v199_v38  ;;  %v538_v44 = vadd.f32 1e-06, %v197_v39 }
  0x90   : > { %v428_v45 = vpop.eup %427  ;;  %v255_v46 = vmul.f32 %v426_v42, %v208_v33  ;;  %v540_v47 = vadd.f32 1e-06, %v195_v41  ;;  %vm261_vm4 = vweird.f32 %v426_v42 }
  0x91   : > { %v430_v48 = vpop.eup %429  ;;  %v235_v49 = vmul.f32 %v428_v45, %v206_v34  ;;  %431 = vrsqrt.f32 %v536_v43  ;;  %vm241_vm5 = vweird.f32 %v428_v45  ;;  %vm270_vm7 = vweird.f32 %v536_v43  ;;  %vm262_vm9 = vmor %vm260_vm1, %vm261_vm4 }
  0x92   : > { %v256_v50 = vmul.f32 %v426_v42, %v255_v46  ;;  %v215_v51 = vmul.f32 %v430_v48, %v530_v35  ;;  %433 = vrsqrt.f32 %v538_v44  ;;  %vm221_vm6 = vweird.f32 %v430_v48  ;;  %vm242_vm10 = vmor %vm240_vm2, %vm241_vm5 }
  0x93   : > { %v236_v52 = vmul.f32 %v428_v45, %v235_v49  ;;  %435 = vrsqrt.f32 %v540_v47  ;;  %vm250_vm8 = vweird.f32 %v538_v44  ;;  %vm222_vm11 = vmor %vm220_vm3, %vm221_vm6  ;;  %vm230_vm1 = vweird.f32 %v540_v47 }
  0x94   : > { %v257_v53 = vmul.f32 0.5, %v256_v50  ;;  %v216_v54 = vmul.f32 %v430_v48, %v215_v51  ;;  %v184_v55 = vpop.xlane.xlu2 %183  ;;  %v182_v56 = vpop.xlane.xlu1 %181 }
  0x95   : > { %v237_v57 = vmul.f32 0.5, %v236_v52  ;;  %v202_v58 = vmul.f32 %v525_v26, %v184_v55  ;;  %v201_v59 = vmul.f32 %v525_v26, %v182_v56  ;;  %v180_v60 = vpop.xlane.xlu0 %179 }
  0x96   : > { %v258_v61 = vsub.f32 1.5, %v257_v53  ;;  %v217_v62 = vmul.f32 0.5, %v216_v54  ;;  %v200_v29 = vmul.f32 %v525_v26, %v180_v60 }
  0x97   : > { %v549_v63 = vpop.eup %431  ;;  %v238_v3 = vsub.f32 1.5, %v237_v57  ;;  %v552_v4 = vadd.f32 1e-06, %v202_v58  ;;  %v569_v20 = vadd.f32 1e-06, %v201_v59 }
  0x98   : > { %v554_v5 = vpop.eup %433  ;;  %v259_v9 = vmul.f32 %v426_v42, %v258_v61  ;;  %v218_v10 = vsub.f32 1.5, %v217_v62  ;;  %v265_v11 = vmul.f32 %v549_v63, %v536_v43  ;;  %vm271_vm12 = vweird.f32 %v549_v63 }
  0x99   : > { %v436_v15 = vpop.eup %435  ;;  %v239_v17 = vmul.f32 %v428_v45, %v238_v3  ;;  %v245_v19 = vmul.f32 %v554_v5, %v538_v44  ;;  %437 = vrsqrt.f32 %v552_v4  ;;  %vm251_vm13 = vweird.f32 %v554_v5  ;;  %vm272_vm15 = vmor %vm270_vm7, %vm271_vm12 }
  0x9a   : > { %v263_v21 = vsel %vm262_vm9, %v426_v42, %v259_v9  ;;  %v219_v22 = vmul.f32 %v430_v48, %v218_v10  ;;  %v266_v23 = vmul.f32 %v549_v63, %v265_v11  ;;  %v225_v24 = vmul.f32 %v436_v15, %v540_v47  ;;  %vm252_vm0 = vmor %vm250_vm8, %vm251_vm13 }
  0x9b   : > { %v318_v25 = vmul.f32 %v263_v21, %v485_v0  ;;  %v243_v27 = vsel %vm242_vm10, %v428_v45, %v239_v17  ;;  %v246_v28 = vmul.f32 %v554_v5, %v245_v19  ;;  %439 = vrsqrt.f32 %v569_v20 }
  0x9c   : > { %v316_v30 = vmul.f32 %v243_v27, %v487_v1  ;;  %v223_v31 = vsel %vm222_vm11, %v430_v48, %v219_v22  ;;  %v267_v0 = vmul.f32 0.5, %v266_v23  ;;  %v226_v32 = vmul.f32 %v436_v15, %v225_v24 }
  0x9d   : > { %v332_v33 = vmul.f32 %v562_v16, %v318_v25  ;;  %v314_v34 = vmul.f32 %v223_v31, %v489_v2  ;;  %v247_v35 = vmul.f32 0.5, %v246_v28  ;;  %v186_v39 = vpop.xlane.xlu0 %185  ;;  %v210_v42 = vadd.f32 1e-06, %v200_v29 }
  0x9e   : > { %v330_v36 = vmul.f32 %v562_v16, %v316_v30  ;;  %v268_v37 = vsub.f32 1.5, %v267_v0  ;;  %v227_v38 = vmul.f32 0.5, %v226_v32  ;;  %vm231_vm14 = vweird.f32 %v436_v15 }
  0x9f   : > { %v438_v1 = vpop.eup %437  ;;  %342 = vst [vmem:[%s586_s20 + $0x20] sm:$0xff] %v332_v33  ;;  %v328_v40 = vmul.f32 %v562_v16, %v314_v34  ;;  %v248_v41 = vsub.f32 1.5, %v247_v35  ;;  %441 = vrsqrt.f32 %v210_v42  ;;  %v203_v49 = vmul.f32 %v525_v26, %v186_v39  ;;  %vm232_vm2 = vmor %vm230_vm1, %vm231_vm14 }
  0xa0   : > { %340 = vst [vmem:[%s586_s20 + $0x10] sm:$0xff] %v330_v36  ;;  %v269_v2 = vmul.f32 %v549_v63, %v268_v37  ;;  %v228_v45 = vsub.f32 1.5, %v227_v38  ;;  %v295_v46 = vmul.f32 %v438_v1, %v552_v4  ;;  %vm300_vm3 = vweird.f32 %v552_v4 }
  0xa1   : > { %338 = vst [vmem:[%s586_s20] sm:$0xff] %v328_v40  ;;  %v249_v48 = vmul.f32 %v554_v5, %v248_v41  ;;  %v213_v43 = vadd.f32 1e-06, %v203_v49  ;;  %v440_v55 = vpop.eup %439  ;;  %vm301_vm4 = vweird.f32 %v438_v1  ;;  %vm290_vm6 = vweird.f32 %v569_v20 }
  0xa2   : > { %v273_v50 = vsel %vm272_vm15, %v549_v63, %v269_v2  ;;  %v229_v51 = vmul.f32 %v436_v15, %v228_v45  ;;  %v296_v52 = vmul.f32 %v438_v1, %v295_v46  ;;  %vm302_vm5 = vmor %vm300_vm3, %vm301_vm4  ;;  %vm291_vm7 = vweird.f32 %v440_v55 }
  0xa3   : > { %v319_v53 = vmul.f32 %v273_v50, %v497_v6  ;;  %v253_v54 = vsel %vm252_vm0, %v554_v5, %v249_v48  ;;  %v285_v6 = vmul.f32 %v440_v55, %v569_v20  ;;  %443 = vrsqrt.f32 %v213_v43  ;;  %vm292_vm8 = vmor %vm290_vm6, %vm291_vm7 }
  0xa4   : > { %v317_v26 = vmul.f32 %v253_v54, %v499_v7  ;;  %v233_v56 = vsel %vm232_vm2, %v436_v15, %v229_v51  ;;  %v297_v57 = vmul.f32 0.5, %v296_v52  ;;  %vm280_vm10 = vweird.f32 %v210_v42 }
  0xa5   : > { %v333_v44 = vmul.f32 %v562_v16, %v319_v53  ;;  %v315_v58 = vmul.f32 %v233_v56, %v501_v8  ;;  %v442_v60 = vpop.eup %441  ;;  %v286_v61 = vmul.f32 %v440_v55, %v285_v6  ;;  %vm310_vm13 = vweird.f32 %v213_v43 }
  0xa6   : > { %v331_v47 = vmul.f32 %v562_v16, %v317_v26  ;;  %v298_v59 = vsub.f32 1.5, %v297_v57  ;;  %v275_v63 = vmul.f32 %v442_v60, %v210_v42  ;;  %vm281_vm9 = vweird.f32 %v442_v60 }
  0xa7   : > { %343 = vst [vmem:[%s586_s20 + $0x28] sm:$0xff] %v333_v44  ;;  %v329_v7 = vmul.f32 %v562_v16, %v315_v58  ;;  %v287_v8 = vmul.f32 0.5, %v286_v61  ;;  %vm282_vm11 = vmor %vm280_vm10, %vm281_vm9 }
  0xa8   : > { %341 = vst [vmem:[%s586_s20 + $0x18] sm:$0xff] %v331_v47  ;;  %v299_v62 = vmul.f32 %v438_v1, %v298_v59  ;;  %v276_v4 = vmul.f32 %v442_v60, %v275_v63 }
  0xa9   : > { %339 = vst [vmem:[%s586_s20 + $0x8] sm:$0xff] %v329_v7  ;;  %v288_v9 = vsub.f32 1.5, %v287_v8  ;;  %v444_v10 = vpop.eup %443 }
  0xaa   : > { %v303_v3 = vsel %vm302_vm5, %v438_v1, %v299_v62  ;;  %v277_v11 = vmul.f32 0.5, %v276_v4  ;;  %v305_v19 = vmul.f32 %v444_v10, %v213_v43  ;;  %vm311_vm12 = vweird.f32 %v444_v10 }
  0xab   : > { %v322_v5 = vmul.f32 %v303_v3, %v509_v12  ;;  %v289_v17 = vmul.f32 %v440_v55, %v288_v9  ;;  %vm312_vm14 = vmor %vm310_vm13, %vm311_vm12 }
  0xac   : > { %v278_v21 = vsub.f32 1.5, %v277_v11  ;;  %v306_v23 = vmul.f32 %v444_v10, %v305_v19 }
  0xad   : > { %v336_v15 = vmul.f32 %v562_v16, %v322_v5  ;;  %v293_v22 = vsel %vm292_vm8, %v440_v55, %v289_v17 }
  0xae   : > { %v321_v12 = vmul.f32 %v293_v22, %v511_v13  ;;  %v279_v24 = vmul.f32 %v442_v60, %v278_v21  ;;  %v307_v20 = vmul.f32 0.5, %v306_v23 }
  0xaf   : > { %346 = vst [vmem:[%s586_s20 + $0x40] sm:$0xff] %v336_v15 }
  0xb0   : > { %v335_v25 = vmul.f32 %v562_v16, %v321_v12  ;;  %v283_v27 = vsel %vm282_vm11, %v442_v60, %v279_v24  ;;  %v308_v29 = vsub.f32 1.5, %v307_v20 }
  0xb1   : > { %v320_v28 = vmul.f32 %v283_v27, %v513_v14 }
  0xb2   : > { %345 = vst [vmem:[%s586_s20 + $0x38] sm:$0xff] %v335_v25  ;;  %v309_v31 = vmul.f32 %v444_v10, %v308_v29 }
  0xb3   : > { %v334_v30 = vmul.f32 %v562_v16, %v320_v28 }
  0xb4   : > { %v313_v13 = vsel %vm312_vm14, %v444_v10, %v309_v31 }
  0xb5   : > { %344 = vst [vmem:[%s586_s20 + $0x30] sm:$0xff] %v334_v30  ;;  %v323_v0 = vmul.f32 %v313_v13, %v521_v18 }
  0xb7   : > { %v337_v32 = vmul.f32 %v562_v16, %v323_v0 }
  0xb9   : > { %347 = vst [vmem:[%s586_s20 + $0x48] sm:$0xff] %v337_v32 }
  0xba PF: > { %s12_s9 = sadd.s32 1, %s451_s9  }
  0xbb   : > { %p9_p4 = scmp.ge.s32.totalorder %s12_s9, 4  }
  0xbd   :  { %11 = sbr.rel (!%p9_p4) target bundleno = 1 (0x1), region = 58 }

// kernel: t5_encoder.6
= control target key start
LH: loop header
LB: loop body
LE: loop exit
PB: predicated region body
PF: predicated region fallthrough
CT: control target
= control target key end

     0   :  { %s1620_s18 = smov 0   ;;  %s2336_s0 = inlined_call_operand.vmem [shape: f32[160,128], index: 0, kind: input, shape index: {}]   ;;  %s2337_s1 = inlined_call_operand.vmem [shape: f32[1,128], index: 1, kind: input, shape index: {}]   ;;  %s2338_s2 = inlined_call_operand.vmem [shape: bf16[128,256], index: 2, kind: input, shape index: {}]   ;;  %s2339_s3 = inlined_call_operand.vmem [shape: bf16[128,256], index: 3, kind: input, shape index: {}]   ;;  %s2340_s4 = inlined_call_operand.vmem [shape: bf16[256,128], index: 4, kind: input, shape index: {}]   ;;  %s2341_s5 = inlined_call_operand.vmem [shape: f32[160,128], index: 5, kind: output, shape index: {}]  }
   0x1 LB: > { %s1234_s19 = sadd.s32 4294967295, %s1587_s18   ;;  %p1238_p0 = scmp.ge.s32.totalorder %s1587_s18, 1  ;;  %s1587_s18 = sphi %s1620_s18, %s15_s18  }
   0x2   : > { %p188_p1 = scmp.lt.s32.totalorder %s1587_s18, 3 }
   0x4   : > { %p189_p2 = pnand %p1238_p0, %p188_p1 }
   0x5   : > { %s216_s20 = smul.u32 (!%p189_p2), 10, %s1234_s19 }
   0x6   : > { %192 = sbr.rel (%p189_p2) target bundleno = 565 (0x235), region = 40 }
   0x7   : > { %p217_p3 = scmp.lt.s32.totalorder (!%p189_p2), %s216_s20, 19 }
   0xb   : > { %s2359_s20 = smov (!%p217_p3, %s216_s20), 19  ;;  %v1299_v20 = vld [vmem:[%s2338_s2 + $0x70] sm:$0xf]  ;;  %v1450_v21 = vld [vmem:[%s2338_s2 + $0x74] sm:$0xf0]  ;;  %v1589_v23 = vmov 128.0  }
   0xc   : > { %s1239_s21 = sshll.u32 %s2359_s20, 3  ;;  %v1449_v22 = vld [vmem:[%s2338_s2 + $0x74] sm:$0xf]  ;;  %1509 = vrcp.f32 %v1589_v23  ;;  %v1300_v24 = vor.u32 %v1450_v21, %v1299_v20  ;;  %v1301_v25 = vld [vmem:[%s2338_s2 + $0x78] sm:$0xf0] }
   0xd   : > { %s1636_s24 = scalar_lea.vmem %s2336_s0, %s1239_s21  ;;  %v1304_v26 = vor.u32 %v1449_v22, %v1301_v25  ;;  %v1291_v27 = vld [vmem:[%s2338_s2 + $0x60] sm:$0xf]  ;;  %v1448_v28 = vld [vmem:[%s2338_s2 + $0x64] sm:$0xf0]  ;;  %v1447_v29 = vld [vmem:[%s2338_s2 + $0x64] sm:$0xf]  ;;  %s2311_s17 = scalar_lea.vmem %s2341_s5, %s1239_s21 }
   0xe   : > { %v1639_v0 = vld [vmem:[%s1636_s24 + $0x30] sm:$0xff]  ;;  %v1642_v1 = vld [vmem:[%s1636_s24 + $0x20] sm:$0xff]  ;;  %v1654_v6 = vld [vmem:[%s1636_s24 + $0x38] sm:$0xff]  ;;  %1483 = vmatpush.bf16.msra.mxu2 %v1300_v24  ;;  %520 = vmatpush.bf16.msra.mxu0 %v1300_v24  ;;  %v1292_v30 = vor.u32 %v1448_v28, %v1291_v27 }
   0xf   : > { %v244_v2 = vmul.f32 %v1639_v0, %v1639_v0  ;;  %v242_v3 = vmul.f32 %v1642_v1, %v1642_v1  ;;  %v1649_v4 = vld [vmem:[%s1636_s24 + $0x40] sm:$0xff]  ;;  %v1657_v7 = vld [vmem:[%s1636_s24 + $0x28] sm:$0xff]  ;;  %v245_v9 = vmul.f32 %v1654_v6, %v1654_v6  ;;  %v1675_v14 = vld [vmem:[%s1636_s24 + $0x10] sm:$0xff]  ;;  %1491 = vmatpush.bf16.msra.mxu3 %v1304_v26  ;;  %554 = vmatpush.bf16.msra.mxu1 %v1304_v26 }
  0x10   : > { %v246_v5 = vmul.f32 %v1649_v4, %v1649_v4  ;;  %v1660_v8 = vld [vmem:[%s1636_s24 + $0x48] sm:$0xff]  ;;  %v243_v10 = vmul.f32 %v1657_v7, %v1657_v7  ;;  %v1672_v13 = vld [vmem:[%s1636_s24] sm:$0xff]  ;;  %v240_v17 = vmul.f32 %v1675_v14, %v1675_v14  ;;  %v1684_v18 = vld [vmem:[%s1636_s24 + $0x18] sm:$0xff] }
  0x11   : > { %260 = vadd.xlane.f32.xlu1 %v244_v2  ;;  %256 = vadd.xlane.f32.xlu0 %v242_v3  ;;  %v247_v11 = vmul.f32 %v1660_v8, %v1660_v8  ;;  %v1669_v12 = vld [vmem:[%s1636_s24 + $0x8] sm:$0xff]  ;;  %v238_v16 = vmul.f32 %v1672_v13, %v1672_v13  ;;  %v241_v19 = vmul.f32 %v1684_v18, %v1684_v18  ;;  %v1283_v34 = vld [vmem:[%s2338_s2 + $0x50] sm:$0xf]  ;;  %v1446_v35 = vld [vmem:[%s2338_s2 + $0x54] sm:$0xf0] }
  0x12   : > { %264 = vadd.xlane.f32.xlu2 %v246_v5  ;;  %v239_v15 = vmul.f32 %v1669_v12, %v1669_v12  ;;  %v1293_v31 = vld [vmem:[%s2338_s2 + $0x68] sm:$0xf0]  ;;  %v1510_v33 = vpop.eup %1509  ;;  %1484 = vmatpush.bf16.msra.mxu2 %v1292_v30  ;;  %v1445_v36 = vld [vmem:[%s2338_s2 + $0x54] sm:$0xf]  ;;  %v1284_v37 = vor.u32 %v1446_v35, %v1283_v34  ;;  %v1285_v38 = vld [vmem:[%s2338_s2 + $0x58] sm:$0xf0] }
  0x13   : > { %v1296_v32 = vor.u32 %v1447_v29, %v1293_v31  ;;  %521 = vmatpush.bf16.msra.mxu0 %v1292_v30  ;;  %v269_v39 = vmul.f32 128.0, %v1510_v33  ;;  %v1288_v40 = vor.u32 %v1445_v36, %v1285_v38  ;;  %v1275_v41 = vld [vmem:[%s2338_s2 + $0x40] sm:$0xf]  ;;  %v1444_v42 = vld [vmem:[%s2338_s2 + $0x44] sm:$0xf0]  ;;  %vm273_vm0 = vweird.f32 %v1510_v33 }
  0x14   : > { %v1443_v43 = vld [vmem:[%s2338_s2 + $0x44] sm:$0xf]  ;;  %v1276_v45 = vor.u32 %v1444_v42, %v1275_v41  ;;  %v1277_v46 = vld [vmem:[%s2338_s2 + $0x48] sm:$0xf0]  ;;  %v1267_v48 = vld [vmem:[%s2338_s2 + $0x30] sm:$0xf] }
  0x15   : > { %1492 = vmatpush.bf16.msra.mxu3 %v1296_v32  ;;  %555 = vmatpush.bf16.msra.mxu1 %v1296_v32  ;;  %v270_v44 = vsub.f32 1.0, %v269_v39  ;;  %v1280_v47 = vor.u32 %v1443_v43, %v1277_v46  ;;  %v1442_v49 = vld [vmem:[%s2338_s2 + $0x34] sm:$0xf0]  ;;  %v1441_v50 = vld [vmem:[%s2338_s2 + $0x34] sm:$0xf] }
  0x16   : > { %1485 = vmatpush.bf16.msra.mxu2 %v1284_v37  ;;  %v1268_v52 = vor.u32 %v1442_v49, %v1267_v48  ;;  %v1269_v53 = vld [vmem:[%s2338_s2 + $0x38] sm:$0xf0]  ;;  %v1259_v55 = vld [vmem:[%s2338_s2 + $0x20] sm:$0xf]  ;;  %v1440_v56 = vld [vmem:[%s2338_s2 + $0x24] sm:$0xf0] }
  0x17   : > { %522 = vmatpush.bf16.msra.mxu0 %v1284_v37  ;;  %v271_v51 = vmul.f32 %v1510_v33, %v270_v44  ;;  %v1272_v54 = vor.u32 %v1441_v50, %v1269_v53  ;;  %v1439_v57 = vld [vmem:[%s2338_s2 + $0x24] sm:$0xf]  ;;  %v1260_v59 = vor.u32 %v1440_v56, %v1259_v55  ;;  %v1261_v60 = vld [vmem:[%s2338_s2 + $0x28] sm:$0xf0]  ;;  %v1251_v62 = vld [vmem:[%s2338_s2 + $0x10] sm:$0xf] }
  0x18   : > { %v1264_v61 = vor.u32 %v1439_v57, %v1261_v60  ;;  %v1438_v63 = vld [vmem:[%s2338_s2 + $0x14] sm:$0xf0]  ;;  %v1437_v2 = vld [vmem:[%s2338_s2 + $0x14] sm:$0xf]  ;;  %v1243_v20 = vld [vmem:[%s2338_s2] sm:$0xf] }
  0x19   : > { %262 = vadd.xlane.f32.xlu1 %v245_v9  ;;  %258 = vadd.xlane.f32.xlu0 %v243_v10  ;;  %v272_v58 = vadd.f32 %v1510_v33, %v271_v51  ;;  %v1252_v5 = vor.u32 %v1438_v63, %v1251_v62  ;;  %v1253_v9 = vld [vmem:[%s2338_s2 + $0x18] sm:$0xf0]  ;;  %v1436_v21 = vld [vmem:[%s2338_s2 + $0x4] sm:$0xf0]  ;;  %v1435_v22 = vld [vmem:[%s2338_s2 + $0x4] sm:$0xf] }
  0x1a   : > { %266 = vadd.xlane.f32.xlu2 %v247_v11  ;;  %1493 = vmatpush.bf16.msra.mxu3 %v1288_v40  ;;  %v1256_v10 = vor.u32 %v1437_v2, %v1253_v9  ;;  %v1244_v23 = vor.u32 %v1436_v21, %v1243_v20  ;;  %v1245_v24 = vld [vmem:[%s2338_s2 + $0x8] sm:$0xf0]  ;;  %v1363_v48 = vld [vmem:[%s2339_s3 + $0x70] sm:$0xf]  ;;  %v1466_v49 = vld [vmem:[%s2339_s3 + $0x74] sm:$0xf0] }
  0x1b   : > { %556 = vmatpush.bf16.msra.mxu1 %v1288_v40  ;;  %1486 = vmatpush.bf16.msra.mxu2 %v1276_v45  ;;  %v1769_v3 = vsel %vm273_vm0, %v1510_v33, %v272_v58  ;;  %v1248_v26 = vor.u32 %v1435_v22, %v1245_v24  ;;  %v1364_v50 = vor.u32 %v1466_v49, %v1363_v48  ;;  %v1465_v51 = vld [vmem:[%s2339_s3 + $0x74] sm:$0xf]  ;;  %v1357_v20 = vld [vmem:[%s2339_s3 + $0x68] sm:$0xf0]  ;;  %v1349_v49 = vld [vmem:[%s2339_s3 + $0x58] sm:$0xf0] }
  0x1c   : > { %523 = vmatpush.bf16.msra.mxu0 %v1276_v45  ;;  %v1461_v48 = vld [vmem:[%s2339_s3 + $0x54] sm:$0xf]  ;;  %v1331_v22 = vld [vmem:[%s2339_s3 + $0x30] sm:$0xf] }
  0x1e   : > { %1494 = vmatpush.bf16.msra.mxu3 %v1280_v47 }
  0x1f   : > { %557 = vmatpush.bf16.msra.mxu1 %v1280_v47  ;;  %1487 = vmatpush.bf16.msra.mxu2 %v1268_v52 }
  0x20   : > { %524 = vmatpush.bf16.msra.mxu0 %v1268_v52  ;;  %v1365_v52 = vld [vmem:[%s2339_s3 + $0x78] sm:$0xf0] }
  0x21   : > { %250 = vadd.xlane.f32.xlu1 %v239_v15  ;;  %248 = vadd.xlane.f32.xlu0 %v238_v16  ;;  %v1368_v58 = vor.u32 %v1465_v51, %v1365_v52 }
  0x22   : > { %252 = vadd.xlane.f32.xlu2 %v240_v17  ;;  %1495 = vmatpush.bf16.msra.mxu3 %v1272_v54 }
  0x23   : > { %558 = vmatpush.bf16.msra.mxu1 %v1272_v54  ;;  %1488 = vmatpush.bf16.msra.mxu2 %v1260_v59 }
  0x24   : > { %525 = vmatpush.bf16.msra.mxu0 %v1260_v59 }
  0x26   : > { %1496 = vmatpush.bf16.msra.mxu3 %v1264_v61 }
  0x27   : > { %559 = vmatpush.bf16.msra.mxu1 %v1264_v61  ;;  %1489 = vmatpush.bf16.msra.mxu2 %v1252_v5 }
  0x28   : > { %526 = vmatpush.bf16.msra.mxu0 %v1252_v5 }
  0x29   : > { %254 = vadd.xlane.f32.xlu0 %v241_v19 }
  0x2a   : > { %1497 = vmatpush.bf16.msra.mxu3 %v1256_v10 }
  0x2b   : > { %560 = vmatpush.bf16.msra.mxu1 %v1256_v10  ;;  %1490 = vmatpush.bf16.msra.mxu2 %v1244_v23 }
  0x2c   : > { %527 = vmatpush.bf16.msra.mxu0 %v1244_v23 }
  0x2e   : > { %1498 = vmatpush.bf16.msra.mxu3 %v1248_v26 }
  0x2f   : > { %561 = vmatpush.bf16.msra.mxu1 %v1248_v26  ;;  %864 = vmatpush.bf16.msrb.mxu2 %v1364_v50 }
  0x32   : > { %898 = vmatpush.bf16.msrb.mxu3 %v1368_v58  ;;  %v1339_v58 = vld [vmem:[%s2339_s3 + $0x40] sm:$0xf] }
  0x84   : > { %v261_v11 = vpop.xlane.xlu1 %260  ;;  %v257_v15 = vpop.xlane.xlu0 %256 }
  0x85   : > { %v281_v16 = vmul.f32 %v1769_v3, %v261_v11  ;;  %v279_v17 = vmul.f32 %v1769_v3, %v257_v15  ;;  %v265_v19 = vpop.xlane.xlu2 %264  ;;  %v1355_v11 = vld [vmem:[%s2339_s3 + $0x60] sm:$0xf] }
  0x86   : > { %v283_v32 = vmul.f32 %v1769_v3, %v265_v19  ;;  %v1463_v19 = vld [vmem:[%s2339_s3 + $0x64] sm:$0xf] }
  0x87   : > { %v1788_v25 = vadd.f32 1e-06, %v279_v17  ;;  %v1790_v27 = vadd.f32 1e-06, %v281_v16  ;;  %v1464_v17 = vld [vmem:[%s2339_s3 + $0x64] sm:$0xf0] }
  0x88   : > { %v1809_v39 = vadd.f32 1e-06, %v283_v32  ;;  %v1360_v32 = vor.u32 %v1463_v19, %v1357_v20  ;;  %v1317_v19 = vld [vmem:[%s2339_s3 + $0x18] sm:$0xf0] }
  0x89   : > { %1511 = vrsqrt.f32 %v1788_v25  ;;  %vm341_vm2 = vweird.f32 %v1788_v25  ;;  %vm361_vm7 = vweird.f32 %v1790_v27 }
  0x8a   : > { %1513 = vrsqrt.f32 %v1790_v27  ;;  %899 = vmatpush.bf16.msrb.mxu3 %v1360_v32  ;;  %v1333_v32 = vld [vmem:[%s2339_s3 + $0x38] sm:$0xf0] }
  0x8c   : > { %v263_v28 = vpop.xlane.xlu1 %262  ;;  %v259_v29 = vpop.xlane.xlu0 %258 }
  0x8d   : > { %v282_v30 = vmul.f32 %v1769_v3, %v263_v28  ;;  %v280_v31 = vmul.f32 %v1769_v3, %v259_v29  ;;  %v267_v35 = vpop.xlane.xlu2 %266 }
  0x8e   : > { %v284_v43 = vmul.f32 %v1769_v3, %v267_v35 }
  0x8f   : > { %v1797_v33 = vadd.f32 1e-06, %v282_v30  ;;  %v1799_v34 = vadd.f32 1e-06, %v280_v31  ;;  %v1801_v36 = vpop.eup %1511  ;;  %v1356_v31 = vor.u32 %v1464_v17, %v1355_v11  ;;  %v1459_v11 = vld [vmem:[%s2339_s3 + $0x44] sm:$0xf] }
  0x90   : > { %v336_v37 = vmul.f32 %v1801_v36, %v1788_v25  ;;  %v1806_v38 = vpop.eup %1513  ;;  %v1840_v61 = vadd.f32 1e-06, %v284_v43  ;;  %vm342_vm1 = vweird.f32 %v1801_v36 }
  0x91   : > { %1515 = vrsqrt.f32 %v1797_v33  ;;  %v356_v44 = vmul.f32 %v1806_v38, %v1790_v27  ;;  %vm1870_vm3 = vmor %vm341_vm2, %vm342_vm1  ;;  %vm371_vm4 = vweird.f32 %v1797_v33  ;;  %vm351_vm6 = vweird.f32 %v1799_v34  ;;  %865 = vmatpush.bf16.msrb.mxu2 %v1356_v31  ;;  %v1457_v31 = vld [vmem:[%s2339_s3 + $0x34] sm:$0xf]  ;;  %v1323_v27 = vld [vmem:[%s2339_s3 + $0x20] sm:$0xf] }
  0x92   : > { %1517 = vrsqrt.f32 %v1799_v34  ;;  %v337_v40 = vmul.f32 %v1801_v36, %v336_v37  ;;  %vm362_vm14 = vweird.f32 %v1806_v38 }
  0x93   : > { %1519 = vrsqrt.f32 %v1809_v39  ;;  %v357_v62 = vmul.f32 %v1806_v38, %v356_v44  ;;  %v1347_v44 = vld [vmem:[%s2339_s3 + $0x50] sm:$0xf]  ;;  %vm2017_vm2 = vmor %vm361_vm7, %vm362_vm14 }
  0x94   : > { %v251_v41 = vpop.xlane.xlu1 %250  ;;  %v249_v42 = vpop.xlane.xlu0 %248  ;;  %v338_v45 = vmul.f32 0.5, %v337_v40 }
  0x95   : > { %v276_v46 = vmul.f32 %v1769_v3, %v251_v41  ;;  %v275_v47 = vmul.f32 %v1769_v3, %v249_v42  ;;  %v253_v57 = vpop.xlane.xlu2 %252  ;;  %v1868_v21 = vmul.f32 0.5, %v357_v62 }
  0x96   : > { %v339_v54 = vsub.f32 1.5, %v338_v45  ;;  %v277_v5 = vmul.f32 %v1769_v3, %v253_v57 }
  0x97   : > { %v1830_v53 = vpop.eup %1515  ;;  %v1832_v55 = vadd.f32 1e-06, %v276_v46  ;;  %v1834_v56 = vadd.f32 1e-06, %v275_v47  ;;  %v359_v40 = vsub.f32 1.5, %v1868_v21 }
  0x98   : > { %v1836_v59 = vpop.eup %1517  ;;  %v366_v60 = vmul.f32 %v1830_v53, %v1797_v33  ;;  %v340_v2 = vmul.f32 %v1801_v36, %v339_v54  ;;  %v1879_v25 = vadd.f32 1e-06, %v277_v5  ;;  %vm372_vm9 = vweird.f32 %v1830_v53  ;;  %v1462_v47 = vld [vmem:[%s2339_s3 + $0x54] sm:$0xf0] }
  0x99   : > { %v346_v63 = vmul.f32 %v1836_v59, %v1799_v34  ;;  %1521 = vrsqrt.f32 %v1832_v55  ;;  %v1855_v15 = vpop.eup %1519  ;;  %vm352_vm5 = vweird.f32 %v1836_v59  ;;  %vm311_vm10 = vweird.f32 %v1832_v55  ;;  %vm1978_vm0 = vmor %vm371_vm4, %vm372_vm9 }
  0x9a   : > { %v367_v9 = vmul.f32 %v1830_v53, %v366_v60  ;;  %1523 = vrsqrt.f32 %v1834_v56  ;;  %v344_v24 = vsel %vm1870_vm3, %v1801_v36, %v340_v2  ;;  %v376_v35 = vmul.f32 %v1855_v15, %v1809_v39  ;;  %vm1903_vm8 = vmor %vm351_vm6, %vm352_vm5  ;;  %v1460_v60 = vld [vmem:[%s2339_s3 + $0x44] sm:$0xf0] }
  0x9b   : > { %v347_v10 = vmul.f32 %v1836_v59, %v346_v63  ;;  %1525 = vrsqrt.f32 %v1840_v61  ;;  %v399_v34 = vmul.f32 %v344_v24, %v1642_v1  ;;  %vm301_vm11 = vweird.f32 %v1834_v56 }
  0x9c   : > { %v255_v16 = vpop.xlane.xlu0 %254  ;;  %v368_v29 = vmul.f32 0.5, %v367_v9  ;;  %1527 = vrsqrt.f32 %v1879_v25  ;;  %v1348_v63 = vor.u32 %v1462_v47, %v1347_v44  ;;  %v377_v17 = vmul.f32 %v1855_v15, %v376_v35 }
  0x9d   : > { %v348_v23 = vmul.f32 0.5, %v347_v10  ;;  %v278_v26 = vmul.f32 %v1769_v3, %v255_v16  ;;  %v1893_v3 = vld [vmem:[%s2337_s1] ss:$0 sm:$0xff]  ;;  %v1341_v16 = vld [vmem:[%s2339_s3 + $0x48] sm:$0xf0]  ;;  %v1340_v21 = vor.u32 %v1460_v60, %v1339_v58  ;;  %v360_v33 = vmul.f32 %v1806_v38, %v359_v40 }
  0x9e   : > { %v369_v50 = vsub.f32 1.5, %v368_v29  ;;  %v413_v62 = vmul.f32 %v1893_v3, %v399_v34  ;;  %866 = vmatpush.bf16.msrb.mxu2 %v1348_v63  ;;  %v1344_v42 = vor.u32 %v1459_v11, %v1341_v16  ;;  %vm321_vm3 = vweird.f32 %v1879_v25  ;;  %v1454_v11 = vld [vmem:[%s2339_s3 + $0x14] sm:$0xf0]  ;;  %v1476_v16 = vld [vmem:[%s2340_s4 + $0x48] sm:$0xff] }
  0x9f   : > { %v1882_v28 = vpop.eup %1521  ;;  %v349_v30 = vsub.f32 1.5, %v348_v23  ;;  %v1907_v43 = vadd.f32 1e-06, %v278_v26  ;;  %v1458_v23 = vld [vmem:[%s2339_s3 + $0x34] sm:$0xf0]  ;;  %v378_v58 = vmul.f32 0.5, %v377_v17  ;;  %vm381_vm9 = vweird.f32 %v1809_v39 }
  0xa0   : > { %v306_v36 = vmul.f32 %v1882_v28, %v1832_v55  ;;  %v1895_v37 = vpop.eup %1523  ;;  %vm312_vm12 = vweird.f32 %v1882_v28  ;;  %v370_v55 = vmul.f32 %v1830_v53, %v369_v50  ;;  %v1332_v47 = vor.u32 %v1458_v23, %v1331_v22  ;;  %v1453_v17 = vld [vmem:[%s2339_s3 + $0x14] sm:$0xf] }
  0xa1   : > { %v350_v41 = vmul.f32 %v1836_v59, %v349_v30  ;;  %v1912_v45 = vpop.eup %1525  ;;  %v296_v46 = vmul.f32 %v1895_v37, %v1834_v56  ;;  %1529 = vrsqrt.f32 %v1907_v43  ;;  %vm302_vm13 = vweird.f32 %v1895_v37  ;;  %vm1961_vm15 = vmor %vm311_vm10, %vm312_vm12 }
  0xa2   : > { %v307_v1 = vmul.f32 %v1882_v28, %v306_v36  ;;  %v1945_v2 = vpop.eup %1527  ;;  %vm1998_vm1 = vmor %vm301_vm11, %vm302_vm13  ;;  %867 = vmatpush.bf16.msrb.mxu2 %v1340_v21  ;;  %vm331_vm5 = vweird.f32 %v1907_v43  ;;  %v379_v22 = vsub.f32 1.5, %v378_v58  ;;  %vm382_vm10 = vweird.f32 %v1855_v15  ;;  %v1470_v58 = vld [vmem:[%s2340_s4 + $0x18] sm:$0xff] }
  0xa3   : > { %v354_v51 = vsel %vm1903_vm8, %v1836_v59, %v350_v41  ;;  %v297_v57 = vmul.f32 %v1895_v37, %v296_v46  ;;  %v386_v59 = vmul.f32 %v1912_v45, %v1840_v61  ;;  %v316_v20 = vmul.f32 %v1945_v2, %v1879_v25  ;;  %vm383_vm13 = vmor %vm381_vm9, %vm382_vm10 }
  0xa4   : > { %v400_v52 = vmul.f32 %v354_v51, %v1657_v7  ;;  %v308_v54 = vmul.f32 0.5, %v307_v1  ;;  %v1352_v7 = vor.u32 %v1461_v48, %v1349_v49  ;;  %v1336_v48 = vor.u32 %v1457_v31, %v1333_v32  ;;  %v1456_v51 = vld [vmem:[%s2339_s3 + $0x24] sm:$0xf0]  ;;  %v1451_v32 = vld [vmem:[%s2339_s3 + $0x4] sm:$0xf] }
  0xa5   : > { %v298_v9 = vmul.f32 0.5, %v297_v57  ;;  %v387_v34 = vmul.f32 %v1912_v45, %v386_v59  ;;  %v317_v41 = vmul.f32 %v1945_v2, %v316_v20  ;;  %v374_v49 = vsel %vm1978_vm0, %v1830_v53, %v370_v55  ;;  %v1325_v57 = vld [vmem:[%s2339_s3 + $0x28] sm:$0xf0]  ;;  %v1452_v31 = vld [vmem:[%s2339_s3 + $0x4] sm:$0xf0] }
  0xa6   : > { %v309_v5 = vsub.f32 1.5, %v308_v54  ;;  %v414_v10 = vmul.f32 %v1893_v3, %v400_v52  ;;  %900 = vmatpush.bf16.msrb.mxu3 %v1352_v7  ;;  %vm322_vm4 = vweird.f32 %v1945_v2  ;;  %v402_v59 = vmul.f32 %v374_v49, %v1654_v6  ;;  %868 = vmatpush.bf16.msrb.mxu2 %v1332_v47  ;;  %v1315_v6 = vld [vmem:[%s2339_s3 + $0x10] sm:$0xf] }
  0xa7   : > { %v299_v29 = vsub.f32 1.5, %v298_v9  ;;  %v1991_v35 = vpop.eup %1529  ;;  %v318_v46 = vmul.f32 0.5, %v317_v41  ;;  %vm2056_vm7 = vmor %vm321_vm3, %vm322_vm4  ;;  %v1316_v23 = vor.u32 %v1454_v11, %v1315_v6  ;;  %vm391_vm11 = vweird.f32 %v1840_v61  ;;  %v1473_v49 = vld [vmem:[%s2340_s4 + $0x30] sm:$0xff]  ;;  %v1468_v11 = vld [vmem:[%s2340_s4 + $0x8] sm:$0xff] }
  0xa8   : > { %v310_v26 = vmul.f32 %v1882_v28, %v309_v5  ;;  %v1983_v30 = vpack.c.bf16 %v414_v10, %v413_v62  ;;  %v326_v40 = vmul.f32 %v1991_v35, %v1907_v43  ;;  %vm332_vm6 = vweird.f32 %v1991_v35 }
  0xa9   : > { %v300_v1 = vmul.f32 %v1895_v37, %v299_v29  ;;  %v319_v54 = vsub.f32 1.5, %v318_v46  ;;  %v388_v62 = vmul.f32 0.5, %v387_v34  ;;  %v1324_v10 = vor.u32 %v1456_v51, %v1323_v27  ;;  %vm2068_vm8 = vmor %vm331_vm5, %vm332_vm6  ;;  %v1307_v29 = vld [vmem:[%s2339_s3] sm:$0xf]  ;;  %v1480_v27 = vld [vmem:[%s2340_s4 + $0x68] sm:$0xff] }
  0xaa   : > { %v314_v44 = vsel %vm1961_vm15, %v1882_v28, %v310_v26  ;;  %538 = vmatmul.bf16.vlgmr.msra.gmra.mxu2 %v1983_v30  ;;  %572 = vmatmul.bf16.vlgmr.msra.gmra.mxu3 %v1983_v30  ;;  %v327_v50 = vmul.f32 %v1991_v35, %v326_v40  ;;  %v416_v43 = vmul.f32 %v1893_v3, %v402_v59  ;;  %vm392_vm12 = vweird.f32 %v1912_v45 }
  0xab   : > { %v396_v56 = vmul.f32 %v314_v44, %v1669_v12  ;;  %901 = vmatpush.bf16.msrb.mxu3 %v1344_v42  ;;  %v304_v12 = vsel %vm1998_vm1, %v1895_v37, %v300_v1  ;;  %v1455_v37 = vld [vmem:[%s2339_s3 + $0x24] sm:$0xf]  ;;  %v320_v7 = vmul.f32 %v1945_v2, %v319_v54  ;;  %v389_v55 = vsub.f32 1.5, %v388_v62  ;;  %869 = vmatpush.bf16.msrb.mxu2 %v1324_v10  ;;  %vm393_vm14 = vmor %vm391_vm11, %vm392_vm12 }
  0xac   : > { %v395_v52 = vmul.f32 %v304_v12, %v1672_v13  ;;  %v328_v60 = vmul.f32 0.5, %v327_v50  ;;  %v364_v13 = vsel %vm2017_vm2, %v1806_v38, %v360_v33  ;;  %v1328_v38 = vor.u32 %v1455_v37, %v1325_v57  ;;  %v1481_v12 = vld [vmem:[%s2340_s4 + $0x70] sm:$0xff]  ;;  %v1472_v50 = vld [vmem:[%s2340_s4 + $0x28] sm:$0xff]  ;;  %v1479_v37 = vld [vmem:[%s2340_s4 + $0x60] sm:$0xff] }
  0xad   : > { %v410_v53 = vmul.f32 %v1893_v3, %v396_v56  ;;  %v401_v20 = vmul.f32 %v364_v13, %v1639_v0  ;;  %v324_v24 = vsel %vm2056_vm7, %v1945_v2, %v320_v7  ;;  %v1320_v0 = vor.u32 %v1453_v17, %v1317_v19  ;;  %v1309_v2 = vld [vmem:[%s2339_s3 + $0x8] sm:$0xf0]  ;;  %v1477_v7 = vld [vmem:[%s2340_s4 + $0x50] sm:$0xff] }
  0xae   : > { %v409_v63 = vmul.f32 %v1893_v3, %v395_v52  ;;  %v329_v9 = vsub.f32 1.5, %v328_v60  ;;  %v397_v33 = vmul.f32 %v324_v24, %v1675_v14  ;;  %v1308_v41 = vor.u32 %v1452_v31, %v1307_v29  ;;  %v1478_v60 = vld [vmem:[%s2340_s4 + $0x58] sm:$0xff] }
  0xaf   : > { %902 = vmatpush.bf16.msrb.mxu3 %v1336_v48  ;;  %870 = vmatpush.bf16.msrb.mxu2 %v1316_v23  ;;  %v1312_v42 = vor.u32 %v1451_v32, %v1309_v2  ;;  %v380_v44 = vmul.f32 %v1855_v15, %v379_v22  ;;  %v390_v39 = vmul.f32 %v1912_v45, %v389_v55  ;;  %v1467_v23 = vld [vmem:[%s2340_s4] sm:$0xff] }
  0xb0   : > { %v419_v25 = vpack.c.bf16 %v410_v53, %v409_v63  ;;  %v330_v21 = vmul.f32 %v1991_v35, %v329_v9  ;;  %v411_v61 = vmul.f32 %v1893_v3, %v397_v33  ;;  %v1471_v53 = vld [vmem:[%s2340_s4 + $0x20] sm:$0xff]  ;;  %v1469_v63 = vld [vmem:[%s2340_s4 + $0x10] sm:$0xff] }
  0xb1   : > { %v384_v14 = vsel %vm383_vm13, %v1855_v15, %v380_v44  ;;  %v1474_v15 = vld [vmem:[%s2340_s4 + $0x38] sm:$0xff]  ;;  %v1475_v55 = vld [vmem:[%s2340_s4 + $0x40] sm:$0xff] }
  0xb2   : > { %528 = vmatmul.bf16.vlgmr.msra.gmra.mxu0 %v419_v25  ;;  %562 = vmatmul.bf16.vlgmr.msra.gmra.mxu1 %v419_v25  ;;  %v334_v26 = vsel %vm2068_vm8, %v1991_v35, %v330_v21  ;;  %v415_v35 = vmul.f32 %v1893_v3, %v401_v20  ;;  %v403_v56 = vmul.f32 %v384_v14, %v1649_v4 }
  0xb3   : > { %903 = vmatpush.bf16.msrb.mxu3 %v1328_v38  ;;  %v398_v36 = vmul.f32 %v334_v26, %v1684_v18  ;;  %871 = vmatpush.bf16.msrb.mxu2 %v1308_v41  ;;  %v394_v18 = vsel %vm393_vm14, %v1912_v45, %v390_v39 }
  0xb4   : > { %v422_v34 = vpack.c.bf16 %v416_v43, %v415_v35  ;;  %v404_v46 = vmul.f32 %v394_v18, %v1660_v8  ;;  %v417_v47 = vmul.f32 %v1893_v3, %v403_v56  ;;  %1090 = vmatpush.bf16.msrb.mxu0 %v1474_v15 }
  0xb5   : > { %v412_v1 = vmul.f32 %v1893_v3, %v398_v36 }
  0xb6   : > { %v418_v48 = vmul.f32 %v1893_v3, %v404_v46  ;;  %v1482_v3 = vld [vmem:[%s2340_s4 + $0x78] sm:$0xff] }
  0xb7   : > { %904 = vmatpush.bf16.msrb.mxu3 %v1320_v0  ;;  %v420_v40 = vpack.c.bf16 %v412_v1, %v411_v61  ;;  %1124 = vmatpush.bf16.msrb.mxu1 %v1482_v3 }
  0xb8   : > { %v423_v28 = vpack.c.bf16 %v418_v48, %v417_v47  ;;  %1091 = vmatpush.bf16.msrb.mxu0 %v1473_v49 }
  0xba   : > { %543 = vmatmul.bf16.gmra.mxu2 %v422_v34  ;;  %577 = vmatmul.bf16.gmra.mxu3 %v422_v34 }
  0xbb   : > { %905 = vmatpush.bf16.msrb.mxu3 %v1312_v42  ;;  %1125 = vmatpush.bf16.msrb.mxu1 %v1481_v12 }
  0xbc   : > { %1092 = vmatpush.bf16.msrb.mxu0 %v1472_v50 }
  0xbf   : > { %1126 = vmatpush.bf16.msrb.mxu1 %v1480_v27 }
  0xc0   : > { %1093 = vmatpush.bf16.msrb.mxu0 %v1471_v53 }
  0xc2   : > { %533 = vmatmul.bf16.gmra.mxu0 %v420_v40  ;;  %567 = vmatmul.bf16.gmra.mxu1 %v420_v40 }
  0xc3   : > { %1127 = vmatpush.bf16.msrb.mxu1 %v1479_v37 }
  0xc4   : > { %1094 = vmatpush.bf16.msrb.mxu0 %v1470_v58 }
  0xc7   : > { %1128 = vmatpush.bf16.msrb.mxu1 %v1478_v60 }
  0xc8   : > { %1095 = vmatpush.bf16.msrb.mxu0 %v1469_v63 }
  0xca   : > { %548 = vmatmul.bf16.gmra.mxu2 %v423_v28  ;;  %582 = vmatmul.bf16.gmra.mxu3 %v423_v28 }
  0xcb   : > { %1129 = vmatpush.bf16.msrb.mxu1 %v1477_v7 }
  0xcc   : > { %1096 = vmatpush.bf16.msrb.mxu0 %v1468_v11 }
  0xcf   : > { %1130 = vmatpush.bf16.msrb.mxu1 %v1476_v16 }
  0xd0   : > { %1097 = vmatpush.bf16.msrb.mxu0 %v1467_v23 }
  0xd3   : > { %1131 = vmatpush.bf16.msrb.mxu1 %v1475_v55 }
  0xda   : > { %872 = vmatmul.bf16.vlgmr.msrb.gmra.mxu2 %v419_v25  ;;  %906 = vmatmul.bf16.vlgmr.msrb.gmra.mxu3 %v419_v25 }
  0xea   : > { %877 = vmatmul.bf16.gmra.mxu2 %v420_v40  ;;  %911 = vmatmul.bf16.gmra.mxu3 %v420_v40 }
  0xfa   : > { %882 = vmatmul.bf16.gmra.mxu2 %v1983_v30  ;;  %916 = vmatmul.bf16.gmra.mxu3 %v1983_v30 }
 0x10a   : > { %887 = vmatmul.bf16.gmra.mxu2 %v422_v34  ;;  %921 = vmatmul.bf16.gmra.mxu3 %v422_v34 }
 0x11a   : > { %892 = vmatmul.bf16.gmra.mxu2 %v423_v28  ;;  %926 = vmatmul.bf16.gmra.mxu3 %v423_v28 }
 0x12d   : > { %v2118_v4 = vpop.f32.mrf.mxu2  ;;  %v2120_v8 = vpop.f32.mrf.mxu3 }
 0x12e   : > { %v616_v50 = vmul.f32 0.044715, %v2118_v4  ;;  %v617_v63 = vmul.f32 0.044715, %v2120_v8 }
 0x12f   : > { %v2128_v45 = vpop.f32.mrf.mxu0  ;;  %v2130_v30 = vpop.f32.mrf.mxu1 }
 0x130   : > { %v608_v62 = vmul.f32 0.044715, %v2128_v45  ;;  %v609_v5 = vmul.f32 0.044715, %v2130_v30  ;;  %v637_v23 = vmul.f32 %v617_v63, %v2120_v8 }
 0x132   : > { %v628_v38 = vmul.f32 %v608_v62, %v2128_v45  ;;  %v629_v25 = vmul.f32 %v609_v5, %v2130_v30 }
 0x134   : > { %v648_v43 = vmul.f32 %v628_v38, %v2128_v45  ;;  %v649_v24 = vmul.f32 %v629_v25, %v2130_v30 }
 0x135   : > { %v2144_v51 = vpop.f32.mrf.mxu2  ;;  %v2146_v52 = vpop.f32.mrf.mxu3 }
 0x136   : > { %v668_v29 = vadd.f32 %v648_v43, %v2128_v45  ;;  %v669_v2 = vadd.f32 %v649_v24, %v2130_v30  ;;  %v618_v55 = vmul.f32 0.044715, %v2144_v51  ;;  %v588_v24 = vmul.f32 0.5, %v2128_v45 }
 0x137   : > { %v2148_v54 = vpop.f32.mrf.mxu0  ;;  %v2156_v57 = vpop.f32.mrf.mxu1  ;;  %v657_v45 = vmul.f32 %v637_v23, %v2120_v8 }
 0x138   : > { %v610_v9 = vmul.f32 0.044715, %v2148_v54  ;;  %v611_v10 = vmul.f32 0.044715, %v2156_v57  ;;  %v688_v44 = vmul.f32 0.7978846, %v668_v29 }
 0x139   : > { %v689_v61 = vmul.f32 0.7978846, %v669_v2  ;;  %v589_v29 = vmul.f32 0.5, %v2130_v30  ;;  %v590_v2 = vmul.f32 0.5, %v2148_v54 }
 0x13a   : > { %v630_v20 = vmul.f32 %v610_v9, %v2148_v54  ;;  %v631_v22 = vmul.f32 %v611_v10, %v2156_v57  ;;  %1531 = vtanh.f32 %v688_v44  ;;  %v636_v10 = vmul.f32 %v616_v50, %v2118_v4 }
 0x13b   : > { %1533 = vtanh.f32 %v689_v61 }
 0x13c   : > { %v650_v26 = vmul.f32 %v630_v20, %v2148_v54  ;;  %v651_v0 = vmul.f32 %v631_v22, %v2156_v57 }
 0x13d   : > { %v2164_v13 = vpop.f32.mrf.mxu2  ;;  %v2166_v59 = vpop.f32.mrf.mxu3 }
 0x13e   : > { %v670_v33 = vadd.f32 %v650_v26, %v2148_v54  ;;  %v671_v34 = vadd.f32 %v651_v0, %v2156_v57  ;;  %v656_v0 = vmul.f32 %v636_v10, %v2118_v4 }
 0x13f   : > { %v2179_v6 = vpop.f32.mrf.mxu0  ;;  %v2193_v21 = vpop.f32.mrf.mxu1 }
 0x140   : > { %v612_v36 = vmul.f32 0.044715, %v2179_v6  ;;  %v613_v41 = vmul.f32 0.044715, %v2193_v21  ;;  %v690_v1 = vmul.f32 0.7978846, %v670_v33  ;;  %v1532_v12 = vpop.eup %1531 }
 0x141   : > { %v691_v40 = vmul.f32 0.7978846, %v671_v34  ;;  %v1534_v27 = vpop.eup %1533  ;;  %v728_v38 = vadd.f32 1.0, %v1532_v12  ;;  %v591_v33 = vmul.f32 0.5, %v2156_v57  ;;  %v677_v12 = vadd.f32 %v657_v45, %v2120_v8 }
 0x142   : > { %v632_v14 = vmul.f32 %v612_v36, %v2179_v6  ;;  %v633_v56 = vmul.f32 %v613_v41, %v2193_v21  ;;  %1535 = vtanh.f32 %v690_v1  ;;  %v729_v25 = vadd.f32 1.0, %v1534_v27 }
 0x143   : > { %1537 = vtanh.f32 %v691_v40  ;;  %v619_v36 = vmul.f32 0.044715, %v2146_v52  ;;  %v748_v34 = vmul.f32 %v728_v38, %v588_v24  ;;  %v638_v1 = vmul.f32 %v618_v55, %v2144_v51 }
 0x144   : > { %v652_v28 = vmul.f32 %v632_v14, %v2179_v6  ;;  %v653_v3 = vmul.f32 %v633_v56, %v2193_v21  ;;  %v749_v44 = vmul.f32 %v729_v25, %v589_v29  ;;  %v697_v63 = vmul.f32 0.7978846, %v677_v12 }
 0x145   : > { %v2188_v17 = vpop.f32.mrf.mxu2  ;;  %v2190_v19 = vpop.f32.mrf.mxu3  ;;  %v639_v56 = vmul.f32 %v619_v36, %v2146_v52  ;;  %v593_v23 = vmul.f32 0.5, %v2193_v21 }
 0x146   : > { %v672_v37 = vadd.f32 %v652_v28, %v2179_v6  ;;  %v673_v60 = vadd.f32 %v653_v3, %v2193_v21  ;;  %v623_v29 = vmul.f32 0.044715, %v2190_v19 }
 0x147   : > { %v2212_v35 = vpop.f32.mrf.mxu0  ;;  %v2218_v42 = vpop.f32.mrf.mxu1 }
 0x148   : > { %v614_v39 = vmul.f32 0.044715, %v2212_v35  ;;  %v615_v18 = vmul.f32 0.044715, %v2218_v42  ;;  %v1536_v58 = vpop.eup %1535  ;;  %v692_v11 = vmul.f32 0.7978846, %v672_v37 }
 0x149   : > { %v1538_v62 = vpop.eup %1537  ;;  %v730_v20 = vadd.f32 1.0, %v1536_v58  ;;  %v693_v43 = vmul.f32 0.7978846, %v673_v60  ;;  %v594_v55 = vmul.f32 0.5, %v2212_v35  ;;  %v595_v24 = vmul.f32 0.5, %v2218_v42 }
 0x14a   : > { %v634_v46 = vmul.f32 %v614_v39, %v2212_v35  ;;  %v635_v15 = vmul.f32 %v615_v18, %v2218_v42  ;;  %v731_v22 = vadd.f32 1.0, %v1538_v62  ;;  %1539 = vtanh.f32 %v692_v11 }
 0x14b   : > { %v750_v39 = vmul.f32 %v730_v20, %v590_v2  ;;  %1541 = vtanh.f32 %v693_v43  ;;  %v622_v20 = vmul.f32 0.044715, %v2188_v17  ;;  %v592_v43 = vmul.f32 0.5, %v2179_v6 }
 0x14c   : > { %v654_v49 = vmul.f32 %v634_v46, %v2212_v35  ;;  %v655_v53 = vmul.f32 %v635_v15, %v2218_v42  ;;  %v751_v61 = vmul.f32 %v731_v22, %v591_v33  ;;  %v676_v46 = vadd.f32 %v656_v0, %v2118_v4 }
 0x14d   : > { %v2207_v31 = vpop.f32.mrf.mxu2  ;;  %v2209_v32 = vpop.f32.mrf.mxu3  ;;  %v642_v6 = vmul.f32 %v622_v20, %v2188_v17  ;;  %v599_v20 = vmul.f32 0.5, %v2146_v52 }
 0x14e   : > { %v674_v9 = vadd.f32 %v654_v49, %v2212_v35  ;;  %v675_v16 = vadd.f32 %v655_v53, %v2218_v42  ;;  %v658_v49 = vmul.f32 %v638_v1, %v2144_v51  ;;  %v659_v53 = vmul.f32 %v639_v56, %v2146_v52 }
 0x14f   : > { %v696_v37 = vmul.f32 0.7978846, %v676_v46 }
 0x150   : > { %v694_v26 = vmul.f32 0.7978846, %v674_v9  ;;  %v695_v41 = vmul.f32 0.7978846, %v675_v16  ;;  %v1540_v3 = vpop.eup %1539  ;;  %v621_v9 = vmul.f32 0.044715, %v2166_v59  ;;  %v679_v10 = vadd.f32 %v659_v53, %v2146_v52 }
 0x151   : > { %v1542_v50 = vpop.eup %1541  ;;  %v732_v38 = vadd.f32 1.0, %v1540_v3 }
 0x152   : > { %1543 = vtanh.f32 %v694_v26  ;;  %v733_v11 = vadd.f32 1.0, %v1542_v50  ;;  %v641_v0 = vmul.f32 %v621_v9, %v2166_v59  ;;  %v699_v2 = vmul.f32 0.7978846, %v679_v10 }
 0x153   : > { %1545 = vtanh.f32 %v695_v41  ;;  %v752_v33 = vmul.f32 %v732_v38, %v592_v43 }
 0x154   : > { %1547 = vtanh.f32 %v696_v37  ;;  %v753_v36 = vmul.f32 %v733_v11, %v593_v23 }
 0x155   : > { %v2225_v47 = vpop.f32.mrf.mxu2  ;;  %v2227_v48 = vpop.f32.mrf.mxu3  ;;  %1549 = vtanh.f32 %v697_v63 }
 0x156   : > { %v626_v38 = vmul.f32 0.044715, %v2225_v47 }
 0x158   : > { %v1544_v27 = vpop.eup %1543 }
 0x159   : > { %v1546_v58 = vpop.eup %1545  ;;  %v734_v16 = vadd.f32 1.0, %v1544_v27  ;;  %v596_v27 = vmul.f32 0.5, %v2118_v4  ;;  %v598_v4 = vmul.f32 0.5, %v2144_v51 }
 0x15a   : > { %v735_v25 = vadd.f32 1.0, %v1546_v58  ;;  %v624_v58 = vmul.f32 0.044715, %v2207_v31 }
 0x15c   : > { %v755_v41 = vmul.f32 %v735_v25, %v595_v24 }
 0x15d   : > { %v873_v7 = vpop.f32.mrf.mxu2  ;;  %v907_v5 = vpop.f32.mrf.mxu3 }
 0x15e   : > { %v932_v30 = vmul.f32 %v873_v7, %v748_v34  ;;  %v933_v54 = vmul.f32 %v907_v5, %v749_v44  ;;  %v678_v7 = vadd.f32 %v658_v49, %v2144_v51  ;;  %v620_v5 = vmul.f32 0.044715, %v2164_v13  ;;  %v1548_v44 = vpop.eup %1547 }
 0x15f   : > { %v754_v34 = vmul.f32 %v734_v16, %v594_v55  ;;  %v1550_v1 = vpop.eup %1549  ;;  %v736_v53 = vadd.f32 1.0, %v1548_v44 }
 0x160   : > { %v698_v22 = vmul.f32 0.7978846, %v678_v7  ;;  %v640_v26 = vmul.f32 %v620_v5, %v2164_v13  ;;  %v737_v37 = vadd.f32 1.0, %v1550_v1  ;;  %v625_v7 = vmul.f32 0.044715, %v2209_v32 }
 0x161   : > { %v756_v16 = vmul.f32 %v736_v53, %v596_v27  ;;  %v602_v27 = vmul.f32 0.5, %v2188_v17  ;;  %v603_v53 = vmul.f32 0.5, %v2190_v19 }
 0x162   : > { %1551 = vtanh.f32 %v698_v22  ;;  %v644_v22 = vmul.f32 %v624_v58, %v2207_v31  ;;  %v645_v23 = vmul.f32 %v625_v7, %v2209_v32 }
 0x163   : > { %1553 = vtanh.f32 %v699_v2 }
 0x165   : > { %v875_v14 = vpop.f32.mrf.mxu2  ;;  %v909_v18 = vpop.f32.mrf.mxu3 }
 0x166   : > { %v934_v40 = vmul.f32 %v875_v14, %v750_v39  ;;  %v935_v57 = vmul.f32 %v909_v18, %v751_v61  ;;  %v660_v14 = vmul.f32 %v640_v26, %v2164_v13  ;;  %v643_v18 = vmul.f32 %v623_v29, %v2190_v19 }
 0x167   : > { %v646_v26 = vmul.f32 %v626_v38, %v2225_v47 }
 0x168   : > { %v952_v28 = vpack.c.bf16 %v934_v40, %v932_v30  ;;  %v953_v15 = vpack.c.bf16 %v935_v57, %v933_v54  ;;  %v661_v30 = vmul.f32 %v641_v0, %v2166_v59  ;;  %v662_v57 = vmul.f32 %v642_v6, %v2188_v17  ;;  %v1552_v56 = vpop.eup %1551 }
 0x169   : > { %v663_v46 = vmul.f32 %v643_v18, %v2190_v19  ;;  %v1554_v3 = vpop.eup %1553  ;;  %v738_v5 = vadd.f32 1.0, %v1552_v56 }
 0x16a   : > { %1098 = vmatmul.bf16.vlgmr.msrb.gmra.mxu0 %v952_v28  ;;  %1132 = vmatmul.bf16.vlgmr.msrb.gmra.mxu1 %v953_v15  ;;  %v680_v28 = vadd.f32 %v660_v14, %v2164_v13  ;;  %v681_v15 = vadd.f32 %v661_v30, %v2166_v59  ;;  %v682_v50 = vadd.f32 %v662_v57, %v2188_v17  ;;  %v739_v9 = vadd.f32 1.0, %v1554_v3 }
 0x16b   : > { %v683_v63 = vadd.f32 %v663_v46, %v2190_v19  ;;  %v758_v55 = vmul.f32 %v738_v5, %v598_v4 }
 0x16c   : > { %v701_v10 = vmul.f32 0.7978846, %v681_v15  ;;  %v702_v11 = vmul.f32 0.7978846, %v682_v50  ;;  %v759_v24 = vmul.f32 %v739_v9, %v599_v20  ;;  %v601_v50 = vmul.f32 0.5, %v2166_v59 }
 0x16d   : > { %v878_v60 = vpop.f32.mrf.mxu2  ;;  %v912_v62 = vpop.f32.mrf.mxu3  ;;  %v703_v43 = vmul.f32 0.7978846, %v683_v63 }
 0x16e   : > { %v936_v35 = vmul.f32 %v878_v60, %v752_v33  ;;  %v937_v61 = vmul.f32 %v912_v62, %v753_v36  ;;  %v597_v60 = vmul.f32 0.5, %v2120_v8  ;;  %v700_v62 = vmul.f32 0.7978846, %v680_v28 }
 0x16f   : > { %v627_v8 = vmul.f32 0.044715, %v2227_v48  ;;  %v664_v36 = vmul.f32 %v644_v22, %v2207_v31 }
 0x170   : > { %v757_v25 = vmul.f32 %v737_v37, %v597_v60  ;;  %1555 = vtanh.f32 %v700_v62 }
 0x171   : > { %1557 = vtanh.f32 %v701_v10 }
 0x172   : > { %1559 = vtanh.f32 %v702_v11 }
 0x173   : > { %1561 = vtanh.f32 %v703_v43 }
 0x175   : > { %v880_v39 = vpop.f32.mrf.mxu2  ;;  %v914_v21 = vpop.f32.mrf.mxu3 }
 0x176   : > { %v938_v42 = vmul.f32 %v880_v39, %v754_v34  ;;  %v939_v45 = vmul.f32 %v914_v21, %v755_v41  ;;  %v647_v34 = vmul.f32 %v627_v8, %v2227_v48  ;;  %v665_v41 = vmul.f32 %v645_v23, %v2209_v32  ;;  %v1556_v39 = vpop.eup %1555 }
 0x177   : > { %v666_v21 = vmul.f32 %v646_v26, %v2225_v47  ;;  %v606_v26 = vmul.f32 0.5, %v2225_v47 }
 0x178   : > { %v954_v54 = vpack.c.bf16 %v938_v42, %v936_v35  ;;  %v955_v40 = vpack.c.bf16 %v939_v45, %v937_v61  ;;  %v1558_v35 = vpop.eup %1557  ;;  %v667_v42 = vmul.f32 %v647_v34, %v2227_v48  ;;  %v684_v45 = vadd.f32 %v664_v36, %v2207_v31 }
 0x179   : > { %v1560_v61 = vpop.eup %1559  ;;  %v685_v1 = vadd.f32 %v665_v41, %v2209_v32  ;;  %v741_v46 = vadd.f32 1.0, %v1558_v35 }
 0x17a   : > { %1103 = vmatmul.bf16.gmra.mxu0 %v954_v54  ;;  %1137 = vmatmul.bf16.gmra.mxu1 %v955_v40  ;;  %v1562_v14 = vpop.eup %1561  ;;  %v686_v54 = vadd.f32 %v666_v21, %v2225_v47  ;;  %v740_v40 = vadd.f32 1.0, %v1556_v39  ;;  %v704_v57 = vmul.f32 0.7978846, %v684_v45  ;;  %v687_v56 = vadd.f32 %v667_v42, %v2227_v48  ;;  %v1571_v21 = vld [vmem:[%s1636_s24] sm:$0xff] }
 0x17b   : > { %v742_v28 = vadd.f32 1.0, %v1560_v61  ;;  %v743_v15 = vadd.f32 1.0, %v1562_v14  ;;  %v705_v3 = vmul.f32 0.7978846, %v685_v1  ;;  %v761_v60 = vmul.f32 %v741_v46, %v601_v50  ;;  %v1572_v1 = vld [vmem:[%s1636_s24 + $0x8] sm:$0xff] }
 0x17c   : > { %1563 = vtanh.f32 %v704_v57  ;;  %v707_v58 = vmul.f32 0.7978846, %v687_v56 }
 0x17d   : > { %v883_v49 = vpop.f32.mrf.mxu2  ;;  %v917_v12 = vpop.f32.mrf.mxu3  ;;  %v762_v62 = vmul.f32 %v742_v28, %v602_v27  ;;  %v763_v63 = vmul.f32 %v743_v15, %v603_v53  ;;  %1565 = vtanh.f32 %v705_v3  ;;  %v1574_v15 = vld [vmem:[%s1636_s24 + $0x18] sm:$0xff]  ;;  %v1575_v27 = vld [vmem:[%s1636_s24 + $0x20] sm:$0xff] }
 0x17e   : > { %v940_v2 = vmul.f32 %v883_v49, %v756_v16  ;;  %v941_v51 = vmul.f32 %v917_v12, %v757_v25  ;;  %v600_v49 = vmul.f32 0.5, %v2164_v13  ;;  %v706_v12 = vmul.f32 0.7978846, %v686_v54 }
 0x180   : > { %v760_v37 = vmul.f32 %v740_v40, %v600_v49  ;;  %1567 = vtanh.f32 %v706_v12  ;;  %v1573_v40 = vld [vmem:[%s1636_s24 + $0x10] sm:$0xff] }
 0x181   : > { %1569 = vtanh.f32 %v707_v58 }
 0x182   : > { %v1564_v17 = vpop.eup %1563 }
 0x183   : > { %v1566_v16 = vpop.eup %1565  ;;  %v744_v22 = vadd.f32 1.0, %v1564_v17  ;;  %v1578_v17 = vld [vmem:[%s1636_s24 + $0x38] sm:$0xff] }
 0x184   : > { %v745_v8 = vadd.f32 1.0, %v1566_v16 }
 0x185   : > { %v885_v0 = vpop.f32.mrf.mxu2  ;;  %v919_v29 = vpop.f32.mrf.mxu3 }
 0x186   : > { %v942_v33 = vmul.f32 %v885_v0, %v758_v55  ;;  %v943_v52 = vmul.f32 %v919_v29, %v759_v24  ;;  %v1568_v19 = vpop.eup %1567  ;;  %v604_v55 = vmul.f32 0.5, %v2207_v31  ;;  %v605_v24 = vmul.f32 0.5, %v2209_v32 }
 0x187   : > { %v1570_v25 = vpop.eup %1569  ;;  %v746_v43 = vadd.f32 1.0, %v1568_v19  ;;  %v607_v0 = vmul.f32 0.5, %v2227_v48 }
 0x188   : > { %v956_v44 = vpack.c.bf16 %v942_v33, %v940_v2  ;;  %v957_v6 = vpack.c.bf16 %v943_v52, %v941_v51  ;;  %v747_v23 = vadd.f32 1.0, %v1570_v25  ;;  %v764_v29 = vmul.f32 %v744_v22, %v604_v55  ;;  %v1580_v55 = vld [vmem:[%s1636_s24 + $0x48] sm:$0xff] }
 0x189   : > { %v765_v2 = vmul.f32 %v745_v8, %v605_v24  ;;  %v766_v51 = vmul.f32 %v746_v43, %v606_v26 }
 0x18a   : > { %1108 = vmatmul.bf16.gmra.mxu0 %v956_v44  ;;  %1142 = vmatmul.bf16.gmra.mxu1 %v957_v6  ;;  %v767_v33 = vmul.f32 %v747_v23, %v607_v0 }
 0x18d   : > { %v888_v18 = vpop.f32.mrf.mxu2  ;;  %v922_v30 = vpop.f32.mrf.mxu3 }
 0x18e   : > { %v944_v9 = vmul.f32 %v888_v18, %v760_v37  ;;  %v945_v10 = vmul.f32 %v922_v30, %v761_v60 }
 0x195   : > { %v890_v7 = vpop.f32.mrf.mxu2  ;;  %v924_v5 = vpop.f32.mrf.mxu3 }
 0x196   : > { %v946_v13 = vmul.f32 %v890_v7, %v762_v62  ;;  %v947_v38 = vmul.f32 %v924_v5, %v763_v63  ;;  %v1576_v62 = vld [vmem:[%s1636_s24 + $0x28] sm:$0xff] }
 0x198   : > { %v958_v59 = vpack.c.bf16 %v946_v13, %v944_v9  ;;  %v959_v11 = vpack.c.bf16 %v947_v38, %v945_v10  ;;  %v1577_v10 = vld [vmem:[%s1636_s24 + $0x30] sm:$0xff] }
 0x19a   : > { %1113 = vmatmul.bf16.gmra.mxu0 %v958_v59  ;;  %1147 = vmatmul.bf16.gmra.mxu1 %v959_v11 }
 0x19d   : > { %v893_v4 = vpop.f32.mrf.mxu2  ;;  %v927_v20 = vpop.f32.mrf.mxu3 }
 0x19e   : > { %v948_v34 = vmul.f32 %v893_v4, %v764_v29  ;;  %v949_v41 = vmul.f32 %v927_v20, %v765_v2  ;;  %v1579_v20 = vld [vmem:[%s1636_s24 + $0x40] sm:$0xff] }
 0x1a5   : > { %v895_v52 = vpop.f32.mrf.mxu2  ;;  %v929_v36 = vpop.f32.mrf.mxu3 }
 0x1a6   : > { %v950_v44 = vmul.f32 %v895_v52, %v766_v51  ;;  %v951_v6 = vmul.f32 %v929_v36, %v767_v33 }
 0x1a8   : > { %v960_v31 = vpack.c.bf16 %v950_v44, %v948_v34  ;;  %v961_v39 = vpack.c.bf16 %v951_v6, %v949_v41 }
 0x1aa   : > { %1118 = vmatmul.bf16.gmra.mxu0 %v960_v31  ;;  %1152 = vmatmul.bf16.gmra.mxu1 %v961_v39 }
 0x1e7   : > { %v1099_v32 = vpop.f32.mrf.mxu0  ;;  %v1133_v47 = vpop.f32.mrf.mxu1 }
 0x1e8   : > { %v1134_v48 = vadd.f32 %v1133_v47, %v1099_v32 }
 0x1ea   : > { %v1158_v35 = vadd.f32 %v1571_v21, %v1134_v48 }
 0x1ec   : > { %1168 = vst [vmem:[%s2311_s17] sm:$0xff] %v1158_v35 }
 0x1ef   : > { %v1101_v61 = vpop.f32.mrf.mxu0  ;;  %v1135_v42 = vpop.f32.mrf.mxu1 }
 0x1f0   : > { %v1136_v45 = vadd.f32 %v1135_v42, %v1101_v61 }
 0x1f2   : > { %v1159_v14 = vadd.f32 %v1572_v1, %v1136_v45 }
 0x1f4   : > { %1169 = vst [vmem:[%s2311_s17 + $0x8] sm:$0xff] %v1159_v14 }
 0x1f7   : > { %v1104_v18 = vpop.f32.mrf.mxu0  ;;  %v1138_v30 = vpop.f32.mrf.mxu1 }
 0x1f8   : > { %v1139_v54 = vadd.f32 %v1138_v30, %v1104_v18 }
 0x1fa   : > { %v1160_v57 = vadd.f32 %v1573_v40, %v1139_v54 }
 0x1fc   : > { %1170 = vst [vmem:[%s2311_s17 + $0x10] sm:$0xff] %v1160_v57 }
 0x1ff   : > { %v1106_v56 = vpop.f32.mrf.mxu0  ;;  %v1140_v46 = vpop.f32.mrf.mxu1 }
 0x200   : > { %v1141_v28 = vadd.f32 %v1140_v46, %v1106_v56 }
 0x202   : > { %v1161_v3 = vadd.f32 %v1574_v15, %v1141_v28 }
 0x204   : > { %1171 = vst [vmem:[%s2311_s17 + $0x18] sm:$0xff] %v1161_v3 }
 0x207   : > { %v1109_v49 = vpop.f32.mrf.mxu0  ;;  %v1143_v12 = vpop.f32.mrf.mxu1 }
 0x208   : > { %v1144_v50 = vadd.f32 %v1143_v12, %v1109_v49 }
 0x20a   : > { %v1162_v53 = vadd.f32 %v1575_v27, %v1144_v50 }
 0x20c   : > { %1172 = vst [vmem:[%s2311_s17 + $0x20] sm:$0xff] %v1162_v53 }
 0x20f   : > { %v1111_v37 = vpop.f32.mrf.mxu0  ;;  %v1145_v58 = vpop.f32.mrf.mxu1 }
 0x210   : > { %v1146_v60 = vadd.f32 %v1145_v58, %v1111_v37 }
 0x212   : > { %v1163_v63 = vadd.f32 %v1576_v62, %v1146_v60 }
 0x214   : > { %1173 = vst [vmem:[%s2311_s17 + $0x28] sm:$0xff] %v1163_v63 }
 0x217   : > { %v1114_v7 = vpop.f32.mrf.mxu0  ;;  %v1148_v5 = vpop.f32.mrf.mxu1 }
 0x218   : > { %v1149_v9 = vadd.f32 %v1148_v5, %v1114_v7 }
 0x21a   : > { %v1164_v13 = vadd.f32 %v1577_v10, %v1149_v9 }
 0x21c   : > { %1174 = vst [vmem:[%s2311_s17 + $0x30] sm:$0xff] %v1164_v13 }
 0x21f   : > { %v1116_v38 = vpop.f32.mrf.mxu0  ;;  %v1150_v59 = vpop.f32.mrf.mxu1 }
 0x220   : > { %v1151_v11 = vadd.f32 %v1150_v59, %v1116_v38 }
 0x222   : > { %v1165_v16 = vadd.f32 %v1578_v17, %v1151_v11 }
 0x224   : > { %1175 = vst [vmem:[%s2311_s17 + $0x38] sm:$0xff] %v1165_v16 }
 0x227   : > { %v1119_v19 = vpop.f32.mrf.mxu0  ;;  %v1153_v25 = vpop.f32.mrf.mxu1 }
 0x228   : > { %v1154_v4 = vadd.f32 %v1153_v25, %v1119_v19 }
 0x22a   : > { %v1166_v22 = vadd.f32 %v1579_v20, %v1154_v4 }
 0x22c   : > { %1176 = vst [vmem:[%s2311_s17 + $0x40] sm:$0xff] %v1166_v22 }
 0x22f   : > { %v1121_v8 = vpop.f32.mrf.mxu0  ;;  %v1155_v43 = vpop.f32.mrf.mxu1 }
 0x230   : > { %v1156_v23 = vadd.f32 %v1155_v43, %v1121_v8 }
 0x232   : > { %v1167_v24 = vadd.f32 %v1580_v55, %v1156_v23 }
 0x234   : > { %1177 = vst [vmem:[%s2311_s17 + $0x48] sm:$0xff] %v1167_v24 }
 0x235 PF: > { %s15_s18 = sadd.s32 1, %s1587_s18  }
 0x236   : > { %p12_p4 = scmp.ge.s32.totalorder %s15_s18, 4  }
 0x238   :  { %14 = sbr.rel (!%p12_p4) target bundleno = 1 (0x1), region = 70 }

// kernel: t5_encoder.5
= control target key start
LH: loop header
LB: loop body
LE: loop exit
PB: predicated region body
PF: predicated region fallthrough
CT: control target
= control target key end

     0   :  { %s1970_s18 = smov 0   ;;  %s2890_s0 = inlined_call_operand.vmem [shape: f32[2,80,128], index: 0, kind: input, shape index: {}]   ;;  %s2891_s1 = inlined_call_operand.vmem [shape: f32[1,128], index: 1, kind: input, shape index: {}]   ;;  %s2892_s2 = inlined_call_operand.vmem [shape: bf16[128,384], index: 2, kind: input, shape index: {}]   ;;  %s2893_s3 = inlined_call_operand.vmem [shape: bf16[128,128], index: 3, kind: input, shape index: {}]   ;;  %s2894_s4 = inlined_call_operand.vmem [shape: f32[2,80,80], index: 4, kind: input, shape index: {}]   ;;  %s2895_s5 = inlined_call_operand.vmem [shape: f32[2,80,128], index: 5, kind: output, shape index: {}]  }
   0x1 LB: > { %s1551_s19 = sadd.s32 4294967295, %s1936_s18   ;;  %p1555_p0 = scmp.ge.s32.totalorder %s1936_s18, 1  ;;  %s1936_s18 = sphi %s1970_s18, %s15_s18  }
   0x2   : > { %p187_p1 = scmp.lt.s32.totalorder %s1936_s18, 3 }
   0x4   : > { %p188_p2 = pnand %p1555_p0, %p187_p1 }
   0x5   : > { %p215_p3 = scmp.lt.s32.totalorder (!%p188_p2), %s1551_s19, 1  ;;  %s1939_s13 = smov (!%p188_p2), 64  }
   0x6   : > { %191 = sbr.rel (%p188_p2) target bundleno = 1432 (0x598), region = 40 }
   0xb   : > { %s2915_s19 = smov (!%p215_p3, %s1551_s19), 1  ;;  %v1644_v20 = vld [vmem:[%s2892_s2 + $0xa8] sm:$0xf]  ;;  %v1780_v21 = vld [vmem:[%s2892_s2 + $0xb0] sm:$0xf0]  ;;  %v1938_v22 = vmov 128.0  }
   0xc   : > { %s1806_s20 = smul.u32 80, %s2915_s19  ;;  %1818 = vrcp.f32 %v1938_v22  ;;  %v1645_v23 = vor.u32 %v1780_v21, %v1644_v20  ;;  %v1632_v24 = vld [vmem:[%s2892_s2 + $0x90] sm:$0xf]  ;;  %v1777_v25 = vld [vmem:[%s2892_s2 + $0x98] sm:$0xf0] }
   0xd   : > { %v1633_v26 = vor.u32 %v1777_v25, %v1632_v24  ;;  %v1620_v28 = vld [vmem:[%s2892_s2 + $0x78] sm:$0xf]  ;;  %v1774_v29 = vld [vmem:[%s2892_s2 + $0x80] sm:$0xf0]  ;;  %v1608_v32 = vld [vmem:[%s2892_s2 + $0x60] sm:$0xf] }
   0xe   : > { %s1986_s23 = scalar_lea.vmem %s2890_s0, %s1806_s20  ;;  %1790 = vmatpush.bf16.msra.mxu1 %v1645_v23  ;;  %582 = vmatpush.bf16.msra.mxu0 %v1645_v23  ;;  %v1621_v31 = vor.u32 %v1774_v29, %v1620_v28  ;;  %v1771_v33 = vld [vmem:[%s2892_s2 + $0x68] sm:$0xf0]  ;;  %v1596_v36 = vld [vmem:[%s2892_s2 + $0x48] sm:$0xf]  ;;  %v1768_v37 = vld [vmem:[%s2892_s2 + $0x50] sm:$0xf0]  ;;  %s2866_s10 = scalar_lea.vmem %s2895_s5, %s1806_s20 }
   0xf   : > { %v1989_v0 = vld [vmem:[%s1986_s23 + $0x30] sm:$0xff]  ;;  %v1992_v1 = vld [vmem:[%s1986_s23 + $0x20] sm:$0xff]  ;;  %v2004_v6 = vld [vmem:[%s1986_s23 + $0x38] sm:$0xff]  ;;  %1791 = vmatpush.bf16.msra.mxu2 %v1645_v23  ;;  %v1609_v35 = vor.u32 %v1771_v33, %v1608_v32  ;;  %v1597_v39 = vor.u32 %v1768_v37, %v1596_v36 }
  0x10   : > { %v1995_v2 = vld [vmem:[%s1986_s23] sm:$0xff]  ;;  %v242_v3 = vmul.f32 %v1989_v0, %v1989_v0  ;;  %v240_v4 = vmul.f32 %v1992_v1, %v1992_v1  ;;  %v2007_v7 = vld [vmem:[%s1986_s23 + $0x28] sm:$0xff]  ;;  %v243_v9 = vmul.f32 %v2004_v6, %v2004_v6  ;;  %v2019_v12 = vld [vmem:[%s1986_s23 + $0x10] sm:$0xff] }
  0x11   : > { %v236_v5 = vmul.f32 %v1995_v2, %v1995_v2  ;;  %v2010_v8 = vld [vmem:[%s1986_s23 + $0x8] sm:$0xff]  ;;  %v241_v10 = vmul.f32 %v2007_v7, %v2007_v7  ;;  %v2022_v13 = vld [vmem:[%s1986_s23 + $0x18] sm:$0xff]  ;;  %v2025_v14 = vld [vmem:[%s1986_s23 + $0x40] sm:$0xff]  ;;  %v238_v15 = vmul.f32 %v2019_v12, %v2019_v12 }
  0x12   : > { %258 = vadd.xlane.f32.xlu1 %v242_v3  ;;  %254 = vadd.xlane.f32.xlu0 %v240_v4  ;;  %v237_v11 = vmul.f32 %v2010_v8, %v2010_v8  ;;  %v239_v16 = vmul.f32 %v2022_v13, %v2022_v13  ;;  %v244_v17 = vmul.f32 %v2025_v14, %v2025_v14  ;;  %v2034_v18 = vld [vmem:[%s1986_s23 + $0x48] sm:$0xff]  ;;  %v1819_v27 = vpop.eup %1818  ;;  %v1584_v40 = vld [vmem:[%s2892_s2 + $0x30] sm:$0xf]  ;;  %v1765_v41 = vld [vmem:[%s2892_s2 + $0x38] sm:$0xf0] }
  0x13   : > { %246 = vadd.xlane.f32.xlu2 %v236_v5  ;;  %v245_v19 = vmul.f32 %v2034_v18, %v2034_v18  ;;  %1792 = vmatpush.bf16.msra.mxu1 %v1633_v26  ;;  %v267_v30 = vmul.f32 128.0, %v1819_v27  ;;  %v1585_v43 = vor.u32 %v1765_v41, %v1584_v40  ;;  %vm271_vm0 = vweird.f32 %v1819_v27  ;;  %v1572_v44 = vld [vmem:[%s2892_s2 + $0x18] sm:$0xf]  ;;  %v1762_v45 = vld [vmem:[%s2892_s2 + $0x20] sm:$0xf0] }
  0x14   : > { %583 = vmatpush.bf16.msra.mxu0 %v1633_v26  ;;  %1793 = vmatpush.bf16.msra.mxu2 %v1633_v26  ;;  %v1573_v47 = vor.u32 %v1762_v45, %v1572_v44  ;;  %v1560_v53 = vld [vmem:[%s2892_s2] sm:$0xf]  ;;  %v1759_v54 = vld [vmem:[%s2892_s2 + $0x8] sm:$0xf0]  ;;  %v1646_v61 = vld [vmem:[%s2892_s2 + $0xb4] sm:$0xf0] }
  0x15   : > { %v268_v34 = vsub.f32 1.0, %v267_v30  ;;  %v1561_v56 = vor.u32 %v1759_v54, %v1560_v53  ;;  %v1779_v60 = vld [vmem:[%s2892_s2 + $0xac] sm:$0xf]  ;;  %v1652_v62 = vld [vmem:[%s2892_s2 + $0xb0] sm:$0xf] }
  0x16   : > { %v1649_v4 = vor.u32 %v1779_v60, %v1646_v61  ;;  %v1781_v5 = vld [vmem:[%s2892_s2 + $0xb8] sm:$0xf0]  ;;  %v1776_v24 = vld [vmem:[%s2892_s2 + $0x94] sm:$0xf]  ;;  %v1640_v28 = vld [vmem:[%s2892_s2 + $0x98] sm:$0xf] }
  0x17   : > { %1794 = vmatpush.bf16.msra.mxu1 %v1621_v31  ;;  %v269_v38 = vmul.f32 %v1819_v27, %v268_v34  ;;  %v1778_v29 = vld [vmem:[%s2892_s2 + $0xa0] sm:$0xf0]  ;;  %v1773_v32 = vld [vmem:[%s2892_s2 + $0x7c] sm:$0xf]  ;;  %v1622_v33 = vld [vmem:[%s2892_s2 + $0x84] sm:$0xf0] }
  0x18   : > { %584 = vmatpush.bf16.msra.mxu0 %v1621_v31  ;;  %1795 = vmatpush.bf16.msra.mxu2 %v1621_v31  ;;  %v1628_v40 = vld [vmem:[%s2892_s2 + $0x80] sm:$0xf]  ;;  %v1775_v41 = vld [vmem:[%s2892_s2 + $0x88] sm:$0xf0]  ;;  %v1610_v54 = vld [vmem:[%s2892_s2 + $0x6c] sm:$0xf0] }
  0x19   : > { %v270_v42 = vadd.f32 %v1819_v27, %v269_v38  ;;  %v1629_v53 = vor.u32 %v1775_v41, %v1628_v40 }
  0x1a   : > { %260 = vadd.xlane.f32.xlu1 %v243_v9  ;;  %256 = vadd.xlane.f32.xlu0 %v241_v10 }
  0x1b   : > { %248 = vadd.xlane.f32.xlu2 %v237_v11  ;;  %1796 = vmatpush.bf16.msra.mxu1 %v1609_v35  ;;  %v2080_v46 = vsel %vm271_vm0, %v1819_v27, %v270_v42  ;;  %v1634_v27 = vld [vmem:[%s2892_s2 + $0x9c] sm:$0xf0] }
  0x1c   : > { %585 = vmatpush.bf16.msra.mxu0 %v1609_v35  ;;  %1797 = vmatpush.bf16.msra.mxu2 %v1609_v35  ;;  %v1637_v38 = vor.u32 %v1776_v24, %v1634_v27 }
  0x1f   : > { %1798 = vmatpush.bf16.msra.mxu1 %v1597_v39 }
  0x20   : > { %586 = vmatpush.bf16.msra.mxu0 %v1597_v39  ;;  %1799 = vmatpush.bf16.msra.mxu2 %v1597_v39  ;;  %v1641_v39 = vor.u32 %v1778_v29, %v1640_v28 }
  0x22   : > { %250 = vadd.xlane.f32.xlu0 %v238_v15  ;;  %252 = vadd.xlane.f32.xlu1 %v239_v16  ;;  %v1653_v15 = vor.u32 %v1781_v5, %v1652_v62 }
  0x23   : > { %262 = vadd.xlane.f32.xlu2 %v244_v17  ;;  %1800 = vmatpush.bf16.msra.mxu1 %v1585_v43 }
  0x24   : > { %587 = vmatpush.bf16.msra.mxu0 %v1585_v43  ;;  %1801 = vmatpush.bf16.msra.mxu2 %v1585_v43 }
  0x27   : > { %1802 = vmatpush.bf16.msra.mxu1 %v1573_v47 }
  0x28   : > { %588 = vmatpush.bf16.msra.mxu0 %v1573_v47  ;;  %1803 = vmatpush.bf16.msra.mxu2 %v1573_v47 }
  0x2a   : > { %264 = vadd.xlane.f32.xlu0 %v245_v19 }
  0x2b   : > { %1804 = vmatpush.bf16.msra.mxu1 %v1561_v56 }
  0x2c   : > { %589 = vmatpush.bf16.msra.mxu0 %v1561_v56  ;;  %1805 = vmatpush.bf16.msra.mxu2 %v1561_v56 }
  0x2f   : > { %616 = vmatpush.bf16.msrb.mxu1 %v1649_v4 }
  0x30   : > { %650 = vmatpush.bf16.msrb.mxu2 %v1653_v15 }
  0x33   : > { %617 = vmatpush.bf16.msrb.mxu1 %v1637_v38  ;;  %v1772_v38 = vld [vmem:[%s2892_s2 + $0x70] sm:$0xf0] }
  0x34   : > { %651 = vmatpush.bf16.msrb.mxu2 %v1641_v39 }
  0x38   : > { %652 = vmatpush.bf16.msrb.mxu2 %v1629_v53 }
  0x85   : > { %v259_v48 = vpop.xlane.xlu1 %258  ;;  %v255_v49 = vpop.xlane.xlu0 %254 }
  0x86   : > { %v279_v50 = vmul.f32 %v2080_v46, %v259_v48  ;;  %v277_v51 = vmul.f32 %v2080_v46, %v255_v49  ;;  %v247_v52 = vpop.xlane.xlu2 %246  ;;  %v1625_v48 = vor.u32 %v1773_v32, %v1622_v33  ;;  %v1770_v49 = vld [vmem:[%s2892_s2 + $0x64] sm:$0xf] }
  0x87   : > { %v273_v55 = vmul.f32 %v2080_v46, %v247_v52 }
  0x88   : > { %v2091_v57 = vadd.f32 1e-06, %v279_v50  ;;  %v2093_v58 = vadd.f32 1e-06, %v277_v51  ;;  %618 = vmatpush.bf16.msrb.mxu1 %v1625_v48 }
  0x89   : > { %v2095_v59 = vadd.f32 1e-06, %v273_v55 }
  0x8a   : > { %1820 = vrsqrt.f32 %v2091_v57  ;;  %vm339_vm3 = vweird.f32 %v2093_v58  ;;  %vm359_vm7 = vweird.f32 %v2091_v57 }
  0x8b   : > { %1822 = vrsqrt.f32 %v2093_v58  ;;  %vm299_vm1 = vweird.f32 %v2095_v59 }
  0x8c   : > { %1824 = vrsqrt.f32 %v2095_v59 }
  0x8d   : > { %v261_v63 = vpop.xlane.xlu1 %260  ;;  %v257_v3 = vpop.xlane.xlu0 %256 }
  0x8e   : > { %v280_v9 = vmul.f32 %v2080_v46, %v261_v63  ;;  %v278_v10 = vmul.f32 %v2080_v46, %v257_v3  ;;  %v249_v11 = vpop.xlane.xlu2 %248 }
  0x8f   : > { %v274_v16 = vmul.f32 %v2080_v46, %v249_v11 }
  0x90   : > { %v2115_v17 = vpop.eup %1820  ;;  %v2117_v19 = vadd.f32 1e-06, %v280_v9  ;;  %v2119_v20 = vadd.f32 1e-06, %v278_v10  ;;  %v1613_v10 = vor.u32 %v1770_v49, %v1610_v54  ;;  %v1767_v54 = vld [vmem:[%s2892_s2 + $0x4c] sm:$0xf] }
  0x91   : > { %v2121_v21 = vpop.eup %1822  ;;  %v354_v22 = vmul.f32 %v2115_v17, %v2091_v57  ;;  %v2125_v23 = vadd.f32 1e-06, %v274_v16  ;;  %vm360_vm8 = vweird.f32 %v2115_v17  ;;  %v1586_v57 = vld [vmem:[%s2892_s2 + $0x3c] sm:$0xf0] }
  0x92   : > { %v2130_v25 = vpop.eup %1824  ;;  %v334_v26 = vmul.f32 %v2121_v21, %v2093_v58  ;;  %1826 = vrsqrt.f32 %v2117_v19  ;;  %vm340_vm4 = vweird.f32 %v2121_v21  ;;  %619 = vmatpush.bf16.msrb.mxu1 %v1613_v10  ;;  %vm369_vm12 = vweird.f32 %v2117_v19 }
  0x93   : > { %v294_v30 = vmul.f32 %v2130_v25, %v2095_v59  ;;  %1828 = vrsqrt.f32 %v2119_v20  ;;  %v355_v34 = vmul.f32 %v2115_v17, %v354_v22  ;;  %vm300_vm2 = vweird.f32 %v2130_v25  ;;  %vm2218_vm10 = vmor %vm339_vm3, %vm340_vm4 }
  0x94   : > { %v335_v31 = vmul.f32 %v2121_v21, %v334_v26  ;;  %1830 = vrsqrt.f32 %v2125_v23  ;;  %vm2199_vm5 = vmor %vm299_vm1, %vm300_vm2  ;;  %vm309_vm6 = vweird.f32 %v2125_v23  ;;  %vm349_vm13 = vweird.f32 %v2119_v20 }
  0x95   : > { %v295_v35 = vmul.f32 %v2130_v25, %v294_v30  ;;  %v251_v36 = vpop.xlane.xlu0 %250  ;;  %v253_v37 = vpop.xlane.xlu1 %252  ;;  %v356_v56 = vmul.f32 0.5, %v355_v34 }
  0x96   : > { %v336_v42 = vmul.f32 0.5, %v335_v31  ;;  %v275_v43 = vmul.f32 %v2080_v46, %v251_v36  ;;  %v263_v44 = vpop.xlane.xlu2 %262  ;;  %v276_v45 = vmul.f32 %v2080_v46, %v253_v37 }
  0x97   : > { %v296_v47 = vmul.f32 0.5, %v295_v35  ;;  %v281_v62 = vmul.f32 %v2080_v46, %v263_v44  ;;  %v357_v24 = vsub.f32 1.5, %v356_v56  ;;  %v2274_v44 = vld [vmem:[%s2891_s1] ss:$0 sm:$0xff] }
  0x98   : > { %v2169_v50 = vpop.eup %1826  ;;  %v337_v51 = vsub.f32 1.5, %v336_v42  ;;  %v2172_v52 = vadd.f32 1e-06, %v275_v43  ;;  %v2187_v4 = vadd.f32 1e-06, %v276_v45 }
  0x99   : > { %v2177_v55 = vpop.eup %1828  ;;  %v297_v60 = vsub.f32 1.5, %v296_v47  ;;  %v364_v61 = vmul.f32 %v2169_v50, %v2117_v19  ;;  %v2207_v28 = vadd.f32 1e-06, %v281_v62  ;;  %vm370_vm14 = vweird.f32 %v2169_v50 }
  0x9a   : > { %v2182_v63 = vpop.eup %1830  ;;  %v344_v3 = vmul.f32 %v2177_v55, %v2119_v20  ;;  %1832 = vrsqrt.f32 %v2172_v52  ;;  %v338_v11 = vmul.f32 %v2121_v21, %v337_v51  ;;  %vm350_vm9 = vweird.f32 %v2177_v55 }
  0x9b   : > { %v298_v5 = vmul.f32 %v2130_v25, %v297_v60  ;;  %v304_v9 = vmul.f32 %v2182_v63, %v2125_v23  ;;  %v365_v16 = vmul.f32 %v2169_v50, %v364_v61  ;;  %1834 = vrsqrt.f32 %v2187_v4  ;;  %vm2263_vm0 = vmor %vm349_vm13, %vm350_vm9 }
  0x9c   : > { %v345_v22 = vmul.f32 %v2177_v55, %v344_v3  ;;  %vm310_vm11 = vweird.f32 %v2182_v63  ;;  %1836 = vrsqrt.f32 %v2207_v28  ;;  %v342_v58 = vsel %vm2218_vm10, %v2121_v21, %v338_v11  ;;  %v1616_v21 = vld [vmem:[%s2892_s2 + $0x68] sm:$0xf]  ;;  %vm2358_vm9 = vmor %vm369_vm12, %vm370_vm14 }
  0x9d   : > { %v305_v26 = vmul.f32 %v2182_v63, %v304_v9  ;;  %v265_v27 = vpop.xlane.xlu0 %264  ;;  %v302_v31 = vsel %vm2199_vm5, %v2130_v25, %v298_v5  ;;  %v2232_v33 = vmul.f32 0.5, %v365_v16  ;;  %v2238_v25 = vmul.f32 %v2115_v17, %v357_v24  ;;  %vm2255_vm15 = vmor %vm309_vm6, %vm310_vm11  ;;  %v1769_v16 = vld [vmem:[%s2892_s2 + $0x58] sm:$0xf0] }
  0x9e   : > { %v346_v59 = vmul.f32 0.5, %v345_v22  ;;  %v282_v29 = vmul.f32 %v2080_v46, %v265_v27  ;;  %v393_v40 = vmul.f32 %v302_v31, %v1995_v2  ;;  %vm319_vm1 = vweird.f32 %v2172_v52  ;;  %vm2320_vm5 = vmor %vm359_vm7, %vm360_vm8 }
  0x9f   : > { %v306_v32 = vmul.f32 0.5, %v305_v26  ;;  %v397_v23 = vmul.f32 %v342_v58, %v1992_v1  ;;  %v367_v45 = vsub.f32 1.5, %v2232_v33  ;;  %vm329_vm2 = vweird.f32 %v2187_v4  ;;  %v1592_v58 = vld [vmem:[%s2892_s2 + $0x38] sm:$0xf] }
  0xa0   : > { %v2227_v46 = vpop.eup %1832  ;;  %v347_v34 = vsub.f32 1.5, %v346_v59  ;;  %v2235_v35 = vadd.f32 1e-06, %v282_v29  ;;  %v1617_v48 = vor.u32 %v1772_v38, %v1616_v21  ;;  %vm379_vm3 = vweird.f32 %v2207_v28  ;;  %v1764_v59 = vld [vmem:[%s2892_s2 + $0x34] sm:$0xf] }
  0xa1   : > { %v307_v36 = vsub.f32 1.5, %v306_v32  ;;  %v314_v37 = vmul.f32 %v2227_v46, %v2172_v52  ;;  %v2276_v2 = vpop.eup %1834  ;;  %v407_v62 = vmul.f32 %v2274_v44, %v393_v40  ;;  %vm320_vm4 = vweird.f32 %v2227_v46  ;;  %v1766_v52 = vld [vmem:[%s2892_s2 + $0x40] sm:$0xf0]  ;;  %v1761_v38 = vld [vmem:[%s2892_s2 + $0x1c] sm:$0xf] }
  0xa2   : > { %v348_v39 = vmul.f32 %v2177_v55, %v347_v34  ;;  %1838 = vrsqrt.f32 %v2235_v35  ;;  %v2283_v49 = vpop.eup %1836  ;;  %v324_v53 = vmul.f32 %v2276_v2, %v2187_v4  ;;  %653 = vmatpush.bf16.msrb.mxu2 %v1617_v48  ;;  %v411_v5 = vmul.f32 %v2274_v44, %v397_v23  ;;  %vm2338_vm7 = vmor %vm319_vm1, %vm320_vm4 }
  0xa3   : > { %v308_v42 = vmul.f32 %v2182_v63, %v307_v36  ;;  %v315_v43 = vmul.f32 %v2227_v46, %v314_v37  ;;  %v374_v56 = vmul.f32 %v2283_v49, %v2207_v28  ;;  %vm330_vm6 = vweird.f32 %v2276_v2  ;;  %v1763_v28 = vld [vmem:[%s2892_s2 + $0x28] sm:$0xf0] }
  0xa4   : > { %v352_v47 = vsel %vm2263_vm0, %v2177_v55, %v348_v39  ;;  %v1598_v55 = vld [vmem:[%s2892_s2 + $0x54] sm:$0xf0]  ;;  %v325_v3 = vmul.f32 %v2276_v2, %v324_v53  ;;  %vm380_vm8 = vweird.f32 %v2283_v49  ;;  %v368_v33 = vmul.f32 %v2169_v50, %v367_v45  ;;  %v1574_v39 = vld [vmem:[%s2892_s2 + $0x24] sm:$0xf0]  ;;  %vm2375_vm12 = vmor %vm329_vm2, %vm330_vm6 }
  0xa5   : > { %v312_v1 = vsel %vm2255_vm15, %v2182_v63, %v308_v42  ;;  %v316_v51 = vmul.f32 0.5, %v315_v43  ;;  %v398_v60 = vmul.f32 %v352_v47, %v2007_v7  ;;  %v375_v10 = vmul.f32 %v2283_v49, %v374_v56  ;;  %vm2388_vm13 = vmor %vm379_vm3, %vm380_vm8  ;;  %v1758_v53 = vld [vmem:[%s2892_s2 + $0x4] sm:$0xf] }
  0xa6   : > { %v394_v61 = vmul.f32 %v312_v1, %v2010_v8  ;;  %v1601_v15 = vor.u32 %v1767_v54, %v1598_v55  ;;  %v1604_v8 = vld [vmem:[%s2892_s2 + $0x50] sm:$0xf]  ;;  %v326_v27 = vmul.f32 0.5, %v325_v3  ;;  %vm389_vm10 = vweird.f32 %v2235_v35 }
  0xa7   : > { %v317_v63 = vsub.f32 1.5, %v316_v51  ;;  %v412_v11 = vmul.f32 %v2274_v44, %v398_v60  ;;  %v376_v30 = vmul.f32 0.5, %v375_v10  ;;  %v1605_v21 = vor.u32 %v1769_v16, %v1604_v8  ;;  %v1562_v54 = vld [vmem:[%s2892_s2 + $0xc] sm:$0xf0] }
  0xa8   : > { %v2305_v9 = vpop.eup %1838  ;;  %v408_v7 = vmul.f32 %v2274_v44, %v394_v61  ;;  %620 = vmatpush.bf16.msrb.mxu1 %v1601_v15  ;;  %v327_v37 = vsub.f32 1.5, %v326_v27  ;;  %v1589_v40 = vor.u32 %v1764_v59, %v1586_v57  ;;  %v1593_v23 = vor.u32 %v1766_v52, %v1592_v58 }
  0xa9   : > { %v318_v24 = vmul.f32 %v2227_v46, %v317_v63  ;;  %v384_v26 = vmul.f32 %v2305_v9, %v2235_v35  ;;  %v2343_v31 = vpack.c.bf16 %v412_v11, %v411_v5  ;;  %vm390_vm11 = vweird.f32 %v2305_v9  ;;  %654 = vmatpush.bf16.msrb.mxu2 %v1605_v21  ;;  %v1568_v35 = vld [vmem:[%s2892_s2 + $0x8] sm:$0xf] }
  0xaa   : > { %v2345_v32 = vpack.c.bf16 %v408_v7, %v407_v62  ;;  %v377_v19 = vsub.f32 1.5, %v376_v30  ;;  %v328_v43 = vmul.f32 %v2276_v2, %v327_v37  ;;  %v1577_v47 = vor.u32 %v1761_v38, %v1574_v39  ;;  %vm391_vm14 = vmor %vm389_vm10, %vm390_vm11 }
  0xab   : > { %v385_v36 = vmul.f32 %v2305_v9, %v384_v26  ;;  %600 = vmatmul.bf16.vlgmr.msra.gmra.mxu1 %v2343_v31  ;;  %v322_v41 = vsel %vm2338_vm7, %v2227_v46, %v318_v24  ;;  %v1580_v46 = vld [vmem:[%s2892_s2 + $0x20] sm:$0xf]  ;;  %v372_v48 = vsel %vm2358_vm9, %v2169_v50, %v368_v33  ;;  %v362_v55 = vsel %vm2320_vm5, %v2115_v17, %v2238_v25 }
  0xac   : > { %590 = vmatmul.bf16.vlgmr.msra.gmra.mxu0 %v2345_v32  ;;  %v378_v45 = vmul.f32 %v2283_v49, %v377_v19  ;;  %621 = vmatpush.bf16.msrb.mxu1 %v1589_v40  ;;  %v332_v51 = vsel %vm2375_vm12, %v2276_v2, %v328_v43  ;;  %v395_v2 = vmul.f32 %v322_v41, %v2019_v12  ;;  %v1760_v12 = vld [vmem:[%s2892_s2 + $0x10] sm:$0xf0]  ;;  %vm694_vm15 = vcmask 523264  }
  0xad   : > { %v386_v42 = vmul.f32 0.5, %v385_v36  ;;  %v396_v56 = vmul.f32 %v332_v51, %v2022_v13  ;;  %655 = vmatpush.bf16.msrb.mxu2 %v1593_v23  ;;  %v1581_v62 = vor.u32 %v1763_v28, %v1580_v46  ;;  %v400_v17 = vmul.f32 %v372_v48, %v2004_v6 }
  0xae   : > { %v382_v50 = vsel %vm2388_vm13, %v2283_v49, %v378_v45  ;;  %v1565_v25 = vor.u32 %v1758_v53, %v1562_v54  ;;  %v399_v49 = vmul.f32 %v362_v55, %v1989_v0  ;;  %v409_v6 = vmul.f32 %v2274_v44, %v395_v2 }
  0xaf   : > { %v387_v1 = vsub.f32 1.5, %v386_v42  ;;  %v401_v61 = vmul.f32 %v382_v50, %v2025_v14  ;;  %v410_v3 = vmul.f32 %v2274_v44, %v396_v56  ;;  %v1569_v5 = vor.u32 %v1760_v12, %v1568_v35 }
  0xb0   : > { %622 = vmatpush.bf16.msrb.mxu1 %v1577_v47  ;;  %v414_v10 = vmul.f32 %v2274_v44, %v400_v17  ;;  %v413_v7 = vmul.f32 %v2274_v44, %v399_v49  ;;  %vm802_vm0 = vcmask 654336  }
  0xb1   : > { %v388_v60 = vmul.f32 %v2305_v9, %v387_v1  ;;  %v415_v63 = vmul.f32 %v2274_v44, %v401_v61  ;;  %656 = vmatpush.bf16.msrb.mxu2 %v1581_v62  ;;  %v418_v15 = vpack.c.bf16 %v410_v3, %v409_v6 }
  0xb2   : > { %v420_v0 = vpack.c.bf16 %v414_v10, %v413_v7  ;;  %v685_v10 = vld [vmem:[%s2894_s4 + $0x8] sm:$0xff] }
  0xb3   : > { %v392_v13 = vsel %vm391_vm14, %v2305_v9, %v388_v60 }
  0xb4   : > { %v402_v14 = vmul.f32 %v392_v13, %v2034_v18  ;;  %623 = vmatpush.bf16.msrb.mxu1 %v1565_v25 }
  0xb5   : > { %657 = vmatpush.bf16.msrb.mxu2 %v1569_v5 }
  0xb6   : > { %v416_v11 = vmul.f32 %v2274_v44, %v402_v14 }
  0xb8   : > { %v421_v9 = vpack.c.bf16 %v416_v11, %v415_v63  ;;  %v684_v63 = vld [vmem:[%s2894_s4] sm:$0xff] }
  0xba   : > { %610 = vmatmul.bf16.vlgmr.msra.gmra.mxu2 %v421_v9 }
  0xbb   : > { %605 = vmatmul.bf16.gmra.mxu1 %v420_v0 }
  0xbc   : > { %595 = vmatmul.bf16.gmra.mxu0 %v418_v15 }
  0xca   : > { %658 = vmatmul.bf16.vlgmr.msrb.gmra.mxu2 %v2345_v32 }
  0xcb   : > { %624 = vmatmul.bf16.vlgmr.msrb.gmra.mxu1 %v2345_v32 }
  0xda   : > { %663 = vmatmul.bf16.gmra.mxu2 %v418_v15 }
  0xdb   : > { %629 = vmatmul.bf16.gmra.mxu1 %v418_v15 }
  0xea   : > { %668 = vmatmul.bf16.gmra.mxu2 %v2343_v31 }
  0xeb   : > { %634 = vmatmul.bf16.gmra.mxu1 %v2343_v31 }
  0xfa   : > { %673 = vmatmul.bf16.gmra.mxu2 %v420_v0 }
  0xfb   : > { %639 = vmatmul.bf16.gmra.mxu1 %v420_v0  ;;  %v686_v0 = vld [vmem:[%s2894_s4 + $0x10] sm:$0xff] }
 0x10a   : > { %678 = vmatmul.bf16.gmra.mxu2 %v421_v9 }
 0x10b   : > { %644 = vmatmul.bf16.gmra.mxu1 %v421_v9 }
 0x128   : > { %v2447_v18 = vpop.f32.mrf.mxu1 }
 0x129   : > { %v591_v40 = vpop.f32.mrf.mxu0 }
 0x130   : > { %v2449_v44 = vpop.f32.mrf.mxu1 }
 0x131   : > { %v593_v43 = vpop.f32.mrf.mxu0 }
 0x138   : > { %v2451_v8 = vpop.f32.mrf.mxu1 }
 0x139   : > { %v596_v46 = vpop.f32.mrf.mxu0 }
 0x13d   : > { %v2453_v16 = vpop.f32.mrf.mxu2 }
 0x140   : > { %v2455_v22 = vpop.f32.mrf.mxu1 }
 0x141   : > { %v598_v28 = vpop.f32.mrf.mxu0 }
 0x145   : > { %v2457_v24 = vpop.f32.mrf.mxu2 }
 0x148   : > { %v2459_v26 = vpop.f32.mrf.mxu1 }
 0x14d   : > { %v659_v27 = vpop.f32.mrf.mxu2 }
 0x150   : > { %v627_v59 = vpop.f32.mrf.mxu1 }
 0x155   : > { %v661_v57 = vpop.f32.mrf.mxu2 }
 0x156   : > { %v2461_v29 = vpack.c.bf16 %v661_v57, %v659_v27  ;;  %v688_v27 = vld [vmem:[%s2894_s4 + $0x20] sm:$0xff] }
 0x158   : > { %v630_v30 = vpop.f32.mrf.mxu1 }
 0x15d   : > { %v664_v31 = vpop.f32.mrf.mxu2 }
 0x160   : > { %v632_v32 = vpop.f32.mrf.mxu1 }
 0x165   : > { %v666_v58 = vpop.f32.mrf.mxu2 }
 0x166   : > { %v2479_v47 = vpack.c.bf16 %v666_v58, %v664_v31 }
 0x168   : > { %v635_v52 = vpop.f32.mrf.mxu1 }
 0x16d   : > { %v669_v33 = vpop.f32.mrf.mxu2 }
 0x170   : > { %v637_v34 = vpop.f32.mrf.mxu1 }
 0x175   : > { %v671_v36 = vpop.f32.mrf.mxu2 }
 0x176   : > { %v2475_v45 = vpack.c.bf16 %v671_v36, %v669_v33 }
 0x178   : > { %v640_v37 = vpop.f32.mrf.mxu1 }
 0x17d   : > { %v674_v21 = vpop.f32.mrf.mxu2 }
 0x180   : > { %v642_v38 = vpop.f32.mrf.mxu1 }
 0x181   : > { %1113 = vrot.lane.b32.xlu0 %v642_v38, %s1939_s13 }
 0x185   : > { %v676_v39 = vpop.f32.mrf.mxu2 }
 0x186   : > { %v921_v23 = vpack.c.bf16 %v676_v39, %v674_v21 }
 0x188   : > { %v645_v19 = vpop.f32.mrf.mxu1 }
 0x189   : > { %1107 = vrot.lane.b32.xlu0 %v635_v52, %s1939_s13  ;;  %1115 = vrot.lane.b32.xlu2 %v645_v19, %s1939_s13 }
 0x18d   : > { %v679_v20 = vpop.f32.mrf.mxu2 }
 0x190   : > { %v647_v41 = vpop.f32.mrf.mxu1 }
 0x191   : > { %1101 = vrot.lane.b32.xlu0 %v627_v59, %s1939_s13  ;;  %1111 = vrot.lane.b32.xlu2 %v640_v37, %s1939_s13 }
 0x192   : > { %1117 = vrot.lane.b32.xlu1 %v647_v41, %s1939_s13  ;;  %1654 = vmatpush.xpose.msk.msra.mxu3 %vm694_vm15, %v647_v41  ;;  %v1700_v41 = vld [vmem:[%s2894_s4 + $0x50] sm:$0xff] }
 0x195   : > { %v681_v42 = vpop.f32.mrf.mxu2 }
 0x196   : > { %v922_v4 = vpack.c.bf16 %v681_v42, %v679_v20  ;;  %1655 = vmatpush.xpose.msk.msra.mxu3 %vm694_vm15, %v645_v19 }
 0x198   : > { %941 = vmatpush.bf16.msrb.mxu0 %v922_v4 }
 0x199   : > { %1081 = vrot.lane.b32.xlu0 %v593_v43, %s1939_s13  ;;  %1105 = vrot.lane.b32.xlu2 %v632_v32, %s1939_s13 }
 0x19a   : > { %1109 = vrot.lane.b32.xlu1 %v637_v34, %s1939_s13  ;;  %1656 = vmatpush.xpose.msk.msra.mxu3 %vm694_vm15, %v642_v38  ;;  %v691_v38 = vld [vmem:[%s2894_s4 + $0x38] sm:$0xff] }
 0x19c   : > { %942 = vmatpush.bf16.msrb.mxu0 %v921_v23 }
 0x19e   : > { %1657 = vmatpush.xpose.msk.msra.mxu3 %vm694_vm15, %v640_v37 }
 0x1a0   : > { %943 = vmatpush.bf16.msrb.mxu0 %v2475_v45 }
 0x1a1   : > { %1087 = vrot.lane.b32.xlu0 %v2447_v18, %s1939_s13  ;;  %1099 = vrot.lane.b32.xlu2 %v2459_v26, %s1939_s13 }
 0x1a2   : > { %1103 = vrot.lane.b32.xlu1 %v630_v30, %s1939_s13  ;;  %1658 = vmatpush.xpose.msk.msra.mxu3 %vm694_vm15, %v637_v34  ;;  %v690_v34 = vld [vmem:[%s2894_s4 + $0x30] sm:$0xff] }
 0x1a4   : > { %944 = vmatpush.bf16.msrb.mxu0 %v2479_v47 }
 0x1a6   : > { %1659 = vmatpush.xpose.msk.msra.mxu3 %vm694_vm15, %v635_v52 }
 0x1a8   : > { %945 = vmatpush.bf16.msrb.mxu0 %v2461_v29 }
 0x1a9   : > { %1093 = vrot.lane.b32.xlu0 %v2455_v22, %s1939_s13  ;;  %1083 = vrot.lane.b32.xlu2 %v596_v46, %s1939_s13 }
 0x1aa   : > { %1079 = vrot.lane.b32.xlu1 %v591_v40, %s1939_s13  ;;  %1660 = vmatpush.xpose.msk.msra.mxu3 %vm694_vm15, %v632_v32  ;;  %v689_v32 = vld [vmem:[%s2894_s4 + $0x28] sm:$0xff] }
 0x1ae   : > { %1661 = vmatpush.xpose.msk.msra.mxu3 %vm694_vm15, %v630_v30 }
 0x1b1   : > { %1089 = vrot.lane.b32.xlu2 %v2449_v44, %s1939_s13  ;;  %1334 = vrot.lane.b32.xlu0 %v922_v4, %s1939_s13 }
 0x1b2   : > { %1085 = vrot.lane.b32.xlu1 %v598_v28, %s1939_s13  ;;  %1662 = vmatpush.xpose.msk.msra.mxu3 %vm694_vm15, %v627_v59 }
 0x1b6   : > { %1663 = vmatpush.xpose.msk.msra.mxu3 %vm694_vm15, %v2459_v26 }
 0x1b9   : > { %1664 = vmatmul.msk.f32.vlgmr.msra.gmra.mxu3 %vm694_vm15, %v591_v40  ;;  %1095 = vrot.lane.b32.xlu2 %v2453_v16, %s1939_s13 }
 0x1ba   : > { %1091 = vrot.lane.b32.xlu1 %v2451_v8, %s1939_s13 }
 0x1c1   : > { %1665 = vmatmul.msk.f32.gmra.mxu3 %vm694_vm15, %v593_v43  ;;  %1332 = vrot.lane.b32.xlu2 %v921_v23, %s1939_s13 }
 0x1c2   : > { %1097 = vrot.lane.b32.xlu1 %v2457_v24, %s1939_s13 }
 0x1c9   : > { %1666 = vmatmul.msk.f32.gmra.mxu3 %vm694_vm15, %v596_v46 }
 0x1d1   : > { %1667 = vmatmul.msk.f32.gmra.mxu3 %vm694_vm15, %v598_v28  ;;  %v1701_v28 = vld [vmem:[%s2894_s4 + $0x58] sm:$0xff] }
 0x1d9   : > { %1668 = vmatmul.msk.f32.gmra.mxu3 %vm694_vm15, %v2447_v18 }
 0x1e1   : > { %1669 = vmatmul.msk.f32.gmra.mxu3 %vm694_vm15, %v2449_v44 }
 0x1e3   : > { %v1116_v48 = vpop.permute.xlu2 %1115 }
 0x1e9   : > { %1670 = vmatmul.msk.f32.gmra.mxu3 %vm694_vm15, %v2451_v8 }
 0x1eb   : > { %v1112_v1 = vpop.permute.xlu2 %1111 }
 0x1f1   : > { %1671 = vmatmul.msk.f32.gmra.mxu3 %vm694_vm15, %v2455_v22 }
 0x1f3   : > { %v1114_v51 = vpop.permute.xlu0 %1113  ;;  %v1106_v53 = vpop.permute.xlu2 %1105 }
 0x1f9   : > { %1672 = vmatmul.msk.f32.gmra.mxu3 %vm694_vm15, %v2453_v16  ;;  %v687_v16 = vld [vmem:[%s2894_s4 + $0x18] sm:$0xff] }
 0x1fb   : > { %v1108_v54 = vpop.permute.xlu0 %1107  ;;  %v1100_v55 = vpop.permute.xlu2 %1099 }
 0x201   : > { %1673 = vmatmul.msk.f32.gmra.mxu3 %vm694_vm15, %v2457_v24 }
 0x203   : > { %v1102_v50 = vpop.permute.xlu0 %1101  ;;  %v1084_v56 = vpop.permute.xlu2 %1083 }
 0x204   : > { %v1118_v2 = vpop.permute.xlu1 %1117 }
 0x205   : > { %1710 = vmatpush.xpose.msk.msra.mxu2 %vm694_vm15, %v1118_v2  ;;  %v1703_v2 = vld [vmem:[%s2894_s4 + $0x68] sm:$0xff] }
 0x209   : > { %1711 = vmatpush.xpose.msk.msra.mxu2 %vm694_vm15, %v1116_v48 }
 0x20b   : > { %v1082_v60 = vpop.permute.xlu0 %1081  ;;  %v1090_v61 = vpop.permute.xlu2 %1089 }
 0x20c   : > { %v1110_v17 = vpop.permute.xlu1 %1109 }
 0x20d   : > { %1712 = vmatpush.xpose.msk.msra.mxu2 %vm694_vm15, %v1114_v51 }
 0x211   : > { %1713 = vmatpush.xpose.msk.msra.mxu2 %vm694_vm15, %v1112_v1 }
 0x213   : > { %v1088_v62 = vpop.permute.xlu0 %1087  ;;  %v1096_v35 = vpop.permute.xlu2 %1095 }
 0x214   : > { %v1104_v12 = vpop.permute.xlu1 %1103 }
 0x215   : > { %1714 = vmatpush.xpose.msk.msra.mxu2 %vm694_vm15, %v1110_v17 }
 0x219   : > { %1715 = vmatpush.xpose.msk.msra.mxu2 %vm694_vm15, %v1108_v54 }
 0x21b   : > { %v1094_v25 = vpop.permute.xlu0 %1093  ;;  %v1333_v49 = vpop.permute.xlu2 %1332 }
 0x21c   : > { %v1080_v14 = vpop.permute.xlu1 %1079 }
 0x21d   : > { %1716 = vmatpush.xpose.msk.msra.mxu2 %vm694_vm15, %v1106_v53 }
 0x221   : > { %1717 = vmatpush.xpose.msk.msra.mxu2 %vm694_vm15, %v1104_v12  ;;  %v1705_v12 = vld [vmem:[%s2894_s4 + $0x78] sm:$0xff] }
 0x223   : > { %v1335_v13 = vpop.permute.xlu0 %1334 }
 0x224   : > { %1359 = vmatpush.bf16.msrb.mxu3 %v1335_v13  ;;  %v1086_v11 = vpop.permute.xlu1 %1085 }
 0x225   : > { %1718 = vmatpush.xpose.msk.msra.mxu2 %vm694_vm15, %v1102_v50 }
 0x228   : > { %1360 = vmatpush.bf16.msrb.mxu3 %v1333_v49 }
 0x229   : > { %1719 = vmatpush.xpose.msk.msra.mxu2 %vm694_vm15, %v1100_v55 }
 0x22c   : > { %1720 = vmatmul.msk.f32.vlgmr.msra.gmra.mxu2 %vm694_vm15, %v1080_v14  ;;  %v1092_v59 = vpop.permute.xlu1 %1091 }
 0x234   : > { %1721 = vmatmul.msk.f32.gmra.mxu2 %vm694_vm15, %v1082_v60  ;;  %v1098_v39 = vpop.permute.xlu1 %1097 }
 0x23c   : > { %v772_v6 = vpop.f32.mrf.mxu3  ;;  %1722 = vmatmul.msk.f32.gmra.mxu2 %vm694_vm15, %v1084_v56 }
 0x23d   : > { %v773_v3 = vadd.f32 %v772_v6, %v684_v63  ;;  %v1707_v6 = vld [vmem:[%s2894_s4 + $0x88] sm:$0xff] }
 0x23f   : > { %v803_v5 = vsel %vm802_vm0, %v773_v3, -inf }
 0x240   : > { %804 = vmax.xlane.f32.xlu1 %v803_v5 }
 0x244   : > { %v775_v7 = vpop.f32.mrf.mxu3  ;;  %1723 = vmatmul.msk.f32.gmra.mxu2 %vm694_vm15, %v1086_v11 }
 0x245   : > { %v2547_v9 = vadd.f32 %v775_v7, %v685_v10  ;;  %v1702_v7 = vld [vmem:[%s2894_s4 + $0x60] sm:$0xff] }
 0x247   : > { %v806_v15 = vsel %vm802_vm0, %v2547_v9, -inf }
 0x248   : > { %807 = vmax.xlane.f32.xlu0 %v806_v15 }
 0x24c   : > { %v778_v18 = vpop.f32.mrf.mxu3  ;;  %1724 = vmatmul.msk.f32.gmra.mxu2 %vm694_vm15, %v1088_v62  ;;  %v1704_v62 = vld [vmem:[%s2894_s4 + $0x70] sm:$0xff] }
 0x24d   : > { %v2555_v44 = vadd.f32 %v778_v18, %v686_v0 }
 0x24f   : > { %v809_v8 = vsel %vm802_vm0, %v2555_v44, -inf }
 0x250   : > { %810 = vmax.xlane.f32.xlu0 %v809_v8 }
 0x254   : > { %v781_v22 = vpop.f32.mrf.mxu3  ;;  %1725 = vmatmul.msk.f32.gmra.mxu2 %vm694_vm15, %v1090_v61 }
 0x255   : > { %v2563_v24 = vadd.f32 %v781_v22, %v687_v16 }
 0x257   : > { %v812_v26 = vsel %vm802_vm0, %v2563_v24, -inf }
 0x258   : > { %813 = vmax.xlane.f32.xlu2 %v812_v26 }
 0x25c   : > { %v784_v57 = vpop.f32.mrf.mxu3  ;;  %1726 = vmatmul.msk.f32.gmra.mxu2 %vm694_vm15, %v1092_v59  ;;  %v692_v59 = vld [vmem:[%s2894_s4 + $0x40] sm:$0xff] }
 0x25d   : > { %v2571_v30 = vadd.f32 %v784_v57, %v688_v27 }
 0x25f   : > { %v815_v31 = vsel %vm802_vm0, %v2571_v30, -inf }
 0x260   : > { %816 = vmax.xlane.f32.xlu2 %v815_v31  ;;  %v1709_v31 = vld [vmem:[%s2894_s4 + $0x98] sm:$0xff] }
 0x264   : > { %v787_v58 = vpop.f32.mrf.mxu3  ;;  %1727 = vmatmul.msk.f32.gmra.mxu2 %vm694_vm15, %v1094_v25 }
 0x265   : > { %v2579_v52 = vadd.f32 %v787_v58, %v689_v32 }
 0x267   : > { %v818_v33 = vsel %vm802_vm0, %v2579_v52, -inf }
 0x268   : > { %819 = vmax.xlane.f32.xlu1 %v818_v33  ;;  %v693_v33 = vld [vmem:[%s2894_s4 + $0x48] sm:$0xff] }
 0x26c   : > { %v790_v36 = vpop.f32.mrf.mxu3  ;;  %1728 = vmatmul.msk.f32.gmra.mxu2 %vm694_vm15, %v1096_v35 }
 0x26d   : > { %v2587_v37 = vadd.f32 %v790_v36, %v690_v34 }
 0x26f   : > { %v821_v21 = vsel %vm802_vm0, %v2587_v37, -inf }
 0x270   : > { %822 = vmax.xlane.f32.xlu1 %v821_v21 }
 0x274   : > { %v793_v19 = vpop.f32.mrf.mxu3  ;;  %1729 = vmatmul.msk.f32.gmra.mxu2 %vm694_vm15, %v1098_v39 }
 0x275   : > { %v2595_v20 = vadd.f32 %v793_v19, %v691_v38 }
 0x277   : > { %v824_v40 = vsel %vm802_vm0, %v2595_v20, -inf }
 0x278   : > { %825 = vmax.xlane.f32.xlu0 %v824_v40 }
 0x27c   : > { %v796_v26 = vpop.f32.mrf.mxu3 }
 0x27d   : > { %v2670_v57 = vadd.f32 %v796_v26, %v692_v59 }
 0x27f   : > { %v827_v58 = vsel %vm802_vm0, %v2670_v57, -inf }
 0x284   : > { %v799_v34 = vpop.f32.mrf.mxu3 }
 0x285   : > { %v2682_v38 = vadd.f32 %v799_v34, %v693_v33 }
 0x287   : > { %v830_v19 = vsel %vm802_vm0, %v2682_v38, -inf }
 0x2af   : > { %v1176_v42 = vpop.f32.mrf.mxu2 }
 0x2b0   : > { %v2602_v4 = vadd.f32 %v1700_v41, %v1176_v42 }
 0x2b2   : > { %v1206_v43 = vsel %vm802_vm0, %v2602_v4, -inf }
 0x2b3   : > { %v805_v23 = vpop.xlane.xlu1 %804  ;;  %1207 = vmax.xlane.f32.xlu0 %v1206_v43 }
 0x2b4   : > { %v833_v46 = vsub.f32 %v773_v3, %v805_v23 }
 0x2b6   : > { %v843_v48 = vmul.f32 1.442695, %v833_v46 }
 0x2b7   : > { %v1179_v1 = vpop.f32.mrf.mxu2 }
 0x2b8   : > { %1840 = vpow2.f32 %v843_v48  ;;  %v2609_v51 = vadd.f32 %v1701_v28, %v1179_v1 }
 0x2ba   : > { %v1209_v53 = vsel %vm802_vm0, %v2609_v51, -inf }
 0x2bb   : > { %1210 = vmax.xlane.f32.xlu2 %v1209_v53  ;;  %v808_v10 = vpop.xlane.xlu0 %807 }
 0x2bc   : > { %v834_v11 = vsub.f32 %v2547_v9, %v808_v10 }
 0x2be   : > { %v2613_v54 = vpop.eup %1840  ;;  %v845_v15 = vmul.f32 1.442695, %v834_v11 }
 0x2bf   : > { %v1182_v55 = vpop.f32.mrf.mxu2  ;;  %v863_v50 = vsel %vm802_vm0, %v2613_v54, 0.0 }
 0x2c0   : > { %864 = vadd.xlane.f32.xlu1 %v863_v50  ;;  %v1183_v0 = vadd.f32 %v1702_v7, %v1182_v55  ;;  %1842 = vpow2.f32 %v845_v15 }
 0x2c2   : > { %v1212_v18 = vsel %vm802_vm0, %v1183_v0, -inf }
 0x2c3   : > { %v811_v21 = vpop.xlane.xlu0 %810 }
 0x2c6   : > { %v2654_v8 = vpop.eup %1842 }
 0x2c7   : > { %v1185_v56 = vpop.f32.mrf.mxu2  ;;  %v866_v16 = vsel %vm802_vm0, %v2654_v8, 0.0 }
 0x2c8   : > { %v2620_v60 = vadd.f32 %v1703_v2, %v1185_v56 }
 0x2ca   : > { %v1215_v61 = vsel %vm802_vm0, %v2620_v60, -inf }
 0x2cb   : > { %1216 = vmax.xlane.f32.xlu1 %v1215_v61  ;;  %v814_v40 = vpop.xlane.xlu2 %813 }
 0x2cf   : > { %v1188_v17 = vpop.f32.mrf.mxu2 }
 0x2d0   : > { %v2627_v25 = vadd.f32 %v1704_v62, %v1188_v17 }
 0x2d2   : > { %v1218_v35 = vsel %vm802_vm0, %v2627_v25, -inf }
 0x2d3   : > { %1219 = vmax.xlane.f32.xlu1 %v1218_v35  ;;  %1330 = vrot.lane.b32.xlu2 %v2475_v45, %s1939_s13  ;;  %v2690_v42 = vpop.xlane.xlu2 %816 }
 0x2d4   : > { %v837_v33 = vsub.f32 %v2571_v30, %v2690_v42 }
 0x2d7   : > { %v1191_v13 = vpop.f32.mrf.mxu2 }
 0x2d8   : > { %v2636_v49 = vadd.f32 %v1705_v12, %v1191_v13 }
 0x2da   : > { %v1221_v14 = vsel %vm802_vm0, %v2636_v49, -inf }
 0x2db   : > { %1222 = vmax.xlane.f32.xlu0 %v1221_v14  ;;  %v820_v62 = vpop.xlane.xlu1 %819 }
 0x2df   : > { %v1194_v63 = vpop.f32.mrf.mxu2 }
 0x2e3   : > { %v2709_v12 = vpop.xlane.xlu1 %822 }
 0x2e7   : > { %v1197_v3 = vpop.f32.mrf.mxu2 }
 0x2e8   : > { %v2643_v5 = vadd.f32 %v1707_v6, %v1197_v3 }
 0x2ea   : > { %v1227_v45 = vsel %vm802_vm0, %v2643_v5, -inf }
 0x2eb   : > { %1228 = vmax.xlane.f32.xlu1 %v1227_v45  ;;  %v2688_v41 = vpop.xlane.xlu0 %825  ;;  %v835_v45 = vsub.f32 %v2555_v44, %v811_v21 }
 0x2ed   : > { %v847_v7 = vmul.f32 1.442695, %v835_v45 }
 0x2ef   : > { %1326 = vrot.lane.b32.xlu0 %v2461_v29, %s1939_s13  ;;  %v1706_v29 = vld [vmem:[%s2894_s4 + $0x80] sm:$0xff]  ;;  %v2663_v22 = vpop.f32.mrf.mxu2 }
 0x2f0   : > { %v2661_v9 = vadd.f32 %v1706_v29, %v1194_v63 }
 0x2f2   : > { %v1224_v27 = vsel %vm802_vm0, %v2661_v9, -inf }
 0x2f7   : > { %v1203_v32 = vpop.f32.mrf.mxu2 }
 0x2f8   : > { %v2680_v36 = vadd.f32 %v1709_v31, %v1203_v32 }
 0x2fa   : > { %v1233_v39 = vsel %vm802_vm0, %v2680_v36, -inf }
 0x2fc   : > { %1213 = vmax.xlane.f32.xlu2 %v1212_v18 }
 0x304   : > { %867 = vadd.xlane.f32.xlu2 %v866_v16 }
 0x30c   : > { %1225 = vmax.xlane.f32.xlu2 %v1224_v27 }
 0x314   : > { %828 = vmax.xlane.f32.xlu2 %v827_v58 }
 0x319   : > { %1234 = vmax.xlane.f32.xlu0 %v1233_v39  ;;  %v840_v39 = vsub.f32 %v2595_v20, %v2688_v41 }
 0x31c   : > { %831 = vmax.xlane.f32.xlu2 %v830_v19 }
 0x326   : > { %v1208_v43 = vpop.xlane.xlu0 %1207 }
 0x327   : > { %v1236_v23 = vsub.f32 %v2602_v4, %v1208_v43 }
 0x329   : > { %v1246_v46 = vmul.f32 1.442695, %v1236_v23 }
 0x32b   : > { %1844 = vpow2.f32 %v1246_v46 }
 0x32e   : > { %v1211_v28 = vpop.xlane.xlu2 %1210 }
 0x32f   : > { %v1237_v48 = vsub.f32 %v2609_v51, %v1211_v28 }
 0x331   : > { %v2694_v1 = vpop.eup %1844  ;;  %v1248_v53 = vmul.f32 1.442695, %v1237_v48 }
 0x332   : > { %v1266_v55 = vsel %vm802_vm0, %v2694_v1, 0.0 }
 0x333   : > { %1846 = vpow2.f32 %v1248_v53  ;;  %1267 = vadd.xlane.f32.xlu1 %v1266_v55  ;;  %v865_v13 = vpop.xlane.xlu1 %864 }
 0x336   : > { %v1331_v50 = vpop.permute.xlu2 %1330 }
 0x337   : > { %1361 = vmatpush.bf16.msrb.mxu3 %v1331_v50  ;;  %v839_v50 = vsub.f32 %v2587_v37, %v2709_v12 }
 0x339   : > { %v2698_v2 = vpop.eup %1846 }
 0x33a   : > { %v1269_v4 = vsel %vm802_vm0, %v2698_v2, 0.0 }
 0x33b   : > { %1270 = vadd.xlane.f32.xlu1 %v1269_v4 }
 0x33e   : > { %v1217_v14 = vpop.xlane.xlu1 %1216 }
 0x346   : > { %v1220_v15 = vpop.xlane.xlu1 %1219 }
 0x347   : > { %v1240_v44 = vsub.f32 %v2627_v25, %v1220_v15 }
 0x349   : > { %v1254_v31 = vmul.f32 1.442695, %v1240_v44 }
 0x34e   : > { %v1223_v56 = vpop.xlane.xlu0 %1222 }
 0x34f   : > { %v1241_v61 = vsub.f32 %v2636_v49, %v1223_v56  ;;  %v1239_v49 = vsub.f32 %v2620_v60, %v1217_v14  ;;  %v836_v60 = vsub.f32 %v2563_v24, %v814_v40  ;;  %v857_v40 = vmul.f32 1.442695, %v840_v39 }
 0x351   : > { %v1256_v51 = vmul.f32 1.442695, %v1241_v61  ;;  %v1252_v10 = vmul.f32 1.442695, %v1239_v49  ;;  %v849_v59 = vmul.f32 1.442695, %v836_v60 }
 0x353   : > { %1848 = vpow2.f32 %v1256_v51  ;;  %v855_v51 = vmul.f32 1.442695, %v839_v50 }
 0x354   : > { %1328 = vrot.lane.b32.xlu1 %v2479_v47, %s1939_s13  ;;  %v1708_v47 = vld [vmem:[%s2894_s4 + $0x90] sm:$0xff] }
 0x355   : > { %v2717_v18 = vadd.f32 %v1708_v47, %v2663_v22 }
 0x357   : > { %v1230_v26 = vsel %vm802_vm0, %v2717_v18, -inf }
 0x359   : > { %v2705_v17 = vpop.eup %1848 }
 0x35a   : > { %v1281_v35 = vsel %vm802_vm0, %v2705_v17, 0.0 }
 0x35b   : > { %1282 = vadd.xlane.f32.xlu0 %v1281_v35 }
 0x35e   : > { %v1229_v42 = vpop.xlane.xlu1 %1228 }
 0x35f   : > { %v1243_v46 = vsub.f32 %v2643_v5, %v1229_v42 }
 0x361   : > { %v1327_v28 = vpop.permute.xlu0 %1326  ;;  %v1260_v4 = vmul.f32 1.442695, %v1243_v46 }
 0x36f   : > { %v1214_v63 = vpop.xlane.xlu2 %1213 }
 0x370   : > { %v1238_v6 = vsub.f32 %v1183_v0, %v1214_v63 }
 0x372   : > { %v1250_v3 = vmul.f32 1.442695, %v1238_v6 }
 0x374   : > { %1850 = vpow2.f32 %v1250_v3 }
 0x375   : > { %1852 = vrcp.f32 %v865_v13 }
 0x377   : > { %v868_v11 = vpop.xlane.xlu2 %867 }
 0x378   : > { %1854 = vrcp.f32 %v868_v11 }
 0x379   : > { %1856 = vpow2.f32 %v1252_v10 }
 0x37a   : > { %v2719_v0 = vpop.eup %1850  ;;  %1858 = vpow2.f32 %v847_v7 }
 0x37b   : > { %v1272_v16 = vsel %vm802_vm0, %v2719_v0, 0.0  ;;  %v1853_v29 = vpop.eup %1852  ;;  %1860 = vpow2.f32 %v849_v59  ;;  %v1785_v59 = vld [vmem:[%s2893_s3 + $0x18] sm:$0xff] }
 0x37c   : > { %1273 = vadd.xlane.f32.xlu2 %v1272_v16  ;;  %v903_v22 = vmul.f32 %v1853_v29, %v2613_v54  ;;  %1862 = vpow2.f32 %v1254_v31  ;;  %1028 = vmatpush.bf16.msra.mxu1 %v1785_v59 }
 0x37e   : > { %v1855_v27 = vpop.eup %1854  ;;  %1231 = vmax.xlane.f32.xlu1 %v1230_v26 }
 0x37f   : > { %v904_v24 = vmul.f32 %v1855_v27, %v2654_v8  ;;  %v1226_v32 = vpop.xlane.xlu2 %1225  ;;  %v2729_v58 = vpop.eup %1856  ;;  %v838_v8 = vsub.f32 %v2579_v52, %v820_v62 }
 0x380   : > { %v1242_v25 = vsub.f32 %v2661_v9, %v1226_v32  ;;  %v2734_v21 = vpop.eup %1858  ;;  %v1275_v54 = vsel %vm802_vm0, %v2729_v58, 0.0  ;;  %v851_v9 = vmul.f32 1.442695, %v837_v33 }
 0x381   : > { %v913_v34 = vpack.c.bf16 %v904_v24, %v903_v22  ;;  %v869_v30 = vsel %vm802_vm0, %v2734_v21, 0.0  ;;  %v2744_v20 = vpop.eup %1860  ;;  %v853_v41 = vmul.f32 1.442695, %v838_v8  ;;  %v1784_v22 = vld [vmem:[%s2893_s3 + $0x10] sm:$0xff] }
 0x382   : > { %v1258_v19 = vmul.f32 1.442695, %v1242_v25  ;;  %v2746_v23 = vpop.eup %1862  ;;  %v872_v53 = vsel %vm802_vm0, %v2744_v20, 0.0  ;;  %1029 = vmatpush.bf16.msra.mxu1 %v1784_v22  ;;  %v1789_v22 = vld [vmem:[%s2893_s3 + $0x38] sm:$0xff] }
 0x383   : > { %1674 = vmatmul.msk.bf16.vlgmr.msrb.gmra.mxu0 %vm802_vm0, %v913_v34  ;;  %v1278_v5 = vsel %vm802_vm0, %v2746_v23, 0.0 }
 0x384   : > { %1864 = vpow2.f32 %v1258_v19  ;;  %1276 = vadd.xlane.f32.xlu2 %v1275_v54  ;;  %1446 = vmatpush.bf16.msra.mxu0 %v1789_v22 }
 0x385   : > { %1866 = vpow2.f32 %v851_v9 }
 0x386   : > { %870 = vadd.xlane.f32.xlu1 %v869_v30  ;;  %1868 = vpow2.f32 %v857_v40 }
 0x387   : > { %v829_v43 = vpop.xlane.xlu2 %828  ;;  %1870 = vpow2.f32 %v853_v41 }
 0x388   : > { %v841_v48 = vsub.f32 %v2670_v57, %v829_v43  ;;  %1872 = vpow2.f32 %v1260_v4 }
 0x38a   : > { %v2749_v52 = vpop.eup %1864  ;;  %v859_v56 = vmul.f32 1.442695, %v841_v48 }
 0x38b   : > { %v1284_v55 = vsel %vm802_vm0, %v2749_v52, 0.0  ;;  %v2760_v61 = vpop.eup %1866 }
 0x38c   : > { %873 = vadd.xlane.f32.xlu2 %v872_v53  ;;  %1285 = vadd.xlane.f32.xlu0 %v1284_v55  ;;  %v2762_v57 = vpop.eup %1868  ;;  %v1235_v62 = vpop.xlane.xlu0 %1234  ;;  %1874 = vpow2.f32 %v859_v56  ;;  %v875_v37 = vsel %vm802_vm0, %v2760_v61, 0.0 }
 0x38d   : > { %v2764_v35 = vpop.eup %1870  ;;  %v884_v12 = vsel %vm802_vm0, %v2762_v57, 0.0  ;;  %1876 = vpow2.f32 %v855_v51  ;;  %v1245_v13 = vsub.f32 %v2680_v36, %v1235_v62 }
 0x38e   : > { %1279 = vadd.xlane.f32.xlu1 %v1278_v5  ;;  %v878_v14 = vsel %vm802_vm0, %v2764_v35, 0.0  ;;  %v2773_v63 = vpop.eup %1872 }
 0x38f   : > { %v1264_v49 = vmul.f32 1.442695, %v1245_v13  ;;  %v1287_v45 = vsel %vm802_vm0, %v2773_v63, 0.0  ;;  %v832_v31 = vpop.xlane.xlu2 %831 }
 0x390   : > { %v842_v33 = vsub.f32 %v2682_v38, %v832_v31 }
 0x391   : > { %1878 = vpow2.f32 %v1264_v49 }
 0x392   : > { %v2775_v6 = vpop.eup %1874  ;;  %v861_v19 = vmul.f32 1.442695, %v842_v33 }
 0x393   : > { %v2777_v3 = vpop.eup %1876  ;;  %v887_v47 = vsel %vm802_vm0, %v2775_v6, 0.0 }
 0x394   : > { %876 = vadd.xlane.f32.xlu2 %v875_v37  ;;  %885 = vadd.xlane.f32.xlu0 %v884_v12  ;;  %v881_v36 = vsel %vm802_vm0, %v2777_v3, 0.0 }
 0x396   : > { %879 = vadd.xlane.f32.xlu1 %v878_v14 }
 0x397   : > { %v2785_v10 = vpop.eup %1878 }
 0x398   : > { %v1293_v11 = vsel %vm802_vm0, %v2785_v10, 0.0 }
 0x39c   : > { %1288 = vadd.xlane.f32.xlu2 %v1287_v45  ;;  %888 = vadd.xlane.f32.xlu0 %v887_v47 }
 0x39e   : > { %882 = vadd.xlane.f32.xlu1 %v881_v36 }
 0x3a6   : > { %1294 = vadd.xlane.f32.xlu1 %v1293_v11  ;;  %v1268_v7 = vpop.xlane.xlu1 %1267 }
 0x3ae   : > { %v1271_v15 = vpop.xlane.xlu1 %1270 }
 0x3af   : > { %1880 = vrcp.f32 %v1271_v15 }
 0x3b0   : > { %1882 = vrcp.f32 %v1268_v7 }
 0x3b5   : > { %v1881_v60 = vpop.eup %1880 }
 0x3b6   : > { %v1883_v16 = vpop.eup %1882  ;;  %v1307_v29 = vmul.f32 %v1881_v60, %v2698_v2  ;;  %v1783_v2 = vld [vmem:[%s2893_s3 + $0x8] sm:$0xff] }
 0x3b7   : > { %v1306_v26 = vmul.f32 %v1883_v16, %v2694_v1  ;;  %1030 = vmatpush.bf16.msra.mxu1 %v1783_v2  ;;  %v1782_v1 = vld [vmem:[%s2893_s3] sm:$0xff] }
 0x3b8   : > { %v1786_v2 = vld [vmem:[%s2893_s3 + $0x20] sm:$0xff] }
 0x3b9   : > { %v1316_v27 = vpack.c.bf16 %v1307_v29, %v1306_v26 }
 0x3bb   : > { %1031 = vmatpush.bf16.msra.mxu1 %v1782_v1 }
 0x3c6   : > { %v1329_v44 = vpop.permute.xlu1 %1328 }
 0x3c7   : > { %1362 = vmatpush.bf16.msrb.mxu3 %v1329_v44 }
 0x3cb   : > { %1363 = vmatpush.bf16.msrb.mxu3 %v1327_v28 }
 0x3ce   : > { %1730 = vmatmul.msk.bf16.vlgmr.msrb.gmra.mxu3 %vm802_vm0, %v1316_v27  ;;  %v1283_v48 = vpop.xlane.xlu0 %1282 }
 0x3ef   : > { %v1274_v24 = vpop.xlane.xlu2 %1273 }
 0x3f0   : > { %1884 = vrcp.f32 %v1274_v24 }
 0x3f1   : > { %v1232_v32 = vpop.xlane.xlu1 %1231 }
 0x3f2   : > { %v1244_v25 = vsub.f32 %v2717_v18, %v1232_v32 }
 0x3f4   : > { %v1262_v34 = vmul.f32 1.442695, %v1244_v25 }
 0x3f6   : > { %1886 = vpow2.f32 %v1262_v34  ;;  %v1885_v8 = vpop.eup %1884 }
 0x3f7   : > { %v1277_v39 = vpop.xlane.xlu2 %1276  ;;  %v1308_v38 = vmul.f32 %v1885_v8, %v2719_v0 }
 0x3f8   : > { %1888 = vrcp.f32 %v1277_v39 }
 0x3f9   : > { %v871_v54 = vpop.xlane.xlu1 %870  ;;  %1890 = vpow2.f32 %v861_v19 }
 0x3fa   : > { %1892 = vrcp.f32 %v871_v54 }
 0x3fc   : > { %v2806_v9 = vpop.eup %1886 }
 0x3fd   : > { %v1290_v30 = vsel %vm802_vm0, %v2806_v9, 0.0 }
 0x3fe   : > { %v1889_v40 = vpop.eup %1888  ;;  %1291 = vadd.xlane.f32.xlu2 %v1290_v30 }
 0x3ff   : > { %v874_v18 = vpop.xlane.xlu2 %873  ;;  %v1309_v42 = vmul.f32 %v1889_v40, %v2729_v58  ;;  %v2812_v28 = vpop.eup %1890 }
 0x400   : > { %1894 = vrcp.f32 %v874_v18  ;;  %v947_v43 = vpop.f32.mrf.mxu0  ;;  %v1893_v53 = vpop.eup %1892  ;;  %v890_v55 = vsel %vm802_vm0, %v2812_v28, 0.0 }
 0x401   : > { %v1280_v41 = vpop.xlane.xlu1 %1279  ;;  %v1317_v46 = vpack.c.bf16 %v1309_v42, %v1308_v38  ;;  %v905_v58 = vmul.f32 %v1893_v53, %v2734_v21  ;;  %v1286_v49 = vpop.xlane.xlu0 %1285 }
 0x402   : > { %1896 = vrcp.f32 %v1280_v41 }
 0x403   : > { %1731 = vmatmul.msk.bf16.gmra.mxu3 %vm802_vm0, %v1317_v46  ;;  %1898 = vrcp.f32 %v1283_v48 }
 0x406   : > { %v1895_v50 = vpop.eup %1894  ;;  %891 = vadd.xlane.f32.xlu2 %v890_v55 }
 0x407   : > { %v877_v0 = vpop.xlane.xlu2 %876  ;;  %v906_v4 = vmul.f32 %v1895_v50, %v2744_v20 }
 0x408   : > { %v949_v5 = vpop.f32.mrf.mxu0  ;;  %v1897_v37 = vpop.eup %1896 }
 0x409   : > { %v972_v56 = vpack.c.bf16 %v949_v5, %v947_v43  ;;  %v880_v51 = vpop.xlane.xlu1 %879  ;;  %v914_v62 = vpack.c.bf16 %v906_v4, %v905_v58  ;;  %v1899_v12 = vpop.eup %1898  ;;  %v1310_v13 = vmul.f32 %v1897_v37, %v2746_v23 }
 0x40a   : > { %1900 = vrcp.f32 %v880_v51  ;;  %v1311_v14 = vmul.f32 %v1899_v12, %v2705_v17  ;;  %v886_v23 = vpop.xlane.xlu0 %885 }
 0x40b   : > { %1675 = vmatmul.msk.bf16.gmra.mxu0 %vm802_vm0, %v914_v62  ;;  %1695 = vmatmul.msk.bf16.vlgmr.msra.gmra.mxu1 %vm694_vm15, %v972_v56  ;;  %1902 = vrcp.f32 %v877_v0 }
 0x40c   : > { %v1318_v45 = vpack.c.bf16 %v1311_v14, %v1310_v13 }
 0x40f   : > { %v1289_v21 = vpop.xlane.xlu2 %1288 }
 0x410   : > { %v1901_v20 = vpop.eup %1900  ;;  %1904 = vrcp.f32 %v1289_v21 }
 0x411   : > { %v1903_v47 = vpop.eup %1902  ;;  %v908_v36 = vmul.f32 %v1901_v20, %v2764_v35  ;;  %1906 = vrcp.f32 %v1286_v49  ;;  %v883_v7 = vpop.xlane.xlu1 %882  ;;  %v1920_v20 = vld [vmem:[%s1986_s23] sm:$0xff] }
 0x412   : > { %v907_v11 = vmul.f32 %v1903_v47, %v2760_v61  ;;  %1908 = vrcp.f32 %v883_v7  ;;  %v889_v31 = vpop.xlane.xlu0 %888 }
 0x413   : > { %1732 = vmatmul.msk.bf16.gmra.mxu3 %vm802_vm0, %v1318_v45  ;;  %1910 = vrcp.f32 %v886_v23 }
 0x414   : > { %v915_v15 = vpack.c.bf16 %v908_v36, %v907_v11 }
 0x416   : > { %v1905_v60 = vpop.eup %1904 }
 0x417   : > { %v1907_v17 = vpop.eup %1906  ;;  %v1313_v44 = vmul.f32 %v1905_v60, %v2773_v63 }
 0x418   : > { %v1312_v16 = vmul.f32 %v1907_v17, %v2749_v52  ;;  %v1909_v26 = vpop.eup %1908  ;;  %v1788_v52 = vld [vmem:[%s2893_s3 + $0x30] sm:$0xff] }
 0x419   : > { %v1911_v35 = vpop.eup %1910  ;;  %v909_v61 = vmul.f32 %v1909_v26, %v2777_v3  ;;  %1447 = vmatpush.bf16.msra.mxu0 %v1788_v52  ;;  %v1295_v63 = vpop.xlane.xlu1 %1294  ;;  %v1787_v3 = vld [vmem:[%s2893_s3 + $0x28] sm:$0xff] }
 0x41a   : > { %v1319_v29 = vpack.c.bf16 %v1313_v44, %v1312_v16  ;;  %v910_v27 = vmul.f32 %v1911_v35, %v2762_v57  ;;  %1912 = vrcp.f32 %v1295_v63  ;;  %v1922_v16 = vld [vmem:[%s1986_s23 + $0x10] sm:$0xff]  ;;  %v1924_v63 = vld [vmem:[%s1986_s23 + $0x20] sm:$0xff] }
 0x41b   : > { %1676 = vmatmul.msk.bf16.gmra.mxu0 %vm802_vm0, %v915_v15  ;;  %v1921_v15 = vld [vmem:[%s1986_s23 + $0x8] sm:$0xff] }
 0x41c   : > { %v916_v59 = vpack.c.bf16 %v910_v27, %v909_v61  ;;  %v1923_v27 = vld [vmem:[%s1986_s23 + $0x18] sm:$0xff] }
 0x41d   : > { %1448 = vmatpush.bf16.msra.mxu0 %v1787_v3 }
 0x420   : > { %v1913_v1 = vpop.eup %1912 }
 0x421   : > { %1449 = vmatpush.bf16.msra.mxu0 %v1786_v2  ;;  %v1315_v33 = vmul.f32 %v1913_v1, %v2785_v10  ;;  %v1925_v1 = vld [vmem:[%s1986_s23 + $0x28] sm:$0xff] }
 0x423   : > { %1733 = vmatmul.msk.bf16.gmra.mxu3 %vm802_vm0, %v1319_v29 }
 0x42b   : > { %1677 = vmatmul.msk.bf16.gmra.mxu0 %vm802_vm0, %v916_v59 }
 0x451   : > { %v1365_v39 = vpop.f32.mrf.mxu3 }
 0x459   : > { %v1367_v18 = vpop.f32.mrf.mxu3 }
 0x45a   : > { %v1390_v10 = vpack.c.bf16 %v1367_v18, %v1365_v39 }
 0x471   : > { %v1292_v57 = vpop.xlane.xlu2 %1291 }
 0x472   : > { %1914 = vrcp.f32 %v1292_v57 }
 0x473   : > { %1916 = vrcp.f32 %v889_v31 }
 0x478   : > { %v1915_v24 = vpop.eup %1914 }
 0x479   : > { %v892_v32 = vpop.xlane.xlu2 %891  ;;  %v1314_v25 = vmul.f32 %v1915_v24, %v2806_v9  ;;  %v1917_v19 = vpop.eup %1916 }
 0x47a   : > { %1918 = vrcp.f32 %v892_v32  ;;  %v911_v8 = vmul.f32 %v1917_v19, %v2775_v6 }
 0x47b   : > { %v1320_v34 = vpack.c.bf16 %v1315_v33, %v1314_v25 }
 0x47d   : > { %1734 = vmatmul.msk.bf16.gmra.mxu3 %vm802_vm0, %v1320_v34  ;;  %v1926_v34 = vld [vmem:[%s1986_s23 + $0x30] sm:$0xff] }
 0x480   : > { %v1919_v54 = vpop.eup %1918 }
 0x481   : > { %v912_v30 = vmul.f32 %v1919_v54, %v2812_v28 }
 0x483   : > { %v917_v40 = vpack.c.bf16 %v912_v30, %v911_v8  ;;  %v1927_v30 = vld [vmem:[%s1986_s23 + $0x38] sm:$0xff] }
 0x485   : > { %1678 = vmatmul.msk.bf16.gmra.mxu0 %vm802_vm0, %v917_v40 }
 0x486   : > { %v1370_v42 = vpop.f32.mrf.mxu3 }
 0x488   : > { %v952_v38 = vpop.f32.mrf.mxu0  ;;  %v1033_v37 = vpop.f32.mrf.mxu1 }
 0x489   : > { %v1058_v47 = vadd.f32 %v1920_v20, %v1033_v37 }
 0x48e   : > { %v1372_v41 = vpop.f32.mrf.mxu3 }
 0x48f   : > { %v1391_v55 = vpack.c.bf16 %v1372_v41, %v1370_v42 }
 0x490   : > { %v954_v9 = vpop.f32.mrf.mxu0  ;;  %v1035_v45 = vpop.f32.mrf.mxu1 }
 0x491   : > { %v973_v43 = vpack.c.bf16 %v954_v9, %v952_v38  ;;  %v1059_v60 = vadd.f32 %v1921_v15, %v1035_v45 }
 0x493   : > { %1696 = vmatmul.msk.bf16.gmra.mxu1 %vm694_vm15, %v973_v43  ;;  %v1928_v43 = vld [vmem:[%s1986_s23 + $0x40] sm:$0xff] }
 0x495   : > { %1751 = vmatmul.msk.bf16.vlgmr.msra.gmra.mxu0 %vm694_vm15, %v1390_v10 }
 0x496   : > { %v1375_v6 = vpop.f32.mrf.mxu3 }
 0x498   : > { %v957_v46 = vpop.f32.mrf.mxu0 }
 0x49e   : > { %v1377_v50 = vpop.f32.mrf.mxu3 }
 0x49f   : > { %v1392_v4 = vpack.c.bf16 %v1377_v50, %v1375_v6 }
 0x4a0   : > { %v959_v48 = vpop.f32.mrf.mxu0 }
 0x4a1   : > { %v974_v53 = vpack.c.bf16 %v959_v48, %v957_v46  ;;  %v1929_v48 = vld [vmem:[%s1986_s23 + $0x48] sm:$0xff] }
 0x4a3   : > { %1697 = vmatmul.msk.bf16.gmra.mxu1 %vm694_vm15, %v974_v53 }
 0x4a5   : > { %1752 = vmatmul.msk.bf16.gmra.mxu0 %vm694_vm15, %v1391_v55 }
 0x4a6   : > { %v1380_v5 = vpop.f32.mrf.mxu3 }
 0x4a8   : > { %v962_v28 = vpop.f32.mrf.mxu0 }
 0x4ae   : > { %v1382_v56 = vpop.f32.mrf.mxu3 }
 0x4af   : > { %v1393_v51 = vpack.c.bf16 %v1382_v56, %v1380_v5 }
 0x4b0   : > { %v964_v0 = vpop.f32.mrf.mxu0 }
 0x4b1   : > { %v975_v58 = vpack.c.bf16 %v964_v0, %v962_v28 }
 0x4b3   : > { %1698 = vmatmul.msk.bf16.gmra.mxu1 %vm694_vm15, %v975_v58 }
 0x4b5   : > { %1753 = vmatmul.msk.bf16.gmra.mxu0 %vm694_vm15, %v1392_v4 }
 0x4c5   : > { %1754 = vmatmul.msk.bf16.gmra.mxu0 %vm694_vm15, %v1393_v51 }
 0x500   : > { %v1385_v62 = vpop.f32.mrf.mxu3 }
 0x502   : > { %v967_v12 = vpop.f32.mrf.mxu0 }
 0x508   : > { %v1387_v13 = vpop.f32.mrf.mxu3 }
 0x509   : > { %v1394_v14 = vpack.c.bf16 %v1387_v13, %v1385_v62 }
 0x50a   : > { %v969_v49 = vpop.f32.mrf.mxu0 }
 0x50b   : > { %v976_v21 = vpack.c.bf16 %v969_v49, %v967_v12  ;;  %1755 = vmatmul.msk.bf16.gmra.mxu0 %vm694_vm15, %v1394_v14 }
 0x50d   : > { %1699 = vmatmul.msk.bf16.gmra.mxu1 %vm694_vm15, %v976_v21 }
 0x510   : > { %v1038_v7 = vpop.f32.mrf.mxu1 }
 0x511   : > { %v1060_v29 = vadd.f32 %v1922_v16, %v1038_v7 }
 0x512   : > { %v1451_v36 = vpop.f32.mrf.mxu0 }
 0x513   : > { %v1476_v11 = vadd.f32 %v1451_v36, %v1058_v47 }
 0x515   : > { %1486 = vst [vmem:[%s2866_s10] sm:$0xff] %v1476_v11 }
 0x518   : > { %v1040_v44 = vpop.f32.mrf.mxu1 }
 0x519   : > { %v1061_v59 = vadd.f32 %v1923_v27, %v1040_v44 }
 0x51a   : > { %v1453_v23 = vpop.f32.mrf.mxu0 }
 0x51b   : > { %v1477_v17 = vadd.f32 %v1453_v23, %v1059_v60 }
 0x51d   : > { %1487 = vst [vmem:[%s2866_s10 + $0x8] sm:$0xff] %v1477_v17 }
 0x520   : > { %v1043_v61 = vpop.f32.mrf.mxu1 }
 0x521   : > { %v1062_v3 = vadd.f32 %v1924_v63, %v1043_v61 }
 0x522   : > { %v1456_v26 = vpop.f32.mrf.mxu0 }
 0x523   : > { %v1478_v35 = vadd.f32 %v1456_v26, %v1060_v29 }
 0x525   : > { %1488 = vst [vmem:[%s2866_s10 + $0x10] sm:$0xff] %v1478_v35 }
 0x528   : > { %v1045_v57 = vpop.f32.mrf.mxu1 }
 0x529   : > { %v1063_v24 = vadd.f32 %v1925_v1, %v1045_v57 }
 0x52a   : > { %v1458_v22 = vpop.f32.mrf.mxu0 }
 0x52b   : > { %v1479_v52 = vadd.f32 %v1458_v22, %v1061_v59 }
 0x52d   : > { %1489 = vst [vmem:[%s2866_s10 + $0x18] sm:$0xff] %v1479_v52 }
 0x530   : > { %v1048_v33 = vpop.f32.mrf.mxu1 }
 0x531   : > { %v1064_v39 = vadd.f32 %v1926_v34, %v1048_v33 }
 0x532   : > { %v1461_v2 = vpop.f32.mrf.mxu0 }
 0x533   : > { %v1480_v31 = vadd.f32 %v1461_v2, %v1062_v3 }
 0x535   : > { %1490 = vst [vmem:[%s2866_s10 + $0x20] sm:$0xff] %v1480_v31 }
 0x538   : > { %v1050_v8 = vpop.f32.mrf.mxu1 }
 0x539   : > { %v1065_v40 = vadd.f32 %v1927_v30, %v1050_v8 }
 0x53a   : > { %v1463_v32 = vpop.f32.mrf.mxu0 }
 0x53b   : > { %v1481_v25 = vadd.f32 %v1463_v32, %v1063_v24 }
 0x53d   : > { %1491 = vst [vmem:[%s2866_s10 + $0x28] sm:$0xff] %v1481_v25 }
 0x542   : > { %v1466_v19 = vpop.f32.mrf.mxu0 }
 0x543   : > { %v1482_v54 = vadd.f32 %v1466_v19, %v1064_v39 }
 0x545   : > { %1492 = vst [vmem:[%s2866_s10 + $0x30] sm:$0xff] %v1482_v54 }
 0x54a   : > { %v1468_v18 = vpop.f32.mrf.mxu0 }
 0x54b   : > { %v1483_v38 = vadd.f32 %v1468_v18, %v1065_v40 }
 0x54d   : > { %1493 = vst [vmem:[%s2866_s10 + $0x38] sm:$0xff] %v1483_v38 }
 0x588   : > { %v1471_v42 = vpop.f32.mrf.mxu0 }
 0x58a   : > { %v1053_v9 = vpop.f32.mrf.mxu1 }
 0x58b   : > { %v1066_v10 = vadd.f32 %v1928_v43, %v1053_v9 }
 0x58d   : > { %v1484_v41 = vadd.f32 %v1471_v42, %v1066_v10 }
 0x58f   : > { %1494 = vst [vmem:[%s2866_s10 + $0x40] sm:$0xff] %v1484_v41 }
 0x590   : > { %v1473_v6 = vpop.f32.mrf.mxu0 }
 0x592   : > { %v1055_v46 = vpop.f32.mrf.mxu1 }
 0x593   : > { %v1067_v53 = vadd.f32 %v1929_v48, %v1055_v46 }
 0x595   : > { %v1485_v55 = vadd.f32 %v1473_v6, %v1067_v53 }
 0x597   : > { %1495 = vst [vmem:[%s2866_s10 + $0x48] sm:$0xff] %v1485_v55 }
 0x598 PF: > { %s15_s18 = sadd.s32 1, %s1936_s18  }
 0x599   : > { %p12_p4 = scmp.ge.s32.totalorder %s15_s18, 4  }
 0x59b   :  { %14 = sbr.rel (!%p12_p4) target bundleno = 1 (0x1), region = 71 }

</bundles_post_ra>
